<compile_context>
chip_gen: v7x
topology: tpu7x:2x2x1
jax: 0.10.0
libtpu: 0.0.40
codegen_flags: <defaults>
</compile_context>

<pallas_src>
import functools

import jax
import jax.numpy as jnp
from jax.experimental import pallas as pl
from jax.experimental.pallas import tpu as pltpu

_VMEM = pl.BlockSpec(memory_space=pltpu.MemorySpace.VMEM)

# ----------------------------------------------------------------------------
# In-memory darknet cfg (parse_cfg normally reads a file; same parsing logic,
# fed from a string since no file IO is allowed).
# ----------------------------------------------------------------------------
CFG_TEXT = """
[net]
height=16
width=16
channels=3

[convolutional]
batch_normalize=1
filters=8
size=3
stride=1
pad=1
activation=leaky

[convolutional]
batch_normalize=1
filters=16
size=3
stride=2
pad=1
activation=leaky

[maxpool]
size=3
stride=1

[convolutional]
batch_normalize=1
filters=16
size=1
stride=1
pad=1
activation=leaky

[shortcut]
from=-2
activation=linear

[convolutional]
filters=27
size=1
stride=1
pad=1
activation=linear

[yolo]
mask=0,1,2
anchors=10,13,16,30,33,23
classes=4

[route]
layers=-3

[upsample]
stride=2

[route]
layers=-1,-9

[convolutional]
filters=27
size=1
stride=1
pad=1
activation=linear

[yolo]
mask=0,1,2
anchors=10,13,16,30,33,23
classes=4
"""


def parse_cfg_str(text):
    lines = [x for x in text.split("\n") if len(x) > 0]
    lines = [x for x in lines if x[0] != "#"]
    lines = [x.rstrip().lstrip() for x in lines]
    block, blocks = {}, []
    for line in lines:
        if line[0] == "[":
            if len(block) != 0:
                blocks.append(block)
                block = {}
            block["type"] = line[1:-1].rstrip()
        else:
            key, value = line.split("=")
            block[key.rstrip()] = value.lstrip()
    blocks.append(block)
    return blocks


# ----------------------------------------------------------------------------
# Pallas kernels
# ----------------------------------------------------------------------------
def _conv0_kernel(p0t_ref, w0t_ref, g0_ref, b0_ref, o_ref):
    # Transposed conv0:  (Cout, K) @ (K, M) -> (Cout, M)
    # BatchNorm (batch statistics, single pass) + LeakyReLU(0.1).
    # Output is (8, 512): cells on lanes -> lane-dense store.
    acc = jnp.dot(w0t_ref[...], p0t_ref[...], preferred_element_type=jnp.float32)
    m = acc.shape[1]
    s = jnp.sum(acc, axis=1, keepdims=True)
    ss = jnp.sum(acc * acc, axis=1, keepdims=True)
    mean = s * (1.0 / m)
    var = ss * (1.0 / m) - mean * mean              # biased var (torch train mode)
    y = (acc - mean) * jax.lax.rsqrt(var + 1e-5) * g0_ref[...] + b0_ref[...]
    o_ref[...] = jnp.where(y > 0, y, 0.1 * y)


def _tail_kernel(na, d_attr, nb, gh, gw, stride0, stride1, anchors0, anchors1,
                 p1_ref, a0t_ref,
                 w1_ref, g1_ref, b1_ref,
                 w3_ref, g3_ref, b3_ref,
                 w5t_ref, b5_ref,
                 w10at_ref, w10bt_ref, b10_ref,
                 off0_ref, off1_ref,
                 det0_ref, det1_ref):
    f32, bf16 = jnp.float32, jnp.bfloat16
    p0cols = nb * gh * gw                       # 128 cells (batch * 8 * 8)

    def bn_leaky(acc, gamma, beta):
        # single-pass batch statistics over rows (N*H*W)
        m = acc.shape[0]
        s = jnp.sum(acc, axis=0, keepdims=True)
        ss = jnp.sum(acc * acc, axis=0, keepdims=True)
        mean = s * (1.0 / m)
        var = ss * (1.0 / m) - mean * mean
        y = (acc - mean) * jax.lax.rsqrt(var + 1e-5) * gamma + beta
        return jnp.where(y > 0, y, 0.1 * y)

    # ---- conv1 (3x3, s2, from precomputed patches) + BN + LeakyReLU ---------
    acc1 = jnp.dot(p1_ref[...], w1_ref[...], preferred_element_type=f32)  # (128,16)
    act1 = bn_leaky(acc1, g1_ref[...], b1_ref[...])

    # ---- maxpool 3x3 s1 p1 (separable; replicate-edge == -inf pad for max) --
    # TODO(synk): specialised to size=3/stride=1 (what this cfg uses).
    c1 = act1.shape[1]
    x4 = act1.reshape(nb, gh, gw, c1)
    left = jnp.concatenate([x4[:, :, :1, :], x4[:, :, :-1, :]], axis=2)
    right = jnp.concatenate([x4[:, :, 1:, :], x4[:, :, -1:, :]], axis=2)
    wmax = jnp.maximum(jnp.maximum(left, x4), right)
    up = jnp.concatenate([wmax[:, :1], wmax[:, :-1]], axis=1)
    down = jnp.concatenate([wmax[:, 1:], wmax[:, -1:]], axis=1)
    mp = jnp.maximum(jnp.maximum(up, wmax), down).reshape(p0cols, c1)     # (128,16)

    # ---- conv3 (1x1) + BN + LeakyReLU, shortcut add --------------------------
    acc3 = jnp.dot(mp.astype(bf16), w3_ref[...], preferred_element_type=f32)
    act3 = bn_leaky(acc3, g3_ref[...], b3_ref[...])
    act4 = act3 + mp                                                      # (128,16)
    act4_b = act4.astype(bf16)

    a0t = a0t_ref[...]                              # (8, 4*p0cols) phase-ordered act0

    # A @ B^T contraction: (d_attr, C) x (cells, C) -> (d_attr, cells);
    # keeps the cell axis on lanes (lane-dense) without any in-kernel transpose.
    dn_t = (((1,), (1,)), ((), ()))

    def yolo_rows(p, off, stride, aw, ah):
        # p: (d_attr, P) raw predictions of one anchor; off: (2, P) grid offsets.
        xy = (jax.nn.sigmoid(p[0:2, :]) + off) * stride
        w = jnp.exp(p[2:3, :]) * aw
        h = jnp.exp(p[3:4, :]) * ah
        rest = jax.nn.sigmoid(p[4:d_attr, :])
        return jnp.concatenate([xy, w, h, rest], axis=0)

    off0 = off0_ref[...]
    for a in range(na):
        aw0, ah0 = anchors0[a]
        aw1, ah1 = anchors1[a]

        # head 0: conv5 (1x1 + bias, linear) for this anchor, transposed output
        p0a = jax.lax.dot_general(w5t_ref[a], act4_b, dn_t,
                                  preferred_element_type=f32) + b5_ref[a]  # (9,128)
        det0_ref[a, :, :] = yolo_rows(p0a, off0, stride0, aw0, ah0)

        # head 1: conv10 on [upsample2(act4), act0] == per-phase (act4@W10a + act0@W10b)
        za = jax.lax.dot_general(w10at_ref[a], act4_b, dn_t,
                                 preferred_element_type=f32)               # (9,128)
        qa = jnp.dot(w10bt_ref[a], a0t, preferred_element_type=f32)        # (9,512)
        ba = b10_ref[a]
        for ph in range(4):
            # 128-aligned lane slice (p0cols == 128 at this cfg/batch size)
            p1a = qa[:, ph * p0cols:(ph + 1) * p0cols] + za + ba
            det1_ref[a, ph, :, :] = yolo_rows(p1a, off1_ref[ph], stride1, aw1, ah1)


# ----------------------------------------------------------------------------
# JAX glue (pure data movement)
# ----------------------------------------------------------------------------
def _im2col(x, k, s, pad):
    # x: NHWC -> patches (N*Ho*Wo, k*k*Cin) ordered (kh, kw, cin)
    n, h, w, c = x.shape
    ho = (h + 2 * pad - k) // s + 1
    wo = (w + 2 * pad - k) // s + 1
    xp = jnp.pad(x, ((0, 0), (pad, pad), (pad, pad), (0, 0)))
    cols = []
    for di in range(k):
        for dj in range(k):
            cols.append(xp[:, di:di + (ho - 1) * s + 1:s, dj:dj + (wo - 1) * s + 1:s, :])
    pat = jnp.concatenate(cols, axis=-1)
    return pat.reshape(n * ho * wo, k * k * c), ho, wo


def _conv_wmat(w):
    # (Cout, Cin, k, k) PyTorch layout -> (k*k*Cin, Cout) with (kh, kw, cin) rows
    cout = w.shape[0]
    return jnp.transpose(w, (2, 3, 1, 0)).reshape(-1, cout)


# ----------------------------------------------------------------------------
# Darknet: deterministic parameter construction + fused forward
# ----------------------------------------------------------------------------
def init_params(blocks, key):
    prev_filters = 3
    output_filters = []
    params = []
    for idx, b in enumerate(blocks[1:]):
        t = b["type"]
        p = {}
        if t == "convolutional":
            filters = int(b["filters"])
            k = int(b["size"])
            s = int(b["stride"])
            pad = (k - 1) // 2 if int(b["pad"]) else 0
            bn = int(b.get("batch_normalize", 0))
            key, k1, k2, k3 = jax.random.split(key, 4)
            p = dict(
                w=0.1 * jax.random.normal(k1, (filters, prev_filters, k, k), jnp.float32),
                k=k, s=s, pad=pad, bn=bn, act=b["activation"])
            if bn:
                p["gamma"] = 1.0 + 0.1 * jax.random.normal(k2, (filters,), jnp.float32)
                p["beta"] = 0.1 * jax.random.normal(k3, (filters,), jnp.float32)
            else:
                p["b"] = 0.1 * jax.random.normal(k2, (filters,), jnp.float32)
        elif t == "route":
            layers = [int(a) for a in b["layers"].split(",")]
            filters = sum(output_filters[l] if l > 0 else output_filters[idx + l]
                          for l in layers)
        elif t == "shortcut":
            filters = output_filters[-1]
        elif t in ("upsample", "maxpool"):
            filters = prev_filters
        elif t == "yolo":
            mask = [int(v) for v in b["mask"].split(",")]
            anch = [int(v) for v in b["anchors"].split(",")]
            anch = [(anch[i], anch[i + 1]) for i in range(0, len(anch), 2)]
            p = dict(anchors=[anch[i] for i in mask], classes=int(b["classes"]))
            filters = prev_filters
        params.append(p)
        prev_filters = filters
        output_filters.append(filters)
    return params


def darknet_forward(blocks, params, x_nchw):
    # Fused forward pass, specialised to this cfg's topology (2 pallas_calls).
    # TODO(synk): generic cfg-graph interpreter (arbitrary topologies) not ported.
    f32, bf16 = jnp.float32, jnp.bfloat16
    inp_dim = int(blocks[0]["height"])
    x = jnp.transpose(x_nchw, (0, 2, 3, 1)).astype(f32)            # NCHW -> NHWC
    n = x.shape[0]

    p0, p1c, p3c, p5c, p10c = params[0], params[1], params[3], params[5], params[10]
    yolo0, yolo1 = params[6], params[11]
    d_attr = 5 + int(yolo0["classes"])                             # 9
    na = len(yolo0["anchors"])                                     # 3

    # ---- Kernel 1: conv0 (3x3 s1 p1) + BN + leaky, lane-dense output --------
    pat0, fh, fw = _im2col(x, p0["k"], p0["s"], p0["pad"])         # (512, 27)
    w0t = _conv_wmat(p0["w"]).T.astype(bf16)                       # (8, 27)
    c0 = w0t.shape[0]
    act0_t = pl.pallas_call(
        _conv0_kernel,
        out_shape=jax.ShapeDtypeStruct((c0, pat0.shape[0]), f32),
        in_specs=[_VMEM] * 4,
        out_specs=_VMEM,
    )(pat0.T.astype(bf16), w0t,
      p0["gamma"].reshape(-1, 1), p0["beta"].reshape(-1, 1))
    act0 = jnp.transpose(act0_t.reshape(c0, n, fh, fw), (1, 2, 3, 0))  # (2,16,16,8)

    # ---- glue: patches for conv1 (3x3 s2) and phase-reordered act0 -----------
    pat1, gh, gw = _im2col(act0, p1c["k"], p1c["s"], p1c["pad"])   # (128, 72), grid 8x8
    p0cols = n * gh * gw                                           # 128
    # act0 columns ordered [phase(py,px), batch, by, bx] so the upsampled-act4
    # term of conv10 is a 128-aligned lane tile per phase inside the kernel.
    a0_ph = act0.reshape(n, gh, 2, gw, 2, c0)                      # (b, by, py, bx, px, c)
    a0_ph = jnp.transpose(a0_ph, (2, 4, 0, 1, 3, 5))               # (py, px, b, by, bx, c)
    a0_ph_t = a0_ph.reshape(4 * p0cols, c0).T.astype(bf16)         # (8, 512)

    # ---- glue: lane-dense YOLO grid-offset constants -------------------------
    idx = jnp.arange(p0cols)
    cx = (idx % gw).astype(f32)
    cy = ((idx // gw) % gh).astype(f32)
    off0 = jnp.stack([cx, cy], axis=0)                             # (2, 128)
    offs1 = []
    for py in range(2):
        for px in range(2):
            offs1.append(jnp.stack([2.0 * cx + px, 2.0 * cy + py], axis=0))
    off1 = jnp.stack(offs1, axis=0)                                # (4, 2, 128)
    stride0 = float(inp_dim // gh)                                 # 2.0
    stride1 = float(inp_dim // (2 * gh))                           # 1.0

    # ---- glue: weights in matmul-friendly (bf16) layouts ---------------------
    w1m = _conv_wmat(p1c["w"]).astype(bf16)                        # (72, 16)
    w3m = _conv_wmat(p3c["w"]).astype(bf16)                        # (16, 16)
    c1 = w1m.shape[1]

    w5m = _conv_wmat(p5c["w"])                                     # (16, 27)
    w5t = w5m.T.reshape(na, d_attr, c1).astype(bf16)               # (3, 9, 16)
    b5 = p5c["b"].reshape(na, d_attr, 1).astype(f32)

    w10m = _conv_wmat(p10c["w"])                                   # (24, 27)  [up(16) ; act0(8)]
    w10at = w10m[:c1].T.reshape(na, d_attr, c1).astype(bf16)       # (3, 9, 16)
    w10bt = w10m[c1:].T.reshape(na, d_attr, c0).astype(bf16)       # (3, 9, 8)
    b10 = p10c["b"].reshape(na, d_attr, 1).astype(f32)

    anchors0 = tuple((float(a), float(b)) for a, b in yolo0["anchors"])
    anchors1 = tuple((float(a), float(b)) for a, b in yolo1["anchors"])

    # ---- Kernel 2: conv1 -> maxpool -> conv3 -> shortcut -> both YOLO heads --
    kern = functools.partial(_tail_kernel, na, d_attr, n, gh, gw,
                             stride0, stride1, anchors0, anchors1)
    det0_t, det1_t = pl.pallas_call(
        kern,
        out_shape=(jax.ShapeDtypeStruct((na, d_attr, p0cols), f32),
                   jax.ShapeDtypeStruct((na, 4, d_attr, p0cols), f32)),
        in_specs=[_VMEM] * 15,
        out_specs=(_VMEM, _VMEM),
    )(pat1.astype(bf16), a0_ph_t,
      w1m, p1c["gamma"].reshape(1, -1), p1c["beta"].reshape(1, -1),
      w3m, p3c["gamma"].reshape(1, -1), p3c["beta"].reshape(1, -1),
      w5t, b5, w10at, w10bt, b10, off0, off1)

    # ---- glue: back to the reference detection layout (B, cells*anchors, D) --
    det0 = jnp.transpose(det0_t.reshape(na, d_attr, n, gh, gw),
                         (2, 3, 4, 0, 1)).reshape(n, gh * gw * na, d_attr)
    det1 = jnp.transpose(det1_t.reshape(na, 2, 2, d_attr, n, gh, gw),
                         (4, 5, 1, 6, 2, 0, 3)).reshape(n, 4 * gh * gw * na, d_attr)
    return jnp.concatenate([det0, det1], axis=1)
    # TODO(synk): load_weights (.weights binary parsing) intentionally not ported.


if __name__ == "__main__":
    blocks = parse_cfg_str(CFG_TEXT)
    key = jax.random.PRNGKey(0)
    key, pkey, xkey = jax.random.split(key, 3)
    params = init_params(blocks, pkey)

    # Input matches the [net] block: batch=2, channels=3, height=width=16 (NCHW).
    x = jax.random.normal(xkey, (2, 3, 16, 16), jnp.float32)

    fwd = jax.jit(lambda inp: darknet_forward(blocks, params, inp))
    det = jax.block_until_ready(fwd(x))

    expected = (2, 8 * 8 * 3 + 16 * 16 * 3, 5 + 4)   # (2, 960, 9)
    assert det.shape == expected, det.shape
    assert bool(jnp.all(jnp.isfinite(det)))
    print("KERNEL_OK")
</pallas_src>

<mosaic_0001>
module attributes {stable_mosaic.version = 11 : i64} {
  func.func @_conv0_kernel(%arg0: memref<27x512xbf16, #tpu.memory_space<vmem>>, %arg1: memref<8x27xbf16, #tpu.memory_space<vmem>>, %arg2: memref<8x1xf32, #tpu.memory_space<vmem>>, %arg3: memref<8x1xf32, #tpu.memory_space<vmem>>, %arg4: memref<8x512xf32, #tpu.memory_space<vmem>>) attributes {dimension_semantics = [], scalar_prefetch = 0 : i64, scratch_operands = 0 : i64, tpu.core_type = #tpu.core_type<tc>} {
    %c0 = arith.constant 0 : index
    %c0_0 = arith.constant 0 : index
    %0 = vector.load %arg1[%c0, %c0_0] : memref<8x27xbf16, #tpu.memory_space<vmem>>, vector<8x27xbf16>
    %c0_1 = arith.constant 0 : index
    %c0_2 = arith.constant 0 : index
    %1 = vector.load %arg0[%c0_1, %c0_2] : memref<27x512xbf16, #tpu.memory_space<vmem>>, vector<27x512xbf16>
    %cst = arith.constant dense<0.000000e+00> : vector<8x512xf32>
    %2 = tpu.matmul %0, %1, %cst {dimension_numbers = #tpu.dot_dimension_numbers<[1], [0], [0], [1], [0, 0, 1, 1], [], []>} : vector<8x27xbf16>, vector<27x512xbf16>, vector<8x512xf32> -> vector<8x512xf32>
    %cst_3 = arith.constant dense<0.000000e+00> : vector<8xf32>
    %3 = vector.multi_reduction <add>, %2, %cst_3 [1] : vector<8x512xf32> to vector<8xf32>
    %4 = vector.shape_cast %3 : vector<8xf32> to vector<8x1xf32>
    %5 = arith.mulf %2, %2 : vector<8x512xf32>
    %cst_4 = arith.constant dense<0.000000e+00> : vector<8xf32>
    %6 = vector.multi_reduction <add>, %5, %cst_4 [1] : vector<8x512xf32> to vector<8xf32>
    %7 = vector.shape_cast %6 : vector<8xf32> to vector<8x1xf32>
    %cst_5 = arith.constant 0.001953125 : f32
    %8 = vector.broadcast %cst_5 : f32 to vector<8x1xf32>
    %9 = arith.mulf %4, %8 : vector<8x1xf32>
    %cst_6 = arith.constant 0.001953125 : f32
    %10 = vector.broadcast %cst_6 : f32 to vector<8x1xf32>
    %11 = arith.mulf %7, %10 : vector<8x1xf32>
    %12 = arith.mulf %9, %9 : vector<8x1xf32>
    %13 = arith.subf %11, %12 : vector<8x1xf32>
    %14 = vector.broadcast %9 : vector<8x1xf32> to vector<8x512xf32>
    %15 = arith.subf %2, %14 : vector<8x512xf32>
    %cst_7 = arith.constant 9.99999974E-6 : f32
    %16 = vector.broadcast %cst_7 : f32 to vector<8x1xf32>
    %17 = arith.addf %13, %16 : vector<8x1xf32>
    %18 = math.rsqrt %17 : vector<8x1xf32>
    %19 = vector.broadcast %18 : vector<8x1xf32> to vector<8x512xf32>
    %20 = arith.mulf %15, %19 : vector<8x512xf32>
    %c0_8 = arith.constant 0 : index
    %c0_9 = arith.constant 0 : index
    %21 = vector.load %arg2[%c0_8, %c0_9] : memref<8x1xf32, #tpu.memory_space<vmem>>, vector<8x1xf32>
    %22 = vector.broadcast %21 : vector<8x1xf32> to vector<8x512xf32>
    %23 = arith.mulf %20, %22 : vector<8x512xf32>
    %c0_10 = arith.constant 0 : index
    %c0_11 = arith.constant 0 : index
    %24 = vector.load %arg3[%c0_10, %c0_11] : memref<8x1xf32, #tpu.memory_space<vmem>>, vector<8x1xf32>
    %25 = vector.broadcast %24 : vector<8x1xf32> to vector<8x512xf32>
    %26 = arith.addf %23, %25 : vector<8x512xf32>
    %cst_12 = arith.constant 0.000000e+00 : f32
    %27 = vector.broadcast %cst_12 : f32 to vector<8x512xf32>
    %28 = arith.cmpf ogt, %26, %27 : vector<8x512xf32>
    %cst_13 = arith.constant 1.000000e-01 : f32
    %29 = vector.broadcast %cst_13 : f32 to vector<8x512xf32>
    %30 = arith.mulf %29, %26 : vector<8x512xf32>
    %31 = arith.select %28, %26, %30 : vector<8x512xi1>, vector<8x512xf32>
    %c0_14 = arith.constant 0 : index
    %c0_15 = arith.constant 0 : index
    %32 = vector.load %arg4[%c0_14, %c0_15] : memref<8x512xf32, #tpu.memory_space<vmem>>, vector<8x512xf32>
    tpu.vector_store %arg4[%c0_14, %c0_15], %31 {strides = array<i32>} : memref<8x512xf32, #tpu.memory_space<vmem>>, vector<8x512xf32>,
    return
  }
}

module attributes {stable_mosaic.version = 11 : i64} {
  func.func @_tail_kernel(%arg0: memref<128x72xbf16, #tpu.memory_space<vmem>>, %arg1: memref<8x512xbf16, #tpu.memory_space<vmem>>, %arg2: memref<72x16xbf16, #tpu.memory_space<vmem>>, %arg3: memref<1x16xf32, #tpu.memory_space<vmem>>, %arg4: memref<1x16xf32, #tpu.memory_space<vmem>>, %arg5: memref<16x16xbf16, #tpu.memory_space<vmem>>, %arg6: memref<1x16xf32, #tpu.memory_space<vmem>>, %arg7: memref<1x16xf32, #tpu.memory_space<vmem>>, %arg8: memref<3x9x16xbf16, #tpu.memory_space<vmem>>, %arg9: memref<3x9x1xf32, #tpu.memory_space<vmem>>, %arg10: memref<3x9x16xbf16, #tpu.memory_space<vmem>>, %arg11: memref<3x9x8xbf16, #tpu.memory_space<vmem>>, %arg12: memref<3x9x1xf32, #tpu.memory_space<vmem>>, %arg13: memref<2x128xf32, #tpu.memory_space<vmem>>, %arg14: memref<4x2x128xf32, #tpu.memory_space<vmem>>, %arg15: memref<3x9x128xf32, #tpu.memory_space<vmem>>, %arg16: memref<3x4x9x128xf32, #tpu.memory_space<vmem>>) attributes {dimension_semantics = [], scalar_prefetch = 0 : i64, scratch_operands = 0 : i64, tpu.core_type = #tpu.core_type<tc>} {
    %c0 = arith.constant 0 : index
    %c0_0 = arith.constant 0 : index
    %0 = vector.load %arg0[%c0, %c0_0] : memref<128x72xbf16, #tpu.memory_space<vmem>>, vector<128x72xbf16>
    %c0_1 = arith.constant 0 : index
    %c0_2 = arith.constant 0 : index
    %1 = vector.load %arg2[%c0_1, %c0_2] : memref<72x16xbf16, #tpu.memory_space<vmem>>, vector<72x16xbf16>
    %cst = arith.constant dense<0.000000e+00> : vector<128x16xf32>
    %2 = tpu.matmul %0, %1, %cst {dimension_numbers = #tpu.dot_dimension_numbers<[1], [0], [0], [1], [0, 0, 1, 1], [], []>} : vector<128x72xbf16>, vector<72x16xbf16>, vector<128x16xf32> -> vector<128x16xf32>
    %c0_3 = arith.constant 0 : index
    %c0_4 = arith.constant 0 : index
    %3 = vector.load %arg3[%c0_3, %c0_4] : memref<1x16xf32, #tpu.memory_space<vmem>>, vector<1x16xf32>
    %c0_5 = arith.constant 0 : index
    %c0_6 = arith.constant 0 : index
    %4 = vector.load %arg4[%c0_5, %c0_6] : memref<1x16xf32, #tpu.memory_space<vmem>>, vector<1x16xf32>
    %cst_7 = arith.constant dense<0.000000e+00> : vector<16xf32>
    %5 = vector.multi_reduction <add>, %2, %cst_7 [0] : vector<128x16xf32> to vector<16xf32>
    %6 = vector.shape_cast %5 : vector<16xf32> to vector<1x16xf32>
    %7 = arith.mulf %2, %2 : vector<128x16xf32>
    %cst_8 = arith.constant dense<0.000000e+00> : vector<16xf32>
    %8 = vector.multi_reduction <add>, %7, %cst_8 [0] : vector<128x16xf32> to vector<16xf32>
    %9 = vector.shape_cast %8 : vector<16xf32> to vector<1x16xf32>
    %cst_9 = arith.constant 7.812500e-03 : f32
    %10 = vector.broadcast %cst_9 : f32 to vector<1x16xf32>
    %11 = arith.mulf %6, %10 : vector<1x16xf32>
    %cst_10 = arith.constant 7.812500e-03 : f32
    %12 = vector.broadcast %cst_10 : f32 to vector<1x16xf32>
    %13 = arith.mulf %9, %12 : vector<1x16xf32>
    %14 = arith.mulf %11, %11 : vector<1x16xf32>
    %15 = arith.subf %13, %14 : vector<1x16xf32>
    %16 = vector.broadcast %11 : vector<1x16xf32> to vector<128x16xf32>
    %17 = arith.subf %2, %16 : vector<128x16xf32>
    %cst_11 = arith.constant 9.99999974E-6 : f32
    %18 = vector.broadcast %cst_11 : f32 to vector<1x16xf32>
    %19 = arith.addf %15, %18 : vector<1x16xf32>
    %20 = math.rsqrt %19 : vector<1x16xf32>
    %21 = vector.broadcast %20 : vector<1x16xf32> to vector<128x16xf32>
    %22 = arith.mulf %17, %21 : vector<128x16xf32>
    %23 = vector.broadcast %3 : vector<1x16xf32> to vector<128x16xf32>
    %24 = arith.mulf %22, %23 : vector<128x16xf32>
    %25 = vector.broadcast %4 : vector<1x16xf32> to vector<128x16xf32>
    %26 = arith.addf %24, %25 : vector<128x16xf32>
    %cst_12 = arith.constant 0.000000e+00 : f32
    %27 = vector.broadcast %cst_12 : f32 to vector<128x16xf32>
    %28 = arith.cmpf ogt, %26, %27 : vector<128x16xf32>
    %cst_13 = arith.constant 1.000000e-01 : f32
    %29 = vector.broadcast %cst_13 : f32 to vector<128x16xf32>
    %30 = arith.mulf %29, %26 : vector<128x16xf32>
    %31 = arith.select %28, %26, %30 : vector<128x16xi1>, vector<128x16xf32>
    %32 = vector.shape_cast %31 : vector<128x16xf32> to vector<2x8x8x16xf32>
    %33 = vector.extract_strided_slice %32 {offsets = [0, 0, 0, 0], sizes = [2, 8, 1, 16], strides = [1, 1, 1, 1]} : vector<2x8x8x16xf32> to vector<2x8x1x16xf32>
    %34 = vector.extract_strided_slice %32 {offsets = [0, 0, 0, 0], sizes = [2, 8, 7, 16], strides = [1, 1, 1, 1]} : vector<2x8x8x16xf32> to vector<2x8x7x16xf32>
    %35 = tpu.concatenate %33, %34 in 2 : vector<2x8x1x16xf32>, vector<2x8x7x16xf32> -> vector<2x8x8x16xf32>
    %36 = vector.extract_strided_slice %32 {offsets = [0, 0, 1, 0], sizes = [2, 8, 7, 16], strides = [1, 1, 1, 1]} : vector<2x8x8x16xf32> to vector<2x8x7x16xf32>
    %37 = vector.extract_strided_slice %32 {offsets = [0, 0, 7, 0], sizes = [2, 8, 1, 16], strides = [1, 1, 1, 1]} : vector<2x8x8x16xf32> to vector<2x8x1x16xf32>
    %38 = tpu.concatenate %36, %37 in 2 : vector<2x8x7x16xf32>, vector<2x8x1x16xf32> -> vector<2x8x8x16xf32>
    %39 = arith.maximumf %35, %32 : vector<2x8x8x16xf32>
    %40 = arith.maximumf %39, %38 : vector<2x8x8x16xf32>
    %41 = vector.extract_strided_slice %40 {offsets = [0, 0, 0, 0], sizes = [2, 1, 8, 16], strides = [1, 1, 1, 1]} : vector<2x8x8x16xf32> to vector<2x1x8x16xf32>
    %42 = vector.extract_strided_slice %40 {offsets = [0, 0, 0, 0], sizes = [2, 7, 8, 16], strides = [1, 1, 1, 1]} : vector<2x8x8x16xf32> to vector<2x7x8x16xf32>
    %43 = tpu.concatenate %41, %42 in 1 : vector<2x1x8x16xf32>, vector<2x7x8x16xf32> -> vector<2x8x8x16xf32>
    %44 = vector.extract_strided_slice %40 {offsets = [0, 1, 0, 0], sizes = [2, 7, 8, 16], strides = [1, 1, 1, 1]} : vector<2x8x8x16xf32> to vector<2x7x8x16xf32>
    %45 = vector.extract_strided_slice %40 {offsets = [0, 7, 0, 0], sizes = [2, 1, 8, 16], strides = [1, 1, 1, 1]} : vector<2x8x8x16xf32> to vector<2x1x8x16xf32>
    %46 = tpu.concatenate %44, %45 in 1 : vector<2x7x8x16xf32>, vector<2x1x8x16xf32> -> vector<2x8x8x16xf32>
    %47 = arith.maximumf %43, %40 : vector<2x8x8x16xf32>
    %48 = arith.maximumf %47, %46 : vector<2x8x8x16xf32>
    %49 = vector.shape_cast %48 : vector<2x8x8x16xf32> to vector<128x16xf32>
    %50 = arith.truncf %49 : vector<128x16xf32> to vector<128x16xbf16>
    %c0_14 = arith.constant 0 : index
    %c0_15 = arith.constant 0 : index
    %51 = vector.load %arg5[%c0_14, %c0_15] : memref<16x16xbf16, #tpu.memory_space<vmem>>, vector<16x16xbf16>
    %cst_16 = arith.constant dense<0.000000e+00> : vector<128x16xf32>
    %52 = tpu.matmul %50, %51, %cst_16 {dimension_numbers = #tpu.dot_dimension_numbers<[1], [0], [0], [1], [0, 0, 1, 1], [], []>} : vector<128x16xbf16>, vector<16x16xbf16>, vector<128x16xf32> -> vector<128x16xf32>
    %c0_17 = arith.constant 0 : index
    %c0_18 = arith.constant 0 : index
    %53 = vector.load %arg6[%c0_17, %c0_18] : memref<1x16xf32, #tpu.memory_space<vmem>>, vector<1x16xf32>
    %c0_19 = arith.constant 0 : index
    %c0_20 = arith.constant 0 : index
    %54 = vector.load %arg7[%c0_19, %c0_20] : memref<1x16xf32, #tpu.memory_space<vmem>>, vector<1x16xf32>
    %cst_21 = arith.constant dense<0.000000e+00> : vector<16xf32>
    %55 = vector.multi_reduction <add>, %52, %cst_21 [0] : vector<128x16xf32> to vector<16xf32>
    %56 = vector.shape_cast %55 : vector<16xf32> to vector<1x16xf32>
    %57 = arith.mulf %52, %52 : vector<128x16xf32>
    %cst_22 = arith.constant dense<0.000000e+00> : vector<16xf32>
    %58 = vector.multi_reduction <add>, %57, %cst_22 [0] : vector<128x16xf32> to vector<16xf32>
    %59 = vector.shape_cast %58 : vector<16xf32> to vector<1x16xf32>
    %cst_23 = arith.constant 7.812500e-03 : f32
    %60 = vector.broadcast %cst_23 : f32 to vector<1x16xf32>
    %61 = arith.mulf %56, %60 : vector<1x16xf32>
    %cst_24 = arith.constant 7.812500e-03 : f32
    %62 = vector.broadcast %cst_24 : f32 to vector<1x16xf32>
    %63 = arith.mulf %59, %62 : vector<1x16xf32>
    %64 = arith.mulf %61, %61 : vector<1x16xf32>
    %65 = arith.subf %63, %64 : vector<1x16xf32>
    %66 = vector.broadcast %61 : vector<1x16xf32> to vector<128x16xf32>
    %67 = arith.subf %52, %66 : vector<128x16xf32>
    %cst_25 = arith.constant 9.99999974E-6 : f32
    %68 = vector.broadcast %cst_25 : f32 to vector<1x16xf32>
    %69 = arith.addf %65, %68 : vector<1x16xf32>
    %70 = math.rsqrt %69 : vector<1x16xf32>
    %71 = vector.broadcast %70 : vector<1x16xf32> to vector<128x16xf32>
    %72 = arith.mulf %67, %71 : vector<128x16xf32>
    %73 = vector.broadcast %53 : vector<1x16xf32> to vector<128x16xf32>
    %74 = arith.mulf %72, %73 : vector<128x16xf32>
    %75 = vector.broadcast %54 : vector<1x16xf32> to vector<128x16xf32>
    %76 = arith.addf %74, %75 : vector<128x16xf32>
    %cst_26 = arith.constant 0.000000e+00 : f32
    %77 = vector.broadcast %cst_26 : f32 to vector<128x16xf32>
    %78 = arith.cmpf ogt, %76, %77 : vector<128x16xf32>
    %cst_27 = arith.constant 1.000000e-01 : f32
    %79 = vector.broadcast %cst_27 : f32 to vector<128x16xf32>
    %80 = arith.mulf %79, %76 : vector<128x16xf32>
    %81 = arith.select %78, %76, %80 : vector<128x16xi1>, vector<128x16xf32>
    %82 = arith.addf %81, %49 : vector<128x16xf32>
    %83 = arith.truncf %82 : vector<128x16xf32> to vector<128x16xbf16>
    %c0_28 = arith.constant 0 : index
    %c0_29 = arith.constant 0 : index
    %84 = vector.load %arg1[%c0_28, %c0_29] : memref<8x512xbf16, #tpu.memory_space<vmem>>, vector<8x512xbf16>
    %c0_30 = arith.constant 0 : index
    %c0_31 = arith.constant 0 : index
    %85 = vector.load %arg13[%c0_30, %c0_31] : memref<2x128xf32, #tpu.memory_space<vmem>>, vector<2x128xf32>
    %c0_32 = arith.constant 0 : index
    %c0_33 = arith.constant 0 : index
    %c0_34 = arith.constant 0 : index
    %86 = vector.load %arg8[%c0_32, %c0_33, %c0_34] : memref<3x9x16xbf16, #tpu.memory_space<vmem>>, vector<1x9x16xbf16>
    %87 = vector.shape_cast %86 : vector<1x9x16xbf16> to vector<9x16xbf16>
    %cst_35 = arith.constant dense<0.000000e+00> : vector<9x128xf32>
    %88 = tpu.matmul %87, %83, %cst_35 {dimension_numbers = #tpu.dot_dimension_numbers<[1], [1], [0], [0], [0, 0, 1, 0], [], []>} : vector<9x16xbf16>, vector<128x16xbf16>, vector<9x128xf32> -> vector<9x128xf32>
    %c0_36 = arith.constant 0 : index
    %c0_37 = arith.constant 0 : index
    %c0_38 = arith.constant 0 : index
    %89 = vector.load %arg9[%c0_36, %c0_37, %c0_38] : memref<3x9x1xf32, #tpu.memory_space<vmem>>, vector<1x9x1xf32>
    %90 = vector.shape_cast %89 : vector<1x9x1xf32> to vector<9x1xf32>
    %91 = vector.broadcast %90 : vector<9x1xf32> to vector<9x128xf32>
    %92 = arith.addf %88, %91 : vector<9x128xf32>
    %93 = vector.extract_strided_slice %92 {offsets = [0, 0], sizes = [2, 128], strides = [1, 1]} : vector<9x128xf32> to vector<2x128xf32>
    %94 = arith.negf %93 : vector<2x128xf32>
    %95 = math.exp %94 : vector<2x128xf32>
    %cst_39 = arith.constant 1.000000e+00 : f32
    %96 = vector.broadcast %cst_39 : f32 to vector<2x128xf32>
    %97 = arith.addf %96, %95 : vector<2x128xf32>
    %98 = arith.divf %96, %97 : vector<2x128xf32>
    %99 = arith.addf %98, %85 : vector<2x128xf32>
    %cst_40 = arith.constant 2.000000e+00 : f32
    %100 = vector.broadcast %cst_40 : f32 to vector<2x128xf32>
    %101 = arith.mulf %99, %100 : vector<2x128xf32>
    %102 = vector.extract_strided_slice %92 {offsets = [2, 0], sizes = [1, 128], strides = [1, 1]} : vector<9x128xf32> to vector<1x128xf32>
    %103 = math.exp %102 : vector<1x128xf32>
    %cst_41 = arith.constant 1.000000e+01 : f32
    %104 = vector.broadcast %cst_41 : f32 to vector<1x128xf32>
    %105 = arith.mulf %103, %104 : vector<1x128xf32>
    %106 = vector.extract_strided_slice %92 {offsets = [3, 0], sizes = [1, 128], strides = [1, 1]} : vector<9x128xf32> to vector<1x128xf32>
    %107 = math.exp %106 : vector<1x128xf32>
    %cst_42 = arith.constant 1.300000e+01 : f32
    %108 = vector.broadcast %cst_42 : f32 to vector<1x128xf32>
    %109 = arith.mulf %107, %108 : vector<1x128xf32>
    %110 = vector.extract_strided_slice %92 {offsets = [4, 0], sizes = [5, 128], strides = [1, 1]} : vector<9x128xf32> to vector<5x128xf32>
    %111 = arith.negf %110 : vector<5x128xf32>
    %112 = math.exp %111 : vector<5x128xf32>
    %cst_43 = arith.constant 1.000000e+00 : f32
    %113 = vector.broadcast %cst_43 : f32 to vector<5x128xf32>
    %114 = arith.addf %113, %112 : vector<5x128xf32>
    %115 = arith.divf %113, %114 : vector<5x128xf32>
    %116 = tpu.concatenate %101, %105, %109, %115 in 0 : vector<2x128xf32>, vector<1x128xf32>, vector<1x128xf32>, vector<5x128xf32> -> vector<9x128xf32>
    %c0_44 = arith.constant 0 : index
    %c0_45 = arith.constant 0 : index
    %c0_46 = arith.constant 0 : index
    %117 = vector.load %arg15[%c0_44, %c0_45, %c0_46] : memref<3x9x128xf32, #tpu.memory_space<vmem>>, vector<1x9x128xf32>
    %118 = vector.shape_cast %117 : vector<1x9x128xf32> to vector<9x128xf32>
    %119 = vector.shape_cast %116 : vector<9x128xf32> to vector<1x9x128xf32>
    tpu.vector_store %arg15[%c0_44, %c0_45, %c0_46], %119 {strides = array<i32>} : memref<3x9x128xf32, #tpu.memory_space<vmem>>, vector<1x9x128xf32>,
    %c0_47 = arith.constant 0 : index
    %c0_48 = arith.constant 0 : index
    %c0_49 = arith.constant 0 : index
    %120 = vector.load %arg10[%c0_47, %c0_48, %c0_49] : memref<3x9x16xbf16, #tpu.memory_space<vmem>>, vector<1x9x16xbf16>
    %121 = vector.shape_cast %120 : vector<1x9x16xbf16> to vector<9x16xbf16>
    %cst_50 = arith.constant dense<0.000000e+00> : vector<9x128xf32>
    %122 = tpu.matmul %121, %83, %cst_50 {dimension_numbers = #tpu.dot_dimension_numbers<[1], [1], [0], [0], [0, 0, 1, 0], [], []>} : vector<9x16xbf16>, vector<128x16xbf16>, vector<9x128xf32> -> vector<9x128xf32>
    %c0_51 = arith.constant 0 : index
    %c0_52 = arith.constant 0 : index
    %c0_53 = arith.constant 0 : index
    %123 = vector.load %arg11[%c0_51, %c0_52, %c0_53] : memref<3x9x8xbf16, #tpu.memory_space<vmem>>, vector<1x9x8xbf16>
    %124 = vector.shape_cast %123 : vector<1x9x8xbf16> to vector<9x8xbf16>
    %cst_54 = arith.constant dense<0.000000e+00> : vector<9x512xf32>
    %125 = tpu.matmul %124, %84, %cst_54 {dimension_numbers = #tpu.dot_dimension_numbers<[1], [0], [0], [1], [0, 0, 1, 1], [], []>} : vector<9x8xbf16>, vector<8x512xbf16>, vector<9x512xf32> -> vector<9x512xf32>
    %c0_55 = arith.constant 0 : index
    %c0_56 = arith.constant 0 : index
    %c0_57 = arith.constant 0 : index
    %126 = vector.load %arg12[%c0_55, %c0_56, %c0_57] : memref<3x9x1xf32, #tpu.memory_space<vmem>>, vector<1x9x1xf32>
    %127 = vector.shape_cast %126 : vector<1x9x1xf32> to vector<9x1xf32>
    %128 = vector.extract_strided_slice %125 {offsets = [0, 0], sizes = [9, 128], strides = [1, 1]} : vector<9x512xf32> to vector<9x128xf32>
    %129 = arith.addf %128, %122 : vector<9x128xf32>
    %130 = vector.broadcast %127 : vector<9x1xf32> to vector<9x128xf32>
    %131 = arith.addf %129, %130 : vector<9x128xf32>
    %c0_58 = arith.constant 0 : index
    %c0_59 = arith.constant 0 : index
    %c0_60 = arith.constant 0 : index
    %132 = vector.load %arg14[%c0_58, %c0_59, %c0_60] : memref<4x2x128xf32, #tpu.memory_space<vmem>>, vector<1x2x128xf32>
    %133 = vector.shape_cast %132 : vector<1x2x128xf32> to vector<2x128xf32>
    %134 = vector.extract_strided_slice %131 {offsets = [0, 0], sizes = [2, 128], strides = [1, 1]} : vector<9x128xf32> to vector<2x128xf32>
    %135 = arith.negf %134 : vector<2x128xf32>
    %136 = math.exp %135 : vector<2x128xf32>
    %cst_61 = arith.constant 1.000000e+00 : f32
    %137 = vector.broadcast %cst_61 : f32 to vector<2x128xf32>
    %138 = arith.addf %137, %136 : vector<2x128xf32>
    %139 = arith.divf %137, %138 : vector<2x128xf32>
    %140 = arith.addf %139, %133 : vector<2x128xf32>
    %cst_62 = arith.constant 1.000000e+00 : f32
    %141 = vector.broadcast %cst_62 : f32 to vector<2x128xf32>
    %142 = arith.mulf %140, %141 : vector<2x128xf32>
    %143 = vector.extract_strided_slice %131 {offsets = [2, 0], sizes = [1, 128], strides = [1, 1]} : vector<9x128xf32> to vector<1x128xf32>
    %144 = math.exp %143 : vector<1x128xf32>
    %cst_63 = arith.constant 1.000000e+01 : f32
    %145 = vector.broadcast %cst_63 : f32 to vector<1x128xf32>
    %146 = arith.mulf %144, %145 : vector<1x128xf32>
    %147 = vector.extract_strided_slice %131 {offsets = [3, 0], sizes = [1, 128], strides = [1, 1]} : vector<9x128xf32> to vector<1x128xf32>
    %148 = math.exp %147 : vector<1x128xf32>
    %cst_64 = arith.constant 1.300000e+01 : f32
    %149 = vector.broadcast %cst_64 : f32 to vector<1x128xf32>
    %150 = arith.mulf %148, %149 : vector<1x128xf32>
    %151 = vector.extract_strided_slice %131 {offsets = [4, 0], sizes = [5, 128], strides = [1, 1]} : vector<9x128xf32> to vector<5x128xf32>
    %152 = arith.negf %151 : vector<5x128xf32>
    %153 = math.exp %152 : vector<5x128xf32>
    %cst_65 = arith.constant 1.000000e+00 : f32
    %154 = vector.broadcast %cst_65 : f32 to vector<5x128xf32>
    %155 = arith.addf %154, %153 : vector<5x128xf32>
    %156 = arith.divf %154, %155 : vector<5x128xf32>
    %157 = tpu.concatenate %142, %146, %150, %156 in 0 : vector<2x128xf32>, vector<1x128xf32>, vector<1x128xf32>, vector<5x128xf32> -> vector<9x128xf32>
    %c0_66 = arith.constant 0 : index
    %c0_67 = arith.constant 0 : index
    %c0_68 = arith.constant 0 : index
    %c0_69 = arith.constant 0 : index
    %158 = vector.load %arg16[%c0_66, %c0_67, %c0_68, %c0_69] : memref<3x4x9x128xf32, #tpu.memory_space<vmem>>, vector<1x1x9x128xf32>
    %159 = vector.shape_cast %158 : vector<1x1x9x128xf32> to vector<9x128xf32>
    %160 = vector.shape_cast %157 : vector<9x128xf32> to vector<1x1x9x128xf32>
    tpu.vector_store %arg16[%c0_66, %c0_67, %c0_68, %c0_69], %160 {strides = array<i32>} : memref<3x4x9x128xf32, #tpu.memory_space<vmem>>, vector<1x1x9x128xf32>,
    %161 = vector.extract_strided_slice %125 {offsets = [0, 128], sizes = [9, 128], strides = [1, 1]} : vector<9x512xf32> to vector<9x128xf32>
    %162 = arith.addf %161, %122 : vector<9x128xf32>
    %163 = vector.broadcast %127 : vector<9x1xf32> to vector<9x128xf32>
    %164 = arith.addf %162, %163 : vector<9x128xf32>
    %c1 = arith.constant 1 : index
    %c0_70 = arith.constant 0 : index
    %c0_71 = arith.constant 0 : index
    %165 = vector.load %arg14[%c1, %c0_70, %c0_71] : memref<4x2x128xf32, #tpu.memory_space<vmem>>, vector<1x2x128xf32>
    %166 = vector.shape_cast %165 : vector<1x2x128xf32> to vector<2x128xf32>
    %167 = vector.extract_strided_slice %164 {offsets = [0, 0], sizes = [2, 128], strides = [1, 1]} : vector<9x128xf32> to vector<2x128xf32>
    %168 = arith.negf %167 : vector<2x128xf32>
    %169 = math.exp %168 : vector<2x128xf32>
    %cst_72 = arith.constant 1.000000e+00 : f32
    %170 = vector.broadcast %cst_72 : f32 to vector<2x128xf32>
    %171 = arith.addf %170, %169 : vector<2x128xf32>
    %172 = arith.divf %170, %171 : vector<2x128xf32>
    %173 = arith.addf %172, %166 : vector<2x128xf32>
    %cst_73 = arith.constant 1.000000e+00 : f32
    %174 = vector.broadcast %cst_73 : f32 to vector<2x128xf32>
    %175 = arith.mulf %173, %174 : vector<2x128xf32>
    %176 = vector.extract_strided_slice %164 {offsets = [2, 0], sizes = [1, 128], strides = [1, 1]} : vector<9x128xf32> to vector<1x128xf32>
    %177 = math.exp %176 : vector<1x128xf32>
    %cst_74 = arith.constant 1.000000e+01 : f32
    %178 = vector.broadcast %cst_74 : f32 to vector<1x128xf32>
    %179 = arith.mulf %177, %178 : vector<1x128xf32>
    %180 = vector.extract_strided_slice %164 {offsets = [3, 0], sizes = [1, 128], strides = [1, 1]} : vector<9x128xf32> to vector<1x128xf32>
    %181 = math.exp %180 : vector<1x128xf32>
    %cst_75 = arith.constant 1.300000e+01 : f32
    %182 = vector.broadcast %cst_75 : f32 to vector<1x128xf32>
    %183 = arith.mulf %181, %182 : vector<1x128xf32>
    %184 = vector.extract_strided_slice %164 {offsets = [4, 0], sizes = [5, 128], strides = [1, 1]} : vector<9x128xf32> to vector<5x128xf32>
    %185 = arith.negf %184 : vector<5x128xf32>
    %186 = math.exp %185 : vector<5x128xf32>
    %cst_76 = arith.constant 1.000000e+00 : f32
    %187 = vector.broadcast %cst_76 : f32 to vector<5x128xf32>
    %188 = arith.addf %187, %186 : vector<5x128xf32>
    %189 = arith.divf %187, %188 : vector<5x128xf32>
    %190 = tpu.concatenate %175, %179, %183, %189 in 0 : vector<2x128xf32>, vector<1x128xf32>, vector<1x128xf32>, vector<5x128xf32> -> vector<9x128xf32>
    %c0_77 = arith.constant 0 : index
    %c1_78 = arith.constant 1 : index
    %c0_79 = arith.constant 0 : index
    %c0_80 = arith.constant 0 : index
    %191 = vector.load %arg16[%c0_77, %c1_78, %c0_79, %c0_80] : memref<3x4x9x128xf32, #tpu.memory_space<vmem>>, vector<1x1x9x128xf32>
    %192 = vector.shape_cast %191 : vector<1x1x9x128xf32> to vector<9x128xf32>
    %193 = vector.shape_cast %190 : vector<9x128xf32> to vector<1x1x9x128xf32>
    tpu.vector_store %arg16[%c0_77, %c1_78, %c0_79, %c0_80], %193 {strides = array<i32>} : memref<3x4x9x128xf32, #tpu.memory_space<vmem>>, vector<1x1x9x128xf32>,
    %194 = vector.extract_strided_slice %125 {offsets = [0, 256], sizes = [9, 128], strides = [1, 1]} : vector<9x512xf32> to vector<9x128xf32>
    %195 = arith.addf %194, %122 : vector<9x128xf32>
    %196 = vector.broadcast %127 : vector<9x1xf32> to vector<9x128xf32>
    %197 = arith.addf %195, %196 : vector<9x128xf32>
    %c2 = arith.constant 2 : index
    %c0_81 = arith.constant 0 : index
    %c0_82 = arith.constant 0 : index
    %198 = vector.load %arg14[%c2, %c0_81, %c0_82] : memref<4x2x128xf32, #tpu.memory_space<vmem>>, vector<1x2x128xf32>
    %199 = vector.shape_cast %198 : vector<1x2x128xf32> to vector<2x128xf32>
    %200 = vector.extract_strided_slice %197 {offsets = [0, 0], sizes = [2, 128], strides = [1, 1]} : vector<9x128xf32> to vector<2x128xf32>
    %201 = arith.negf %200 : vector<2x128xf32>
    %202 = math.exp %201 : vector<2x128xf32>
    %cst_83 = arith.constant 1.000000e+00 : f32
    %203 = vector.broadcast %cst_83 : f32 to vector<2x128xf32>
    %204 = arith.addf %203, %202 : vector<2x128xf32>
    %205 = arith.divf %203, %204 : vector<2x128xf32>
    %206 = arith.addf %205, %199 : vector<2x128xf32>
    %cst_84 = arith.constant 1.000000e+00 : f32
    %207 = vector.broadcast %cst_84 : f32 to vector<2x128xf32>
    %208 = arith.mulf %206, %207 : vector<2x128xf32>
    %209 = vector.extract_strided_slice %197 {offsets = [2, 0], sizes = [1, 128], strides = [1, 1]} : vector<9x128xf32> to vector<1x128xf32>
    %210 = math.exp %209 : vector<1x128xf32>
    %cst_85 = arith.constant 1.000000e+01 : f32
    %211 = vector.broadcast %cst_85 : f32 to vector<1x128xf32>
    %212 = arith.mulf %210, %211 : vector<1x128xf32>
    %213 = vector.extract_strided_slice %197 {offsets = [3, 0], sizes = [1, 128], strides = [1, 1]} : vector<9x128xf32> to vector<1x128xf32>
    %214 = math.exp %213 : vector<1x128xf32>
    %cst_86 = arith.constant 1.300000e+01 : f32
    %215 = vector.broadcast %cst_86 : f32 to vector<1x128xf32>
    %216 = arith.mulf %214, %215 : vector<1x128xf32>
    %217 = vector.extract_strided_slice %197 {offsets = [4, 0], sizes = [5, 128], strides = [1, 1]} : vector<9x128xf32> to vector<5x128xf32>
    %218 = arith.negf %217 : vector<5x128xf32>
    %219 = math.exp %218 : vector<5x128xf32>
    %cst_87 = arith.constant 1.000000e+00 : f32
    %220 = vector.broadcast %cst_87 : f32 to vector<5x128xf32>
    %221 = arith.addf %220, %219 : vector<5x128xf32>
    %222 = arith.divf %220, %221 : vector<5x128xf32>
    %223 = tpu.concatenate %208, %212, %216, %222 in 0 : vector<2x128xf32>, vector<1x128xf32>, vector<1x128xf32>, vector<5x128xf32> -> vector<9x128xf32>
    %c0_88 = arith.constant 0 : index
    %c2_89 = arith.constant 2 : index
    %c0_90 = arith.constant 0 : index
    %c0_91 = arith.constant 0 : index
    %224 = vector.load %arg16[%c0_88, %c2_89, %c0_90, %c0_91] : memref<3x4x9x128xf32, #tpu.memory_space<vmem>>, vector<1x1x9x128xf32>
    %225 = vector.shape_cast %224 : vector<1x1x9x128xf32> to vector<9x128xf32>
    %226 = vector.shape_cast %223 : vector<9x128xf32> to vector<1x1x9x128xf32>
    tpu.vector_store %arg16[%c0_88, %c2_89, %c0_90, %c0_91], %226 {strides = array<i32>} : memref<3x4x9x128xf32, #tpu.memory_space<vmem>>, vector<1x1x9x128xf32>,
    %227 = vector.extract_strided_slice %125 {offsets = [0, 384], sizes = [9, 128], strides = [1, 1]} : vector<9x512xf32> to vector<9x128xf32>
    %228 = arith.addf %227, %122 : vector<9x128xf32>
    %229 = vector.broadcast %127 : vector<9x1xf32> to vector<9x128xf32>
    %230 = arith.addf %228, %229 : vector<9x128xf32>
    %c3 = arith.constant 3 : index
    %c0_92 = arith.constant 0 : index
    %c0_93 = arith.constant 0 : index
    %231 = vector.load %arg14[%c3, %c0_92, %c0_93] : memref<4x2x128xf32, #tpu.memory_space<vmem>>, vector<1x2x128xf32>
    %232 = vector.shape_cast %231 : vector<1x2x128xf32> to vector<2x128xf32>
    %233 = vector.extract_strided_slice %230 {offsets = [0, 0], sizes = [2, 128], strides = [1, 1]} : vector<9x128xf32> to vector<2x128xf32>
    %234 = arith.negf %233 : vector<2x128xf32>
    %235 = math.exp %234 : vector<2x128xf32>
    %cst_94 = arith.constant 1.000000e+00 : f32
    %236 = vector.broadcast %cst_94 : f32 to vector<2x128xf32>
    %237 = arith.addf %236, %235 : vector<2x128xf32>
    %238 = arith.divf %236, %237 : vector<2x128xf32>
    %239 = arith.addf %238, %232 : vector<2x128xf32>
    %cst_95 = arith.constant 1.000000e+00 : f32
    %240 = vector.broadcast %cst_95 : f32 to vector<2x128xf32>
    %241 = arith.mulf %239, %240 : vector<2x128xf32>
    %242 = vector.extract_strided_slice %230 {offsets = [2, 0], sizes = [1, 128], strides = [1, 1]} : vector<9x128xf32> to vector<1x128xf32>
    %243 = math.exp %242 : vector<1x128xf32>
    %cst_96 = arith.constant 1.000000e+01 : f32
    %244 = vector.broadcast %cst_96 : f32 to vector<1x128xf32>
    %245 = arith.mulf %243, %244 : vector<1x128xf32>
    %246 = vector.extract_strided_slice %230 {offsets = [3, 0], sizes = [1, 128], strides = [1, 1]} : vector<9x128xf32> to vector<1x128xf32>
    %247 = math.exp %246 : vector<1x128xf32>
    %cst_97 = arith.constant 1.300000e+01 : f32
    %248 = vector.broadcast %cst_97 : f32 to vector<1x128xf32>
    %249 = arith.mulf %247, %248 : vector<1x128xf32>
    %250 = vector.extract_strided_slice %230 {offsets = [4, 0], sizes = [5, 128], strides = [1, 1]} : vector<9x128xf32> to vector<5x128xf32>
    %251 = arith.negf %250 : vector<5x128xf32>
    %252 = math.exp %251 : vector<5x128xf32>
    %cst_98 = arith.constant 1.000000e+00 : f32
    %253 = vector.broadcast %cst_98 : f32 to vector<5x128xf32>
    %254 = arith.addf %253, %252 : vector<5x128xf32>
    %255 = arith.divf %253, %254 : vector<5x128xf32>
    %256 = tpu.concatenate %241, %245, %249, %255 in 0 : vector<2x128xf32>, vector<1x128xf32>, vector<1x128xf32>, vector<5x128xf32> -> vector<9x128xf32>
    %c0_99 = arith.constant 0 : index
    %c3_100 = arith.constant 3 : index
    %c0_101 = arith.constant 0 : index
    %c0_102 = arith.constant 0 : index
    %257 = vector.load %arg16[%c0_99, %c3_100, %c0_101, %c0_102] : memref<3x4x9x128xf32, #tpu.memory_space<vmem>>, vector<1x1x9x128xf32>
    %258 = vector.shape_cast %257 : vector<1x1x9x128xf32> to vector<9x128xf32>
    %259 = vector.shape_cast %256 : vector<9x128xf32> to vector<1x1x9x128xf32>
    tpu.vector_store %arg16[%c0_99, %c3_100, %c0_101, %c0_102], %259 {strides = array<i32>} : memref<3x4x9x128xf32, #tpu.memory_space<vmem>>, vector<1x1x9x128xf32>,
    %c1_103 = arith.constant 1 : index
    %c0_104 = arith.constant 0 : index
    %c0_105 = arith.constant 0 : index
    %260 = vector.load %arg8[%c1_103, %c0_104, %c0_105] : memref<3x9x16xbf16, #tpu.memory_space<vmem>>, vector<1x9x16xbf16>
    %261 = vector.shape_cast %260 : vector<1x9x16xbf16> to vector<9x16xbf16>
    %cst_106 = arith.constant dense<0.000000e+00> : vector<9x128xf32>
    %262 = tpu.matmul %261, %83, %cst_106 {dimension_numbers = #tpu.dot_dimension_numbers<[1], [1], [0], [0], [0, 0, 1, 0], [], []>} : vector<9x16xbf16>, vector<128x16xbf16>, vector<9x128xf32> -> vector<9x128xf32>
    %c1_107 = arith.constant 1 : index
    %c0_108 = arith.constant 0 : index
    %c0_109 = arith.constant 0 : index
    %263 = vector.load %arg9[%c1_107, %c0_108, %c0_109] : memref<3x9x1xf32, #tpu.memory_space<vmem>>, vector<1x9x1xf32>
    %264 = vector.shape_cast %263 : vector<1x9x1xf32> to vector<9x1xf32>
    %265 = vector.broadcast %264 : vector<9x1xf32> to vector<9x128xf32>
    %266 = arith.addf %262, %265 : vector<9x128xf32>
    %267 = vector.extract_strided_slice %266 {offsets = [0, 0], sizes = [2, 128], strides = [1, 1]} : vector<9x128xf32> to vector<2x128xf32>
    %268 = arith.negf %267 : vector<2x128xf32>
    %269 = math.exp %268 : vector<2x128xf32>
    %cst_110 = arith.constant 1.000000e+00 : f32
    %270 = vector.broadcast %cst_110 : f32 to vector<2x128xf32>
    %271 = arith.addf %270, %269 : vector<2x128xf32>
    %272 = arith.divf %270, %271 : vector<2x128xf32>
    %273 = arith.addf %272, %85 : vector<2x128xf32>
    %cst_111 = arith.constant 2.000000e+00 : f32
    %274 = vector.broadcast %cst_111 : f32 to vector<2x128xf32>
    %275 = arith.mulf %273, %274 : vector<2x128xf32>
    %276 = vector.extract_strided_slice %266 {offsets = [2, 0], sizes = [1, 128], strides = [1, 1]} : vector<9x128xf32> to vector<1x128xf32>
    %277 = math.exp %276 : vector<1x128xf32>
    %cst_112 = arith.constant 1.600000e+01 : f32
    %278 = vector.broadcast %cst_112 : f32 to vector<1x128xf32>
    %279 = arith.mulf %277, %278 : vector<1x128xf32>
    %280 = vector.extract_strided_slice %266 {offsets = [3, 0], sizes = [1, 128], strides = [1, 1]} : vector<9x128xf32> to vector<1x128xf32>
    %281 = math.exp %280 : vector<1x128xf32>
    %cst_113 = arith.constant 3.000000e+01 : f32
    %282 = vector.broadcast %cst_113 : f32 to vector<1x128xf32>
    %283 = arith.mulf %281, %282 : vector<1x128xf32>
    %284 = vector.extract_strided_slice %266 {offsets = [4, 0], sizes = [5, 128], strides = [1, 1]} : vector<9x128xf32> to vector<5x128xf32>
    %285 = arith.negf %284 : vector<5x128xf32>
    %286 = math.exp %285 : vector<5x128xf32>
    %cst_114 = arith.constant 1.000000e+00 : f32
    %287 = vector.broadcast %cst_114 : f32 to vector<5x128xf32>
    %288 = arith.addf %287, %286 : vector<5x128xf32>
    %289 = arith.divf %287, %288 : vector<5x128xf32>
    %290 = tpu.concatenate %275, %279, %283, %289 in 0 : vector<2x128xf32>, vector<1x128xf32>, vector<1x128xf32>, vector<5x128xf32> -> vector<9x128xf32>
    %c1_115 = arith.constant 1 : index
    %c0_116 = arith.constant 0 : index
    %c0_117 = arith.constant 0 : index
    %291 = vector.load %arg15[%c1_115, %c0_116, %c0_117] : memref<3x9x128xf32, #tpu.memory_space<vmem>>, vector<1x9x128xf32>
    %292 = vector.shape_cast %291 : vector<1x9x128xf32> to vector<9x128xf32>
    %293 = vector.shape_cast %290 : vector<9x128xf32> to vector<1x9x128xf32>
    tpu.vector_store %arg15[%c1_115, %c0_116, %c0_117], %293 {strides = array<i32>} : memref<3x9x128xf32, #tpu.memory_space<vmem>>, vector<1x9x128xf32>,
    %c1_118 = arith.constant 1 : index
    %c0_119 = arith.constant 0 : index
    %c0_120 = arith.constant 0 : index
    %294 = vector.load %arg10[%c1_118, %c0_119, %c0_120] : memref<3x9x16xbf16, #tpu.memory_space<vmem>>, vector<1x9x16xbf16>
    %295 = vector.shape_cast %294 : vector<1x9x16xbf16> to vector<9x16xbf16>
    %cst_121 = arith.constant dense<0.000000e+00> : vector<9x128xf32>
    %296 = tpu.matmul %295, %83, %cst_121 {dimension_numbers = #tpu.dot_dimension_numbers<[1], [1], [0], [0], [0, 0, 1, 0], [], []>} : vector<9x16xbf16>, vector<128x16xbf16>, vector<9x128xf32> -> vector<9x128xf32>
    %c1_122 = arith.constant 1 : index
    %c0_123 = arith.constant 0 : index
    %c0_124 = arith.constant 0 : index
    %297 = vector.load %arg11[%c1_122, %c0_123, %c0_124] : memref<3x9x8xbf16, #tpu.memory_space<vmem>>, vector<1x9x8xbf16>
    %298 = vector.shape_cast %297 : vector<1x9x8xbf16> to vector<9x8xbf16>
    %cst_125 = arith.constant dense<0.000000e+00> : vector<9x512xf32>
    %299 = tpu.matmul %298, %84, %cst_125 {dimension_numbers = #tpu.dot_dimension_numbers<[1], [0], [0], [1], [0, 0, 1, 1], [], []>} : vector<9x8xbf16>, vector<8x512xbf16>, vector<9x512xf32> -> vector<9x512xf32>
    %c1_126 = arith.constant 1 : index
    %c0_127 = arith.constant 0 : index
    %c0_128 = arith.constant 0 : index
    %300 = vector.load %arg12[%c1_126, %c0_127, %c0_128] : memref<3x9x1xf32, #tpu.memory_space<vmem>>, vector<1x9x1xf32>
    %301 = vector.shape_cast %300 : vector<1x9x1xf32> to vector<9x1xf32>
    %302 = vector.extract_strided_slice %299 {offsets = [0, 0], sizes = [9, 128], strides = [1, 1]} : vector<9x512xf32> to vector<9x128xf32>
    %303 = arith.addf %302, %296 : vector<9x128xf32>
    %304 = vector.broadcast %301 : vector<9x1xf32> to vector<9x128xf32>
    %305 = arith.addf %303, %304 : vector<9x128xf32>
    %c0_129 = arith.constant 0 : index
    %c0_130 = arith.constant 0 : index
    %c0_131 = arith.constant 0 : index
    %306 = vector.load %arg14[%c0_129, %c0_130, %c0_131] : memref<4x2x128xf32, #tpu.memory_space<vmem>>, vector<1x2x128xf32>
    %307 = vector.shape_cast %306 : vector<1x2x128xf32> to vector<2x128xf32>
    %308 = vector.extract_strided_slice %305 {offsets = [0, 0], sizes = [2, 128], strides = [1, 1]} : vector<9x128xf32> to vector<2x128xf32>
    %309 = arith.negf %308 : vector<2x128xf32>
    %310 = math.exp %309 : vector<2x128xf32>
    %cst_132 = arith.constant 1.000000e+00 : f32
    %311 = vector.broadcast %cst_132 : f32 to vector<2x128xf32>
    %312 = arith.addf %311, %310 : vector<2x128xf32>
    %313 = arith.divf %311, %312 : vector<2x128xf32>
    %314 = arith.addf %313, %307 : vector<2x128xf32>
    %cst_133 = arith.constant 1.000000e+00 : f32
    %315 = vector.broadcast %cst_133 : f32 to vector<2x128xf32>
    %316 = arith.mulf %314, %315 : vector<2x128xf32>
    %317 = vector.extract_strided_slice %305 {offsets = [2, 0], sizes = [1, 128], strides = [1, 1]} : vector<9x128xf32> to vector<1x128xf32>
    %318 = math.exp %317 : vector<1x128xf32>
    %cst_134 = arith.constant 1.600000e+01 : f32
    %319 = vector.broadcast %cst_134 : f32 to vector<1x128xf32>
    %320 = arith.mulf %318, %319 : vector<1x128xf32>
    %321 = vector.extract_strided_slice %305 {offsets = [3, 0], sizes = [1, 128], strides = [1, 1]} : vector<9x128xf32> to vector<1x128xf32>
    %322 = math.exp %321 : vector<1x128xf32>
    %cst_135 = arith.constant 3.000000e+01 : f32
    %323 = vector.broadcast %cst_135 : f32 to vector<1x128xf32>
    %324 = arith.mulf %322, %323 : vector<1x128xf32>
    %325 = vector.extract_strided_slice %305 {offsets = [4, 0], sizes = [5, 128], strides = [1, 1]} : vector<9x128xf32> to vector<5x128xf32>
    %326 = arith.negf %325 : vector<5x128xf32>
    %327 = math.exp %326 : vector<5x128xf32>
    %cst_136 = arith.constant 1.000000e+00 : f32
    %328 = vector.broadcast %cst_136 : f32 to vector<5x128xf32>
    %329 = arith.addf %328, %327 : vector<5x128xf32>
    %330 = arith.divf %328, %329 : vector<5x128xf32>
    %331 = tpu.concatenate %316, %320, %324, %330 in 0 : vector<2x128xf32>, vector<1x128xf32>, vector<1x128xf32>, vector<5x128xf32> -> vector<9x128xf32>
    %c1_137 = arith.constant 1 : index
    %c0_138 = arith.constant 0 : index
    %c0_139 = arith.constant 0 : index
    %c0_140 = arith.constant 0 : index
    %332 = vector.load %arg16[%c1_137, %c0_138, %c0_139, %c0_140] : memref<3x4x9x128xf32, #tpu.memory_space<vmem>>, vector<1x1x9x128xf32>
    %333 = vector.shape_cast %332 : vector<1x1x9x128xf32> to vector<9x128xf32>
    %334 = vector.shape_cast %331 : vector<9x128xf32> to vector<1x1x9x128xf32>
    tpu.vector_store %arg16[%c1_137, %c0_138, %c0_139, %c0_140], %334 {strides = array<i32>} : memref<3x4x9x128xf32, #tpu.memory_space<vmem>>, vector<1x1x9x128xf32>,
    %335 = vector.extract_strided_slice %299 {offsets = [0, 128], sizes = [9, 128], strides = [1, 1]} : vector<9x512xf32> to vector<9x128xf32>
    %336 = arith.addf %335, %296 : vector<9x128xf32>
    %337 = vector.broadcast %301 : vector<9x1xf32> to vector<9x128xf32>
    %338 = arith.addf %336, %337 : vector<9x128xf32>
    %c1_141 = arith.constant 1 : index
    %c0_142 = arith.constant 0 : index
    %c0_143 = arith.constant 0 : index
    %339 = vector.load %arg14[%c1_141, %c0_142, %c0_143] : memref<4x2x128xf32, #tpu.memory_space<vmem>>, vector<1x2x128xf32>
    %340 = vector.shape_cast %339 : vector<1x2x128xf32> to vector<2x128xf32>
    %341 = vector.extract_strided_slice %338 {offsets = [0, 0], sizes = [2, 128], strides = [1, 1]} : vector<9x128xf32> to vector<2x128xf32>
    %342 = arith.negf %341 : vector<2x128xf32>
    %343 = math.exp %342 : vector<2x128xf32>
    %cst_144 = arith.constant 1.000000e+00 : f32
    %344 = vector.broadcast %cst_144 : f32 to vector<2x128xf32>
    %345 = arith.addf %344, %343 : vector<2x128xf32>
    %346 = arith.divf %344, %345 : vector<2x128xf32>
    %347 = arith.addf %346, %340 : vector<2x128xf32>
    %cst_145 = arith.constant 1.000000e+00 : f32
    %348 = vector.broadcast %cst_145 : f32 to vector<2x128xf32>
    %349 = arith.mulf %347, %348 : vector<2x128xf32>
    %350 = vector.extract_strided_slice %338 {offsets = [2, 0], sizes = [1, 128], strides = [1, 1]} : vector<9x128xf32> to vector<1x128xf32>
    %351 = math.exp %350 : vector<1x128xf32>
    %cst_146 = arith.constant 1.600000e+01 : f32
    %352 = vector.broadcast %cst_146 : f32 to vector<1x128xf32>
    %353 = arith.mulf %351, %352 : vector<1x128xf32>
    %354 = vector.extract_strided_slice %338 {offsets = [3, 0], sizes = [1, 128], strides = [1, 1]} : vector<9x128xf32> to vector<1x128xf32>
    %355 = math.exp %354 : vector<1x128xf32>
    %cst_147 = arith.constant 3.000000e+01 : f32
    %356 = vector.broadcast %cst_147 : f32 to vector<1x128xf32>
    %357 = arith.mulf %355, %356 : vector<1x128xf32>
    %358 = vector.extract_strided_slice %338 {offsets = [4, 0], sizes = [5, 128], strides = [1, 1]} : vector<9x128xf32> to vector<5x128xf32>
    %359 = arith.negf %358 : vector<5x128xf32>
    %360 = math.exp %359 : vector<5x128xf32>
    %cst_148 = arith.constant 1.000000e+00 : f32
    %361 = vector.broadcast %cst_148 : f32 to vector<5x128xf32>
    %362 = arith.addf %361, %360 : vector<5x128xf32>
    %363 = arith.divf %361, %362 : vector<5x128xf32>
    %364 = tpu.concatenate %349, %353, %357, %363 in 0 : vector<2x128xf32>, vector<1x128xf32>, vector<1x128xf32>, vector<5x128xf32> -> vector<9x128xf32>
    %c1_149 = arith.constant 1 : index
    %c1_150 = arith.constant 1 : index
    %c0_151 = arith.constant 0 : index
    %c0_152 = arith.constant 0 : index
    %365 = vector.load %arg16[%c1_149, %c1_150, %c0_151, %c0_152] : memref<3x4x9x128xf32, #tpu.memory_space<vmem>>, vector<1x1x9x128xf32>
    %366 = vector.shape_cast %365 : vector<1x1x9x128xf32> to vector<9x128xf32>
    %367 = vector.shape_cast %364 : vector<9x128xf32> to vector<1x1x9x128xf32>
    tpu.vector_store %arg16[%c1_149, %c1_150, %c0_151, %c0_152], %367 {strides = array<i32>} : memref<3x4x9x128xf32, #tpu.memory_space<vmem>>, vector<1x1x9x128xf32>,
    %368 = vector.extract_strided_slice %299 {offsets = [0, 256], sizes = [9, 128], strides = [1, 1]} : vector<9x512xf32> to vector<9x128xf32>
    %369 = arith.addf %368, %296 : vector<9x128xf32>
    %370 = vector.broadcast %301 : vector<9x1xf32> to vector<9x128xf32>
    %371 = arith.addf %369, %370 : vector<9x128xf32>
    %c2_153 = arith.constant 2 : index
    %c0_154 = arith.constant 0 : index
    %c0_155 = arith.constant 0 : index
    %372 = vector.load %arg14[%c2_153, %c0_154, %c0_155] : memref<4x2x128xf32, #tpu.memory_space<vmem>>, vector<1x2x128xf32>
    %373 = vector.shape_cast %372 : vector<1x2x128xf32> to vector<2x128xf32>
    %374 = vector.extract_strided_slice %371 {offsets = [0, 0], sizes = [2, 128], strides = [1, 1]} : vector<9x128xf32> to vector<2x128xf32>
    %375 = arith.negf %374 : vector<2x128xf32>
    %376 = math.exp %375 : vector<2x128xf32>
    %cst_156 = arith.constant 1.000000e+00 : f32
    %377 = vector.broadcast %cst_156 : f32 to vector<2x128xf32>
    %378 = arith.addf %377, %376 : vector<2x128xf32>
    %379 = arith.divf %377, %378 : vector<2x128xf32>
    %380 = arith.addf %379, %373 : vector<2x128xf32>
    %cst_157 = arith.constant 1.000000e+00 : f32
    %381 = vector.broadcast %cst_157 : f32 to vector<2x128xf32>
    %382 = arith.mulf %380, %381 : vector<2x128xf32>
    %383 = vector.extract_strided_slice %371 {offsets = [2, 0], sizes = [1, 128], strides = [1, 1]} : vector<9x128xf32> to vector<1x128xf32>
    %384 = math.exp %383 : vector<1x128xf32>
    %cst_158 = arith.constant 1.600000e+01 : f32
    %385 = vector.broadcast %cst_158 : f32 to vector<1x128xf32>
    %386 = arith.mulf %384, %385 : vector<1x128xf32>
    %387 = vector.extract_strided_slice %371 {offsets = [3, 0], sizes = [1, 128], strides = [1, 1]} : vector<9x128xf32> to vector<1x128xf32>
    %388 = math.exp %387 : vector<1x128xf32>
    %cst_159 = arith.constant 3.000000e+01 : f32
    %389 = vector.broadcast %cst_159 : f32 to vector<1x128xf32>
    %390 = arith.mulf %388, %389 : vector<1x128xf32>
    %391 = vector.extract_strided_slice %371 {offsets = [4, 0], sizes = [5, 128], strides = [1, 1]} : vector<9x128xf32> to vector<5x128xf32>
    %392 = arith.negf %391 : vector<5x128xf32>
    %393 = math.exp %392 : vector<5x128xf32>
    %cst_160 = arith.constant 1.000000e+00 : f32
    %394 = vector.broadcast %cst_160 : f32 to vector<5x128xf32>
    %395 = arith.addf %394, %393 : vector<5x128xf32>
    %396 = arith.divf %394, %395 : vector<5x128xf32>
    %397 = tpu.concatenate %382, %386, %390, %396 in 0 : vector<2x128xf32>, vector<1x128xf32>, vector<1x128xf32>, vector<5x128xf32> -> vector<9x128xf32>
    %c1_161 = arith.constant 1 : index
    %c2_162 = arith.constant 2 : index
    %c0_163 = arith.constant 0 : index
    %c0_164 = arith.constant 0 : index
    %398 = vector.load %arg16[%c1_161, %c2_162, %c0_163, %c0_164] : memref<3x4x9x128xf32, #tpu.memory_space<vmem>>, vector<1x1x9x128xf32>
    %399 = vector.shape_cast %398 : vector<1x1x9x128xf32> to vector<9x128xf32>
    %400 = vector.shape_cast %397 : vector<9x128xf32> to vector<1x1x9x128xf32>
    tpu.vector_store %arg16[%c1_161, %c2_162, %c0_163, %c0_164], %400 {strides = array<i32>} : memref<3x4x9x128xf32, #tpu.memory_space<vmem>>, vector<1x1x9x128xf32>,
    %401 = vector.extract_strided_slice %299 {offsets = [0, 384], sizes = [9, 128], strides = [1, 1]} : vector<9x512xf32> to vector<9x128xf32>
    %402 = arith.addf %401, %296 : vector<9x128xf32>
    %403 = vector.broadcast %301 : vector<9x1xf32> to vector<9x128xf32>
    %404 = arith.addf %402, %403 : vector<9x128xf32>
    %c3_165 = arith.constant 3 : index
    %c0_166 = arith.constant 0 : index
    %c0_167 = arith.constant 0 : index
    %405 = vector.load %arg14[%c3_165, %c0_166, %c0_167] : memref<4x2x128xf32, #tpu.memory_space<vmem>>, vector<1x2x128xf32>
    %406 = vector.shape_cast %405 : vector<1x2x128xf32> to vector<2x128xf32>
    %407 = vector.extract_strided_slice %404 {offsets = [0, 0], sizes = [2, 128], strides = [1, 1]} : vector<9x128xf32> to vector<2x128xf32>
    %408 = arith.negf %407 : vector<2x128xf32>
    %409 = math.exp %408 : vector<2x128xf32>
    %cst_168 = arith.constant 1.000000e+00 : f32
    %410 = vector.broadcast %cst_168 : f32 to vector<2x128xf32>
    %411 = arith.addf %410, %409 : vector<2x128xf32>
    %412 = arith.divf %410, %411 : vector<2x128xf32>
    %413 = arith.addf %412, %406 : vector<2x128xf32>
    %cst_169 = arith.constant 1.000000e+00 : f32
    %414 = vector.broadcast %cst_169 : f32 to vector<2x128xf32>
    %415 = arith.mulf %413, %414 : vector<2x128xf32>
    %416 = vector.extract_strided_slice %404 {offsets = [2, 0], sizes = [1, 128], strides = [1, 1]} : vector<9x128xf32> to vector<1x128xf32>
    %417 = math.exp %416 : vector<1x128xf32>
    %cst_170 = arith.constant 1.600000e+01 : f32
    %418 = vector.broadcast %cst_170 : f32 to vector<1x128xf32>
    %419 = arith.mulf %417, %418 : vector<1x128xf32>
    %420 = vector.extract_strided_slice %404 {offsets = [3, 0], sizes = [1, 128], strides = [1, 1]} : vector<9x128xf32> to vector<1x128xf32>
    %421 = math.exp %420 : vector<1x128xf32>
    %cst_171 = arith.constant 3.000000e+01 : f32
    %422 = vector.broadcast %cst_171 : f32 to vector<1x128xf32>
    %423 = arith.mulf %421, %422 : vector<1x128xf32>
    %424 = vector.extract_strided_slice %404 {offsets = [4, 0], sizes = [5, 128], strides = [1, 1]} : vector<9x128xf32> to vector<5x128xf32>
    %425 = arith.negf %424 : vector<5x128xf32>
    %426 = math.exp %425 : vector<5x128xf32>
    %cst_172 = arith.constant 1.000000e+00 : f32
    %427 = vector.broadcast %cst_172 : f32 to vector<5x128xf32>
    %428 = arith.addf %427, %426 : vector<5x128xf32>
    %429 = arith.divf %427, %428 : vector<5x128xf32>
    %430 = tpu.concatenate %415, %419, %423, %429 in 0 : vector<2x128xf32>, vector<1x128xf32>, vector<1x128xf32>, vector<5x128xf32> -> vector<9x128xf32>
    %c1_173 = arith.constant 1 : index
    %c3_174 = arith.constant 3 : index
    %c0_175 = arith.constant 0 : index
    %c0_176 = arith.constant 0 : index
    %431 = vector.load %arg16[%c1_173, %c3_174, %c0_175, %c0_176] : memref<3x4x9x128xf32, #tpu.memory_space<vmem>>, vector<1x1x9x128xf32>
    %432 = vector.shape_cast %431 : vector<1x1x9x128xf32> to vector<9x128xf32>
    %433 = vector.shape_cast %430 : vector<9x128xf32> to vector<1x1x9x128xf32>
    tpu.vector_store %arg16[%c1_173, %c3_174, %c0_175, %c0_176], %433 {strides = array<i32>} : memref<3x4x9x128xf32, #tpu.memory_space<vmem>>, vector<1x1x9x128xf32>,
    %c2_177 = arith.constant 2 : index
    %c0_178 = arith.constant 0 : index
    %c0_179 = arith.constant 0 : index
    %434 = vector.load %arg8[%c2_177, %c0_178, %c0_179] : memref<3x9x16xbf16, #tpu.memory_space<vmem>>, vector<1x9x16xbf16>
    %435 = vector.shape_cast %434 : vector<1x9x16xbf16> to vector<9x16xbf16>
    %cst_180 = arith.constant dense<0.000000e+00> : vector<9x128xf32>
    %436 = tpu.matmul %435, %83, %cst_180 {dimension_numbers = #tpu.dot_dimension_numbers<[1], [1], [0], [0], [0, 0, 1, 0], [], []>} : vector<9x16xbf16>, vector<128x16xbf16>, vector<9x128xf32> -> vector<9x128xf32>
    %c2_181 = arith.constant 2 : index
    %c0_182 = arith.constant 0 : index
    %c0_183 = arith.constant 0 : index
    %437 = vector.load %arg9[%c2_181, %c0_182, %c0_183] : memref<3x9x1xf32, #tpu.memory_space<vmem>>, vector<1x9x1xf32>
    %438 = vector.shape_cast %437 : vector<1x9x1xf32> to vector<9x1xf32>
    %439 = vector.broadcast %438 : vector<9x1xf32> to vector<9x128xf32>
    %440 = arith.addf %436, %439 : vector<9x128xf32>
    %441 = vector.extract_strided_slice %440 {offsets = [0, 0], sizes = [2, 128], strides = [1, 1]} : vector<9x128xf32> to vector<2x128xf32>
    %442 = arith.negf %441 : vector<2x128xf32>
    %443 = math.exp %442 : vector<2x128xf32>
    %cst_184 = arith.constant 1.000000e+00 : f32
    %444 = vector.broadcast %cst_184 : f32 to vector<2x128xf32>
    %445 = arith.addf %444, %443 : vector<2x128xf32>
    %446 = arith.divf %444, %445 : vector<2x128xf32>
    %447 = arith.addf %446, %85 : vector<2x128xf32>
    %cst_185 = arith.constant 2.000000e+00 : f32
    %448 = vector.broadcast %cst_185 : f32 to vector<2x128xf32>
    %449 = arith.mulf %447, %448 : vector<2x128xf32>
    %450 = vector.extract_strided_slice %440 {offsets = [2, 0], sizes = [1, 128], strides = [1, 1]} : vector<9x128xf32> to vector<1x128xf32>
    %451 = math.exp %450 : vector<1x128xf32>
    %cst_186 = arith.constant 3.300000e+01 : f32
    %452 = vector.broadcast %cst_186 : f32 to vector<1x128xf32>
    %453 = arith.mulf %451, %452 : vector<1x128xf32>
    %454 = vector.extract_strided_slice %440 {offsets = [3, 0], sizes = [1, 128], strides = [1, 1]} : vector<9x128xf32> to vector<1x128xf32>
    %455 = math.exp %454 : vector<1x128xf32>
    %cst_187 = arith.constant 2.300000e+01 : f32
    %456 = vector.broadcast %cst_187 : f32 to vector<1x128xf32>
    %457 = arith.mulf %455, %456 : vector<1x128xf32>
    %458 = vector.extract_strided_slice %440 {offsets = [4, 0], sizes = [5, 128], strides = [1, 1]} : vector<9x128xf32> to vector<5x128xf32>
    %459 = arith.negf %458 : vector<5x128xf32>
    %460 = math.exp %459 : vector<5x128xf32>
    %cst_188 = arith.constant 1.000000e+00 : f32
    %461 = vector.broadcast %cst_188 : f32 to vector<5x128xf32>
    %462 = arith.addf %461, %460 : vector<5x128xf32>
    %463 = arith.divf %461, %462 : vector<5x128xf32>
    %464 = tpu.concatenate %449, %453, %457, %463 in 0 : vector<2x128xf32>, vector<1x128xf32>, vector<1x128xf32>, vector<5x128xf32> -> vector<9x128xf32>
    %c2_189 = arith.constant 2 : index
    %c0_190 = arith.constant 0 : index
    %c0_191 = arith.constant 0 : index
    %465 = vector.load %arg15[%c2_189, %c0_190, %c0_191] : memref<3x9x128xf32, #tpu.memory_space<vmem>>, vector<1x9x128xf32>
    %466 = vector.shape_cast %465 : vector<1x9x128xf32> to vector<9x128xf32>
    %467 = vector.shape_cast %464 : vector<9x128xf32> to vector<1x9x128xf32>
    tpu.vector_store %arg15[%c2_189, %c0_190, %c0_191], %467 {strides = array<i32>} : memref<3x9x128xf32, #tpu.memory_space<vmem>>, vector<1x9x128xf32>,
    %c2_192 = arith.constant 2 : index
    %c0_193 = arith.constant 0 : index
    %c0_194 = arith.constant 0 : index
    %468 = vector.load %arg10[%c2_192, %c0_193, %c0_194] : memref<3x9x16xbf16, #tpu.memory_space<vmem>>, vector<1x9x16xbf16>
    %469 = vector.shape_cast %468 : vector<1x9x16xbf16> to vector<9x16xbf16>
    %cst_195 = arith.constant dense<0.000000e+00> : vector<9x128xf32>
    %470 = tpu.matmul %469, %83, %cst_195 {dimension_numbers = #tpu.dot_dimension_numbers<[1], [1], [0], [0], [0, 0, 1, 0], [], []>} : vector<9x16xbf16>, vector<128x16xbf16>, vector<9x128xf32> -> vector<9x128xf32>
    %c2_196 = arith.constant 2 : index
    %c0_197 = arith.constant 0 : index
    %c0_198 = arith.constant 0 : index
    %471 = vector.load %arg11[%c2_196, %c0_197, %c0_198] : memref<3x9x8xbf16, #tpu.memory_space<vmem>>, vector<1x9x8xbf16>
    %472 = vector.shape_cast %471 : vector<1x9x8xbf16> to vector<9x8xbf16>
    %cst_199 = arith.constant dense<0.000000e+00> : vector<9x512xf32>
    %473 = tpu.matmul %472, %84, %cst_199 {dimension_numbers = #tpu.dot_dimension_numbers<[1], [0], [0], [1], [0, 0, 1, 1], [], []>} : vector<9x8xbf16>, vector<8x512xbf16>, vector<9x512xf32> -> vector<9x512xf32>
    %c2_200 = arith.constant 2 : index
    %c0_201 = arith.constant 0 : index
    %c0_202 = arith.constant 0 : index
    %474 = vector.load %arg12[%c2_200, %c0_201, %c0_202] : memref<3x9x1xf32, #tpu.memory_space<vmem>>, vector<1x9x1xf32>
    %475 = vector.shape_cast %474 : vector<1x9x1xf32> to vector<9x1xf32>
    %476 = vector.extract_strided_slice %473 {offsets = [0, 0], sizes = [9, 128], strides = [1, 1]} : vector<9x512xf32> to vector<9x128xf32>
    %477 = arith.addf %476, %470 : vector<9x128xf32>
    %478 = vector.broadcast %475 : vector<9x1xf32> to vector<9x128xf32>
    %479 = arith.addf %477, %478 : vector<9x128xf32>
    %c0_203 = arith.constant 0 : index
    %c0_204 = arith.constant 0 : index
    %c0_205 = arith.constant 0 : index
    %480 = vector.load %arg14[%c0_203, %c0_204, %c0_205] : memref<4x2x128xf32, #tpu.memory_space<vmem>>, vector<1x2x128xf32>
    %481 = vector.shape_cast %480 : vector<1x2x128xf32> to vector<2x128xf32>
    %482 = vector.extract_strided_slice %479 {offsets = [0, 0], sizes = [2, 128], strides = [1, 1]} : vector<9x128xf32> to vector<2x128xf32>
    %483 = arith.negf %482 : vector<2x128xf32>
    %484 = math.exp %483 : vector<2x128xf32>
    %cst_206 = arith.constant 1.000000e+00 : f32
    %485 = vector.broadcast %cst_206 : f32 to vector<2x128xf32>
    %486 = arith.addf %485, %484 : vector<2x128xf32>
    %487 = arith.divf %485, %486 : vector<2x128xf32>
    %488 = arith.addf %487, %481 : vector<2x128xf32>
    %cst_207 = arith.constant 1.000000e+00 : f32
    %489 = vector.broadcast %cst_207 : f32 to vector<2x128xf32>
    %490 = arith.mulf %488, %489 : vector<2x128xf32>
    %491 = vector.extract_strided_slice %479 {offsets = [2, 0], sizes = [1, 128], strides = [1, 1]} : vector<9x128xf32> to vector<1x128xf32>
    %492 = math.exp %491 : vector<1x128xf32>
    %cst_208 = arith.constant 3.300000e+01 : f32
    %493 = vector.broadcast %cst_208 : f32 to vector<1x128xf32>
    %494 = arith.mulf %492, %493 : vector<1x128xf32>
    %495 = vector.extract_strided_slice %479 {offsets = [3, 0], sizes = [1, 128], strides = [1, 1]} : vector<9x128xf32> to vector<1x128xf32>
    %496 = math.exp %495 : vector<1x128xf32>
    %cst_209 = arith.constant 2.300000e+01 : f32
    %497 = vector.broadcast %cst_209 : f32 to vector<1x128xf32>
    %498 = arith.mulf %496, %497 : vector<1x128xf32>
    %499 = vector.extract_strided_slice %479 {offsets = [4, 0], sizes = [5, 128], strides = [1, 1]} : vector<9x128xf32> to vector<5x128xf32>
    %500 = arith.negf %499 : vector<5x128xf32>
    %501 = math.exp %500 : vector<5x128xf32>
    %cst_210 = arith.constant 1.000000e+00 : f32
    %502 = vector.broadcast %cst_210 : f32 to vector<5x128xf32>
    %503 = arith.addf %502, %501 : vector<5x128xf32>
    %504 = arith.divf %502, %503 : vector<5x128xf32>
    %505 = tpu.concatenate %490, %494, %498, %504 in 0 : vector<2x128xf32>, vector<1x128xf32>, vector<1x128xf32>, vector<5x128xf32> -> vector<9x128xf32>
    %c2_211 = arith.constant 2 : index
    %c0_212 = arith.constant 0 : index
    %c0_213 = arith.constant 0 : index
    %c0_214 = arith.constant 0 : index
    %506 = vector.load %arg16[%c2_211, %c0_212, %c0_213, %c0_214] : memref<3x4x9x128xf32, #tpu.memory_space<vmem>>, vector<1x1x9x128xf32>
    %507 = vector.shape_cast %506 : vector<1x1x9x128xf32> to vector<9x128xf32>
    %508 = vector.shape_cast %505 : vector<9x128xf32> to vector<1x1x9x128xf32>
    tpu.vector_store %arg16[%c2_211, %c0_212, %c0_213, %c0_214], %508 {strides = array<i32>} : memref<3x4x9x128xf32, #tpu.memory_space<vmem>>, vector<1x1x9x128xf32>,
    %509 = vector.extract_strided_slice %473 {offsets = [0, 128], sizes = [9, 128], strides = [1, 1]} : vector<9x512xf32> to vector<9x128xf32>
    %510 = arith.addf %509, %470 : vector<9x128xf32>
    %511 = vector.broadcast %475 : vector<9x1xf32> to vector<9x128xf32>
    %512 = arith.addf %510, %511 : vector<9x128xf32>
    %c1_215 = arith.constant 1 : index
    %c0_216 = arith.constant 0 : index
    %c0_217 = arith.constant 0 : index
    %513 = vector.load %arg14[%c1_215, %c0_216, %c0_217] : memref<4x2x128xf32, #tpu.memory_space<vmem>>, vector<1x2x128xf32>
    %514 = vector.shape_cast %513 : vector<1x2x128xf32> to vector<2x128xf32>
    %515 = vector.extract_strided_slice %512 {offsets = [0, 0], sizes = [2, 128], strides = [1, 1]} : vector<9x128xf32> to vector<2x128xf32>
    %516 = arith.negf %515 : vector<2x128xf32>
    %517 = math.exp %516 : vector<2x128xf32>
    %cst_218 = arith.constant 1.000000e+00 : f32
    %518 = vector.broadcast %cst_218 : f32 to vector<2x128xf32>
    %519 = arith.addf %518, %517 : vector<2x128xf32>
    %520 = arith.divf %518, %519 : vector<2x128xf32>
    %521 = arith.addf %520, %514 : vector<2x128xf32>
    %cst_219 = arith.constant 1.000000e+00 : f32
    %522 = vector.broadcast %cst_219 : f32 to vector<2x128xf32>
    %523 = arith.mulf %521, %522 : vector<2x128xf32>
    %524 = vector.extract_strided_slice %512 {offsets = [2, 0], sizes = [1, 128], strides = [1, 1]} : vector<9x128xf32> to vector<1x128xf32>
    %525 = math.exp %524 : vector<1x128xf32>
    %cst_220 = arith.constant 3.300000e+01 : f32
    %526 = vector.broadcast %cst_220 : f32 to vector<1x128xf32>
    %527 = arith.mulf %525, %526 : vector<1x128xf32>
    %528 = vector.extract_strided_slice %512 {offsets = [3, 0], sizes = [1, 128], strides = [1, 1]} : vector<9x128xf32> to vector<1x128xf32>
    %529 = math.exp %528 : vector<1x128xf32>
    %cst_221 = arith.constant 2.300000e+01 : f32
    %530 = vector.broadcast %cst_221 : f32 to vector<1x128xf32>
    %531 = arith.mulf %529, %530 : vector<1x128xf32>
    %532 = vector.extract_strided_slice %512 {offsets = [4, 0], sizes = [5, 128], strides = [1, 1]} : vector<9x128xf32> to vector<5x128xf32>
    %533 = arith.negf %532 : vector<5x128xf32>
    %534 = math.exp %533 : vector<5x128xf32>
    %cst_222 = arith.constant 1.000000e+00 : f32
    %535 = vector.broadcast %cst_222 : f32 to vector<5x128xf32>
    %536 = arith.addf %535, %534 : vector<5x128xf32>
    %537 = arith.divf %535, %536 : vector<5x128xf32>
    %538 = tpu.concatenate %523, %527, %531, %537 in 0 : vector<2x128xf32>, vector<1x128xf32>, vector<1x128xf32>, vector<5x128xf32> -> vector<9x128xf32>
    %c2_223 = arith.constant 2 : index
    %c1_224 = arith.constant 1 : index
    %c0_225 = arith.constant 0 : index
    %c0_226 = arith.constant 0 : index
    %539 = vector.load %arg16[%c2_223, %c1_224, %c0_225, %c0_226] : memref<3x4x9x128xf32, #tpu.memory_space<vmem>>, vector<1x1x9x128xf32>
    %540 = vector.shape_cast %539 : vector<1x1x9x128xf32> to vector<9x128xf32>
    %541 = vector.shape_cast %538 : vector<9x128xf32> to vector<1x1x9x128xf32>
    tpu.vector_store %arg16[%c2_223, %c1_224, %c0_225, %c0_226], %541 {strides = array<i32>} : memref<3x4x9x128xf32, #tpu.memory_space<vmem>>, vector<1x1x9x128xf32>,
    %542 = vector.extract_strided_slice %473 {offsets = [0, 256], sizes = [9, 128], strides = [1, 1]} : vector<9x512xf32> to vector<9x128xf32>
    %543 = arith.addf %542, %470 : vector<9x128xf32>
    %544 = vector.broadcast %475 : vector<9x1xf32> to vector<9x128xf32>
    %545 = arith.addf %543, %544 : vector<9x128xf32>
    %c2_227 = arith.constant 2 : index
    %c0_228 = arith.constant 0 : index
    %c0_229 = arith.constant 0 : index
    %546 = vector.load %arg14[%c2_227, %c0_228, %c0_229] : memref<4x2x128xf32, #tpu.memory_space<vmem>>, vector<1x2x128xf32>
    %547 = vector.shape_cast %546 : vector<1x2x128xf32> to vector<2x128xf32>
    %548 = vector.extract_strided_slice %545 {offsets = [0, 0], sizes = [2, 128], strides = [1, 1]} : vector<9x128xf32> to vector<2x128xf32>
    %549 = arith.negf %548 : vector<2x128xf32>
    %550 = math.exp %549 : vector<2x128xf32>
    %cst_230 = arith.constant 1.000000e+00 : f32
    %551 = vector.broadcast %cst_230 : f32 to vector<2x128xf32>
    %552 = arith.addf %551, %550 : vector<2x128xf32>
    %553 = arith.divf %551, %552 : vector<2x128xf32>
    %554 = arith.addf %553, %547 : vector<2x128xf32>
    %cst_231 = arith.constant 1.000000e+00 : f32
    %555 = vector.broadcast %cst_231 : f32 to vector<2x128xf32>
    %556 = arith.mulf %554, %555 : vector<2x128xf32>
    %557 = vector.extract_strided_slice %545 {offsets = [2, 0], sizes = [1, 128], strides = [1, 1]} : vector<9x128xf32> to vector<1x128xf32>
    %558 = math.exp %557 : vector<1x128xf32>
    %cst_232 = arith.constant 3.300000e+01 : f32
    %559 = vector.broadcast %cst_232 : f32 to vector<1x128xf32>
    %560 = arith.mulf %558, %559 : vector<1x128xf32>
    %561 = vector.extract_strided_slice %545 {offsets = [3, 0], sizes = [1, 128], strides = [1, 1]} : vector<9x128xf32> to vector<1x128xf32>
    %562 = math.exp %561 : vector<1x128xf32>
    %cst_233 = arith.constant 2.300000e+01 : f32
    %563 = vector.broadcast %cst_233 : f32 to vector<1x128xf32>
    %564 = arith.mulf %562, %563 : vector<1x128xf32>
    %565 = vector.extract_strided_slice %545 {offsets = [4, 0], sizes = [5, 128], strides = [1, 1]} : vector<9x128xf32> to vector<5x128xf32>
    %566 = arith.negf %565 : vector<5x128xf32>
    %567 = math.exp %566 : vector<5x128xf32>
    %cst_234 = arith.constant 1.000000e+00 : f32
    %568 = vector.broadcast %cst_234 : f32 to vector<5x128xf32>
    %569 = arith.addf %568, %567 : vector<5x128xf32>
    %570 = arith.divf %568, %569 : vector<5x128xf32>
    %571 = tpu.concatenate %556, %560, %564, %570 in 0 : vector<2x128xf32>, vector<1x128xf32>, vector<1x128xf32>, vector<5x128xf32> -> vector<9x128xf32>
    %c2_235 = arith.constant 2 : index
    %c2_236 = arith.constant 2 : index
    %c0_237 = arith.constant 0 : index
    %c0_238 = arith.constant 0 : index
    %572 = vector.load %arg16[%c2_235, %c2_236, %c0_237, %c0_238] : memref<3x4x9x128xf32, #tpu.memory_space<vmem>>, vector<1x1x9x128xf32>
    %573 = vector.shape_cast %572 : vector<1x1x9x128xf32> to vector<9x128xf32>
    %574 = vector.shape_cast %571 : vector<9x128xf32> to vector<1x1x9x128xf32>
    tpu.vector_store %arg16[%c2_235, %c2_236, %c0_237, %c0_238], %574 {strides = array<i32>} : memref<3x4x9x128xf32, #tpu.memory_space<vmem>>, vector<1x1x9x128xf32>,
    %575 = vector.extract_strided_slice %473 {offsets = [0, 384], sizes = [9, 128], strides = [1, 1]} : vector<9x512xf32> to vector<9x128xf32>
    %576 = arith.addf %575, %470 : vector<9x128xf32>
    %577 = vector.broadcast %475 : vector<9x1xf32> to vector<9x128xf32>
    %578 = arith.addf %576, %577 : vector<9x128xf32>
    %c3_239 = arith.constant 3 : index
    %c0_240 = arith.constant 0 : index
    %c0_241 = arith.constant 0 : index
    %579 = vector.load %arg14[%c3_239, %c0_240, %c0_241] : memref<4x2x128xf32, #tpu.memory_space<vmem>>, vector<1x2x128xf32>
    %580 = vector.shape_cast %579 : vector<1x2x128xf32> to vector<2x128xf32>
    %581 = vector.extract_strided_slice %578 {offsets = [0, 0], sizes = [2, 128], strides = [1, 1]} : vector<9x128xf32> to vector<2x128xf32>
    %582 = arith.negf %581 : vector<2x128xf32>
    %583 = math.exp %582 : vector<2x128xf32>
    %cst_242 = arith.constant 1.000000e+00 : f32
    %584 = vector.broadcast %cst_242 : f32 to vector<2x128xf32>
    %585 = arith.addf %584, %583 : vector<2x128xf32>
    %586 = arith.divf %584, %585 : vector<2x128xf32>
    %587 = arith.addf %586, %580 : vector<2x128xf32>
    %cst_243 = arith.constant 1.000000e+00 : f32
    %588 = vector.broadcast %cst_243 : f32 to vector<2x128xf32>
    %589 = arith.mulf %587, %588 : vector<2x128xf32>
    %590 = vector.extract_strided_slice %578 {offsets = [2, 0], sizes = [1, 128], strides = [1, 1]} : vector<9x128xf32> to vector<1x128xf32>
    %591 = math.exp %590 : vector<1x128xf32>
    %cst_244 = arith.constant 3.300000e+01 : f32
    %592 = vector.broadcast %cst_244 : f32 to vector<1x128xf32>
    %593 = arith.mulf %591, %592 : vector<1x128xf32>
    %594 = vector.extract_strided_slice %578 {offsets = [3, 0], sizes = [1, 128], strides = [1, 1]} : vector<9x128xf32> to vector<1x128xf32>
    %595 = math.exp %594 : vector<1x128xf32>
    %cst_245 = arith.constant 2.300000e+01 : f32
    %596 = vector.broadcast %cst_245 : f32 to vector<1x128xf32>
    %597 = arith.mulf %595, %596 : vector<1x128xf32>
    %598 = vector.extract_strided_slice %578 {offsets = [4, 0], sizes = [5, 128], strides = [1, 1]} : vector<9x128xf32> to vector<5x128xf32>
    %599 = arith.negf %598 : vector<5x128xf32>
    %600 = math.exp %599 : vector<5x128xf32>
    %cst_246 = arith.constant 1.000000e+00 : f32
    %601 = vector.broadcast %cst_246 : f32 to vector<5x128xf32>
    %602 = arith.addf %601, %600 : vector<5x128xf32>
    %603 = arith.divf %601, %602 : vector<5x128xf32>
    %604 = tpu.concatenate %589, %593, %597, %603 in 0 : vector<2x128xf32>, vector<1x128xf32>, vector<1x128xf32>, vector<5x128xf32> -> vector<9x128xf32>
    %c2_247 = arith.constant 2 : index
    %c3_248 = arith.constant 3 : index
    %c0_249 = arith.constant 0 : index
    %c0_250 = arith.constant 0 : index
    %605 = vector.load %arg16[%c2_247, %c3_248, %c0_249, %c0_250] : memref<3x4x9x128xf32, #tpu.memory_space<vmem>>, vector<1x1x9x128xf32>
    %606 = vector.shape_cast %605 : vector<1x1x9x128xf32> to vector<9x128xf32>
    %607 = vector.shape_cast %604 : vector<9x128xf32> to vector<1x1x9x128xf32>
    tpu.vector_store %arg16[%c2_247, %c3_248, %c0_249, %c0_250], %607 {strides = array<i32>} : memref<3x4x9x128xf32, #tpu.memory_space<vmem>>, vector<1x1x9x128xf32>,
    return
  }
}

</mosaic_0001>

<bundles_post_ra>
// kernel: _lambda_.2
= control target key start
LH: loop header
LB: loop body
LE: loop exit
PB: predicated region body
PF: predicated region fallthrough
CT: control target
= control target key end

     0   :  { %vm67_vm0 = vcmask 1044480   ;;  %vm68_vm1 = vcmask 1045504   ;;  %v261_v1 = vmov 65535   ;;  %v262_v3 = vmov 0   ;;  %s333_s0 = inlined_call_operand.vmem [shape: bf16[27,512], index: 0, kind: input, shape index: {}]   ;;  %s334_s1 = inlined_call_operand.vmem [shape: bf16[8,27], index: 1, kind: input, shape index: {}]   ;;  %s335_s2 = inlined_call_operand.vmem [shape: f32[8,1], index: 2, kind: input, shape index: {}]   ;;  %s336_s3 = inlined_call_operand.vmem [shape: f32[8,1], index: 3, kind: input, shape index: {}]   ;;  %s337_s4 = inlined_call_operand.vmem [shape: f32[8,512], index: 4, kind: output, shape index: {}]  }
   0x1   :  { %v247_v0 = vld [vmem:[%s333_s0 + $0x4] ss:$16 sps:$4 sm:$0xff]   ;;  %v69_v2 = vsel %vm67_vm0, 4294967295, %v261_v1  ;;  %115 = vmatprep.mubr.bf16.mxu0 %v262_v3  ;;  %156 = vmatprep.mubr.bf16.mxu1 %v262_v3  ;;  %v249_v4 = vld [vmem:[%s333_s0 + $0xc] ss:$16 sps:$4 sm:$0xff]   ;;  %vm63_vm2 = vcmask 220160  }
   0x2   :  { %245 = vset.pattern.permute.xlu1 %v262_v3  ;;  %246 = vset.pattern.permute.xlu0 %v262_v3  ;;  %v251_v5 = vld [vmem:[%s333_s0] ss:$16 sps:$4 sm:$0xff]   ;;  %v252_v6 = vld [vmem:[%s333_s0 + $0x8] ss:$16 sps:$4 sm:$0xff]   ;;  %v70_v7 = vsel %vm68_vm1, %v69_v2, 0 }
   0x3   :  { %83 = vmatprep.subr.bf16.mxu0 %v247_v0  ;;  %124 = vmatprep.subr.bf16.mxu1 %v249_v4  ;;  %v253_v8 = vld [vmem:[%s333_s0 + $0x24] ss:$16 sps:$4 sm:$0x3f]   ;;  %v255_v9 = vld [vmem:[%s333_s0 + $0x2c] ss:$16 sps:$4 sm:$0x3f]  }
   0x4   :  { %84 = vmatpush1.bf16.msra.mxu0 %v251_v5  ;;  %125 = vmatpush1.bf16.msra.mxu1 %v252_v6  ;;  %v75_v10 = vand.u32 %v253_v8, %v70_v7  ;;  %v257_v11 = vld [vmem:[%s333_s0 + $0x20] ss:$16 sps:$4 sm:$0x3f]   ;;  %v258_v12 = vld [vmem:[%s333_s0 + $0x28] ss:$16 sps:$4 sm:$0x3f]   ;;  %v81_v13 = vand.u32 %v255_v9, %v70_v7 }
   0x5   :  { %v72_v14 = vand.u32 %v257_v11, %v70_v7  ;;  %v78_v15 = vand.u32 %v258_v12, %v70_v7  ;;  %v18_v16 = vld [vmem:[%s334_s1] sm:$0xf] }
   0x6   :  { %85 = vmatprep.subr.bf16.mxu0 %v75_v10  ;;  %126 = vmatprep.subr.bf16.mxu1 %v81_v13  ;;  %v193_v17 = vld [vmem:[%s335_s2] sm:$0xff] }
   0x7   :  { %196 = vperm.xlu1 %245, %v193_v17   ;;  %v203_v18 = vld [vmem:[%s336_s3] sm:$0xff] }
   0x8   :  { %86 = vmatpush1.bf16.msra.mxu0 %v72_v14  ;;  %127 = vmatpush1.bf16.msra.mxu1 %v78_v15 }
   0xb   :  { %241 = vmatmul.mubr.msk.bf16.vlgmr.msra.gmra.mrb[0].mxu0 %vm63_vm2, %v18_v16  ;;  %242 = vmatmul.mubr.msk.bf16.vlgmr.msra.gmra.mrb[0].mxu1 %vm63_vm2, %v18_v16 }
   0xc   :  { %206 = vperm.xlu1 %245, %v203_v18  }
  0x86   :  { %v197_v44 = vpop.permute.xlu1 %196 }
  0x8b   :  { %v207_v58 = vpop.permute.xlu1 %206 }
  0xde   :  { %v117_v19 = vpop.f32.mrb[0].mxu0  ;;  %v158_v20 = vpop.f32.mrb[0].mxu1 }
  0xdf   :  { %v170_v21 = vmul.f32 %v117_v19, %v117_v19  ;;  %v119_v22 = vpop.f32.mrb[1].mxu0  ;;  %v160_v23 = vpop.f32.mrb[1].mxu1  ;;  %v172_v24 = vmul.f32 %v158_v20, %v158_v20 }
  0xe0   :  { %v165_v25 = vadd.f32 %v119_v22, %v117_v19  ;;  %v171_v26 = vmul.f32 %v119_v22, %v119_v22  ;;  %v121_v27 = vpop.f32.mrb[2].mxu0  ;;  %v162_v28 = vpop.f32.mrb[2].mxu1  ;;  %v173_v34 = vmul.f32 %v160_v23, %v160_v23 }
  0xe1   :  { %v122_v29 = vpop.f32.mrb[3].mxu0  ;;  %v163_v30 = vpop.f32.mrb[3].mxu1 }
  0xe2   :  { %v166_v31 = vadd.f32 %v165_v25, %v158_v20  ;;  %v174_v32 = vadd.f32 %v171_v26, %v170_v21 }
  0xe4   :  { %v167_v33 = vadd.f32 %v166_v31, %v160_v23  ;;  %v175_v35 = vadd.f32 %v174_v32, %v172_v24 }
  0xe6   :  { %168 = vadd.xlane.f32.xlu0 %v167_v33  ;;  %v176_v36 = vadd.f32 %v175_v35, %v173_v34 }
  0xea   :  { %177 = vadd.xlane.f32.xlu0 %v176_v36 }
 0x173   :  { %v169_v37 = vpop.xlane.xlu0 %168 }
 0x174   :  { %v179_v38 = vmul.f32 0.001953125, %v169_v37 }
 0x176   :  { %v181_v40 = vmul.f32 %v179_v38, %v179_v38  ;;  %v183_v45 = vsub.f32 %v117_v19, %v179_v38  ;;  %v184_v46 = vsub.f32 %v119_v22, %v179_v38  ;;  %v185_v47 = vsub.f32 %v158_v20, %v179_v38 }
 0x177   :  { %v178_v39 = vpop.xlane.xlu0 %177  ;;  %v186_v48 = vsub.f32 %v160_v23, %v179_v38 }
 0x178   :  { %v180_v41 = vmul.f32 0.001953125, %v178_v39 }
 0x17a   :  { %v182_v42 = vsub.f32 %v180_v41, %v181_v40 }
 0x17c   :  { %v187_v43 = vadd.f32 1e-05, %v182_v42 }
 0x17e   :  { %259 = vrsqrt.f32 %v187_v43 }
 0x188   :  { %v260_v49 = vpop.eup %259 }
 0x189   :  { %v189_v50 = vmul.f32 %v260_v49, %v183_v45  ;;  %v190_v51 = vmul.f32 %v260_v49, %v184_v46  ;;  %v191_v52 = vmul.f32 %v260_v49, %v185_v47  ;;  %v192_v53 = vmul.f32 %v260_v49, %v186_v48 }
 0x18b   :  { %v199_v54 = vmul.f32 %v197_v44, %v189_v50  ;;  %v200_v55 = vmul.f32 %v197_v44, %v190_v51  ;;  %v201_v56 = vmul.f32 %v197_v44, %v191_v52  ;;  %v202_v57 = vmul.f32 %v197_v44, %v192_v53 }
 0x18d   :  { %v209_v59 = vadd.f32 %v207_v58, %v199_v54  ;;  %v210_v60 = vadd.f32 %v207_v58, %v200_v55  ;;  %v211_v61 = vadd.f32 %v207_v58, %v201_v56  ;;  %v212_v62 = vadd.f32 %v207_v58, %v202_v57 }
 0x18f   :  { %vm213_vm3 = vcmp.gt.f32.partialorder %v209_v59, 0.0  ;;  %vm214_vm4 = vcmp.gt.f32.partialorder %v210_v60, 0.0  ;;  %vm215_vm5 = vcmp.gt.f32.partialorder %v211_v61, 0.0  ;;  %vm216_vm6 = vcmp.gt.f32.partialorder %v212_v62, 0.0 }
 0x190   :  { %v217_v63 = vmul.f32 0.1, %v209_v59  ;;  %v218_v0 = vmul.f32 0.1, %v210_v60  ;;  %v219_v1 = vmul.f32 0.1, %v211_v61 }
 0x191   :  { %v220_v2 = vmul.f32 0.1, %v212_v62 }
 0x192   :  { %v221_v3 = vsel %vm213_vm3, %v209_v59, %v217_v63  ;;  %v222_v4 = vsel %vm214_vm4, %v210_v60, %v218_v0  ;;  %v223_v5 = vsel %vm215_vm5, %v211_v61, %v219_v1 }
 0x193   :  { %v224_v6 = vsel %vm216_vm6, %v212_v62, %v220_v2  ;;  %225 = vst [vmem:[%s337_s4] sm:$0xff] %v221_v3  ;;  %226 = vst [vmem:[%s337_s4 + $0x8] sm:$0xff] %v222_v4 }
 0x194   :  { %227 = vst [vmem:[%s337_s4 + $0x10] sm:$0xff] %v223_v5  ;;  %228 = vst [vmem:[%s337_s4 + $0x18] sm:$0xff] %v224_v6 }

// kernel: _lambda_.3
= control target key start
LH: loop header
LB: loop body
LE: loop exit
PB: predicated region body
PF: predicated region fallthrough
CT: control target
= control target key end

     0   :  { %vm145_vm0 = vcmask 588800   ;;  %vm170_vm1 = vcmask 1043456   ;;  %vm273_vm2 = vcmask 130048   ;;  %vm542_vm3 = vcmask 1040384   ;;  %s3956_s2 = inlined_call_operand.vmem [shape: bf16[72,16], index: 2, kind: input, shape index: {}]   ;;  %s3957_s0 = inlined_call_operand.vmem [shape: bf16[128,72], index: 0, kind: input, shape index: {}]   ;;  %s3958_s5 = inlined_call_operand.vmem [shape: bf16[16,16], index: 5, kind: input, shape index: {}]   ;;  %s3959_s3 = inlined_call_operand.vmem [shape: f32[1,16], index: 3, kind: input, shape index: {}]   ;;  %s3960_s4 = inlined_call_operand.vmem [shape: f32[1,16], index: 4, kind: input, shape index: {}]   ;;  %s3961_s8 = inlined_call_operand.vmem [shape: bf16[3,9,16], index: 8, kind: input, shape index: {}]   ;;  %s3962_s10 = inlined_call_operand.vmem [shape: bf16[3,9,16], index: 10, kind: input, shape index: {}]   ;;  %s3963_s11 = inlined_call_operand.vmem [shape: bf16[3,9,8], index: 11, kind: input, shape index: {}]   ;;  %s3964_s6 = inlined_call_operand.vmem [shape: f32[1,16], index: 6, kind: input, shape index: {}]   ;;  %s3965_s7 = inlined_call_operand.vmem [shape: f32[1,16], index: 7, kind: input, shape index: {}]   ;;  %s3966_s9 = inlined_call_operand.vmem [shape: f32[3,9,1], index: 9, kind: input, shape index: {}]   ;;  %s3967_s12 = inlined_call_operand.vmem [shape: f32[3,9,1], index: 12, kind: input, shape index: {}]   ;;  %s3968_s1 = inlined_call_operand.vmem [shape: bf16[8,512], index: 1, kind: input, shape index: {}]   ;;  %s3969_s13 = inlined_call_operand.vmem [shape: f32[2,128], index: 13, kind: input, shape index: {}]   ;;  %s3970_s15 = inlined_call_operand.vmem [shape: f32[3,9,128], index: 15, kind: output, shape index: {0}]   ;;  %s3971_s14 = inlined_call_operand.vmem [shape: f32[4,2,128], index: 14, kind: input, shape index: {}]   ;;  %s3972_s16 = inlined_call_operand.vmem [shape: f32[3,4,9,128], index: 16, kind: output, shape index: {1}]  }
   0x1   :  { %3974 = sst [smem:[#allocation2_spill]] %s3956_s2  ;;  %v2597_v3 = vld [vmem:[%s3957_s0] sm:$0xff]   ;;  %v2598_v7 = vld [vmem:[%s3957_s0 + $0x8] sm:$0xff]   ;;  %v2599_v8 = vld [vmem:[%s3957_s0 + $0x10] sm:$0xff]   ;;  %vm591_vm4 = vcmask 1046528  }
   0x2   :  { %s3975_s23 = sld [smem:[#allocation2_spill]]  ;;  %2432 = vmatprep.mubr.msk.bf16.mxu0 %vm145_vm0, %v2597_v3  ;;  %v2600_v9 = vld [vmem:[%s3957_s0 + $0x18] sm:$0xff]   ;;  %v2601_v10 = vld [vmem:[%s3957_s0 + $0x20] sm:$0xff]   ;;  %v2602_v11 = vld [vmem:[%s3957_s0 + $0x28] sm:$0xff]  }
   0x3   :  { %v2603_v12 = vld [vmem:[%s3957_s0 + $0x30] sm:$0xff]   ;;  %v2604_v13 = vld [vmem:[%s3957_s0 + $0x38] sm:$0xff]   ;;  %v2605_v14 = vld [vmem:[%s3958_s5] sm:$0xff]  }
   0x4   :  { %2448 = vmatprep.subr.bf16.mxu1 %v2605_v14 }
   0x5   :  { %2449 = vmatpush3.bf16.msra.mxu1 %v2605_v14 }
   0x8   :  { %v2592_v0 = vld [vmem:[%s3975_s23] sm:$0xff]   ;;  %v2593_v1 = vld [vmem:[%s3975_s23 + $0x8] sm:$0xff]   ;;  %v2594_v2 = vld [vmem:[%s3975_s23 + $0x10] sm:$0xff]  }
   0x9   :  { %2422 = vmatprep.subr.bf16.mxu0 %v2592_v0  ;;  %v2595_v4 = vld [vmem:[%s3975_s23 + $0x18] sm:$0xff]   ;;  %v2596_v5 = vld [vmem:[%s3975_s23 + $0x20] ss:$0 sps:$4 sm:$0xff]  }
   0xa   :  { %2423 = vmatpush3.bf16.msra.mxu0 %v2592_v0  ;;  %v172_v6 = vsel %vm170_vm1, %v2596_v5, 0 }
   0xb   :  { %2424 = vmatprep.subr.bf16.mxu0 %v2593_v1 }
   0xe   :  { %2425 = vmatpush3.bf16.msra.mxu0 %v2593_v1 }
   0xf   :  { %2426 = vmatprep.subr.bf16.mxu0 %v2594_v2 }
  0x12   :  { %2427 = vmatpush3.bf16.msra.mxu0 %v2594_v2 }
  0x13   :  { %2428 = vmatprep.subr.bf16.mxu0 %v2595_v4 }
  0x16   :  { %2429 = vmatpush3.bf16.msra.mxu0 %v2595_v4 }
  0x17   :  { %2586 = vmatprep.subr.msk.bf16.mxu0 %vm170_vm1, %v2596_v5 }
  0x1a   :  { %2431 = vmatpush3.bf16.msra.mxu0 %v172_v6 }
  0x1d   :  { %2433 = vmatmul.mubr.msk.bf16.vlgmr.msra.gmra.mrb[0].mxu0 %vm145_vm0, %v2598_v7 }
  0x1e   :  { %2436 = vmatprep.mubr.msk.bf16.mxu0 %vm145_vm0, %v2599_v8 }
  0x25   :  { %2437 = vmatmul.mubr.msk.bf16.gmra.mrb[4].mxu0 %vm145_vm0, %v2600_v9 }
  0x26   :  { %2440 = vmatprep.mubr.msk.bf16.mxu0 %vm145_vm0, %v2601_v10 }
  0x2d   :  { %2441 = vmatmul.mubr.msk.bf16.gmra.mrb[8].mxu0 %vm145_vm0, %v2602_v11 }
  0x2e   :  { %2444 = vmatprep.mubr.msk.bf16.mxu0 %vm145_vm0, %v2603_v12 }
  0x35   :  { %2445 = vmatmul.mubr.msk.bf16.gmra.mrb[12].mxu0 %vm145_vm0, %v2604_v13 }
  0xf0   :  { %v2913_v15 = vpop.f32.mrb[0].mxu0 }
  0xf1   :  { %v2915_v16 = vpop.f32.mrb[1].mxu0  ;;  %v313_v20 = vmul.f32 %v2913_v15, %v2913_v15  ;;  %v277_v25 = vsel %vm273_vm2, %v2913_v15, 0.0 }
  0xf2   :  { %v311_v17 = vmul.f32 %v2915_v16, %v2915_v16  ;;  %v2919_v18 = vpop.f32.mrb[2].mxu0  ;;  %v274_v21 = vsel %vm273_vm2, %v2915_v16, 0.0 }
  0xf3   :  { %v2921_v19 = vpop.f32.mrb[3].mxu0  ;;  %v314_v27 = vmul.f32 %v2919_v18, %v2919_v18  ;;  %v330_v31 = vsel %vm273_vm2, %v313_v20, 0.0  ;;  %v279_v32 = vsel %vm273_vm2, %v2919_v18, 0.0 }
  0xf4   :  { %v275_v22 = vsel %vm273_vm2, %v2921_v19, 0.0  ;;  %v312_v23 = vmul.f32 %v2921_v19, %v2921_v19  ;;  %v327_v26 = vsel %vm273_vm2, %v311_v17, 0.0 }
  0xf5   :  { %v276_v24 = vadd.f32 %v275_v22, %v274_v21  ;;  %v332_v37 = vsel %vm273_vm2, %v314_v27, 0.0 }
  0xf6   :  { %v328_v28 = vsel %vm273_vm2, %v312_v23, 0.0 }
  0xf7   :  { %v278_v29 = vadd.f32 %v277_v25, %v276_v24  ;;  %v329_v30 = vadd.f32 %v328_v28, %v327_v26 }
  0xf8   :  { %v2940_v33 = vpop.f32.mrb[4].mxu0 }
  0xf9   :  { %v331_v34 = vadd.f32 %v330_v31, %v329_v30  ;;  %v2942_v35 = vpop.f32.mrb[5].mxu0  ;;  %v280_v36 = vadd.f32 %v279_v32, %v278_v29  ;;  %v317_v44 = vmul.f32 %v2940_v33, %v2940_v33  ;;  %v285_v50 = vsel %vm273_vm2, %v2940_v33, 0.0 }
  0xfa   :  { %v281_v38 = vsel %vm273_vm2, %v2942_v35, 0.0  ;;  %v315_v39 = vmul.f32 %v2942_v35, %v2942_v35  ;;  %v2949_v40 = vpop.f32.mrb[6].mxu0 }
  0xfb   :  { %v282_v41 = vadd.f32 %v281_v38, %v280_v36  ;;  %v333_v42 = vadd.f32 %v332_v37, %v331_v34  ;;  %v2951_v43 = vpop.f32.mrb[7].mxu0  ;;  %v318_v51 = vmul.f32 %v2949_v40, %v2949_v40  ;;  %v338_v55 = vsel %vm273_vm2, %v317_v44, 0.0 }
  0xfc   :  { %v334_v45 = vsel %vm273_vm2, %v315_v39, 0.0  ;;  %v283_v46 = vsel %vm273_vm2, %v2951_v43, 0.0  ;;  %v316_v47 = vmul.f32 %v2951_v43, %v2951_v43  ;;  %v287_v56 = vsel %vm273_vm2, %v2949_v40, 0.0 }
  0xfd   :  { %v335_v48 = vadd.f32 %v334_v45, %v333_v42  ;;  %v284_v49 = vadd.f32 %v283_v46, %v282_v41  ;;  %v340_v61 = vsel %vm273_vm2, %v318_v51, 0.0 }
  0xfe   :  { %v336_v52 = vsel %vm273_vm2, %v316_v47, 0.0 }
  0xff   :  { %v286_v53 = vadd.f32 %v285_v50, %v284_v49  ;;  %v337_v54 = vadd.f32 %v336_v52, %v335_v48 }
 0x100   :  { %v2968_v57 = vpop.f32.mrb[8].mxu0 }
 0x101   :  { %v339_v58 = vadd.f32 %v338_v55, %v337_v54  ;;  %v2970_v59 = vpop.f32.mrb[9].mxu0  ;;  %v288_v60 = vadd.f32 %v287_v56, %v286_v53  ;;  %v321_v4 = vmul.f32 %v2968_v57, %v2968_v57  ;;  %v293_v10 = vsel %vm273_vm2, %v2968_v57, 0.0 }
 0x102   :  { %v289_v62 = vsel %vm273_vm2, %v2970_v59, 0.0  ;;  %v319_v63 = vmul.f32 %v2970_v59, %v2970_v59  ;;  %v2977_v0 = vpop.f32.mrb[10].mxu0 }
 0x103   :  { %v290_v1 = vadd.f32 %v289_v62, %v288_v60  ;;  %v341_v2 = vadd.f32 %v340_v61, %v339_v58  ;;  %v2979_v3 = vpop.f32.mrb[11].mxu0  ;;  %v322_v11 = vmul.f32 %v2977_v0, %v2977_v0  ;;  %v346_v17 = vsel %vm273_vm2, %v321_v4, 0.0 }
 0x104   :  { %v342_v5 = vsel %vm273_vm2, %v319_v63, 0.0  ;;  %v291_v6 = vsel %vm273_vm2, %v2979_v3, 0.0  ;;  %v320_v7 = vmul.f32 %v2979_v3, %v2979_v3  ;;  %v295_v20 = vsel %vm273_vm2, %v2977_v0, 0.0 }
 0x105   :  { %v343_v8 = vadd.f32 %v342_v5, %v341_v2  ;;  %v292_v9 = vadd.f32 %v291_v6, %v290_v1  ;;  %v348_v25 = vsel %vm273_vm2, %v322_v11, 0.0 }
 0x106   :  { %v344_v12 = vsel %vm273_vm2, %v320_v7, 0.0 }
 0x107   :  { %v294_v13 = vadd.f32 %v293_v10, %v292_v9  ;;  %v345_v14 = vadd.f32 %v344_v12, %v343_v8 }
 0x108   :  { %v2996_v21 = vpop.f32.mrb[12].mxu0 }
 0x109   :  { %v347_v22 = vadd.f32 %v346_v17, %v345_v14  ;;  %v2998_v23 = vpop.f32.mrb[13].mxu0  ;;  %v296_v24 = vadd.f32 %v295_v20, %v294_v13  ;;  %v325_v32 = vmul.f32 %v2996_v21, %v2996_v21  ;;  %v301_v41 = vsel %vm273_vm2, %v2996_v21, 0.0 }
 0x10a   :  { %v297_v26 = vsel %vm273_vm2, %v2998_v23, 0.0  ;;  %v323_v27 = vmul.f32 %v2998_v23, %v2998_v23  ;;  %v3005_v28 = vpop.f32.mrb[14].mxu0 }
 0x10b   :  { %v298_v29 = vadd.f32 %v297_v26, %v296_v24  ;;  %v349_v30 = vadd.f32 %v348_v25, %v347_v22  ;;  %v259_v31 = vpop.f32.mrb[15].mxu0  ;;  %v326_v42 = vmul.f32 %v3005_v28, %v3005_v28  ;;  %v354_v47 = vsel %vm273_vm2, %v325_v32, 0.0  ;;  %v3060_v26 = vld [vmem:[%s3959_s3] ss:$0 sm:$0xff] }
 0x10c   :  { %v350_v34 = vsel %vm273_vm2, %v323_v27, 0.0  ;;  %v299_v36 = vsel %vm273_vm2, %v259_v31, 0.0  ;;  %v324_v37 = vmul.f32 %v259_v31, %v259_v31  ;;  %v303_v48 = vsel %vm273_vm2, %v3005_v28, 0.0  ;;  %v3069_v32 = vld [vmem:[%s3960_s4] ss:$0 sm:$0xff] }
 0x10d   :  { %v351_v38 = vadd.f32 %v350_v34, %v349_v30  ;;  %v300_v39 = vadd.f32 %v299_v36, %v298_v29  ;;  %v356_v51 = vsel %vm273_vm2, %v326_v42, 0.0 }
 0x10e   :  { %v352_v44 = vsel %vm273_vm2, %v324_v37, 0.0 }
 0x10f   :  { %v302_v45 = vadd.f32 %v301_v41, %v300_v39  ;;  %v353_v46 = vadd.f32 %v352_v44, %v351_v38 }
 0x111   :  { %v304_v49 = vadd.f32 %v303_v48, %v302_v45  ;;  %v355_v50 = vadd.f32 %v354_v47, %v353_v46 }
 0x113   :  { %v305_v52 = vrot.slane %v304_v49, 4  ;;  %v357_v53 = vadd.f32 %v356_v51, %v355_v50 }
 0x115   :  { %v306_v54 = vadd.f32 %v305_v52, %v304_v49  ;;  %v358_v55 = vrot.slane %v357_v53, 4 }
 0x117   :  { %v307_v56 = vrot.slane %v306_v54, 2  ;;  %v359_v58 = vadd.f32 %v358_v55, %v357_v53 }
 0x119   :  { %v308_v60 = vadd.f32 %v307_v56, %v306_v54  ;;  %v360_v61 = vrot.slane %v359_v58, 2 }
 0x11b   :  { %v309_v62 = vrot.slane %v308_v60, 1  ;;  %v361_v63 = vadd.f32 %v360_v61, %v359_v58 }
 0x11d   :  { %v310_v1 = vadd.f32 %v309_v62, %v308_v60  ;;  %v362_v2 = vrot.slane %v361_v63, 1 }
 0x11f   :  { %v363_v4 = vadd.f32 %v362_v2, %v361_v63  ;;  %v3020_v5 = vmul.f32 0.0078125, %v310_v1 }
 0x121   :  { %v365_v6 = vmul.f32 0.0078125, %v363_v4  ;;  %v366_v7 = vmul.f32 %v3020_v5, %v3020_v5  ;;  %v381_v8 = vsub.f32 %v259_v31, %v3020_v5  ;;  %v368_v9 = vsub.f32 %v2915_v16, %v3020_v5 }
 0x122   :  { %v369_v10 = vsub.f32 %v2921_v19, %v3020_v5  ;;  %v370_v11 = vsub.f32 %v2913_v15, %v3020_v5  ;;  %v371_v12 = vsub.f32 %v2919_v18, %v3020_v5  ;;  %v372_v13 = vsub.f32 %v2942_v35, %v3020_v5 }
 0x123   :  { %v367_v14 = vsub.f32 %v365_v6, %v366_v7  ;;  %v373_v17 = vsub.f32 %v2951_v43, %v3020_v5  ;;  %v374_v20 = vsub.f32 %v2940_v33, %v3020_v5  ;;  %v375_v16 = vsub.f32 %v2949_v40, %v3020_v5 }
 0x124   :  { %v376_v19 = vsub.f32 %v2970_v59, %v3020_v5  ;;  %v377_v15 = vsub.f32 %v2979_v3, %v3020_v5  ;;  %v378_v18 = vsub.f32 %v2968_v57, %v3020_v5  ;;  %v379_v35 = vsub.f32 %v2977_v0, %v3020_v5 }
 0x125   :  { %v384_v22 = vadd.f32 1e-05, %v367_v14  ;;  %v380_v43 = vsub.f32 %v2998_v23, %v3020_v5  ;;  %v382_v33 = vsub.f32 %v2996_v21, %v3020_v5  ;;  %v383_v24 = vsub.f32 %v3005_v28, %v3020_v5 }
 0x127   :  { %2619 = vrsqrt.f32 %v384_v22 }
 0x131   :  { %v3055_v25 = vpop.eup %2619 }
 0x132   :  { %v399_v27 = vmul.f32 %v3055_v25, %v381_v8  ;;  %v386_v29 = vmul.f32 %v3055_v25, %v368_v9  ;;  %v387_v30 = vmul.f32 %v3055_v25, %v369_v10  ;;  %v388_v31 = vmul.f32 %v3055_v25, %v370_v11 }
 0x133   :  { %v389_v34 = vmul.f32 %v3055_v25, %v371_v12  ;;  %v390_v36 = vmul.f32 %v3055_v25, %v372_v13  ;;  %v391_v37 = vmul.f32 %v3055_v25, %v373_v17  ;;  %v392_v38 = vmul.f32 %v3055_v25, %v374_v20 }
 0x134   :  { %v421_v39 = vmul.f32 %v3060_v26, %v399_v27  ;;  %v408_v41 = vmul.f32 %v3060_v26, %v386_v29  ;;  %v409_v42 = vmul.f32 %v3060_v26, %v387_v30  ;;  %v410_v44 = vmul.f32 %v3060_v26, %v388_v31 }
 0x135   :  { %v411_v45 = vmul.f32 %v3060_v26, %v389_v34  ;;  %v412_v46 = vmul.f32 %v3060_v26, %v390_v36  ;;  %v413_v47 = vmul.f32 %v3060_v26, %v391_v37  ;;  %v414_v48 = vmul.f32 %v3060_v26, %v392_v38 }
 0x136   :  { %v443_v49 = vadd.f32 %v3069_v32, %v421_v39  ;;  %v430_v50 = vadd.f32 %v3069_v32, %v408_v41  ;;  %v431_v51 = vadd.f32 %v3069_v32, %v409_v42  ;;  %v432_v52 = vadd.f32 %v3069_v32, %v410_v44 }
 0x137   :  { %v433_v53 = vadd.f32 %v3069_v32, %v411_v45  ;;  %v434_v54 = vadd.f32 %v3069_v32, %v412_v46  ;;  %v435_v55 = vadd.f32 %v3069_v32, %v413_v47  ;;  %v3091_v56 = vadd.f32 %v3069_v32, %v414_v48 }
 0x138   :  { %vm459_vm5 = vcmp.gt.f32.partialorder %v443_v49, 0.0  ;;  %v475_v58 = vmul.f32 0.1, %v443_v49  ;;  %vm446_vm6 = vcmp.gt.f32.partialorder %v430_v50, 0.0  ;;  %vm447_vm7 = vcmp.gt.f32.partialorder %v431_v51, 0.0 }
 0x139   :  { %vm448_vm8 = vcmp.gt.f32.partialorder %v432_v52, 0.0  ;;  %v462_v60 = vmul.f32 0.1, %v430_v50  ;;  %v463_v61 = vmul.f32 0.1, %v431_v51  ;;  %vm449_vm9 = vcmp.gt.f32.partialorder %v433_v53, 0.0 }
 0x13a   :  { %v3093_v62 = vsel %vm459_vm5, %v443_v49, %v475_v58  ;;  %v464_v63 = vmul.f32 0.1, %v432_v52  ;;  %vm450_vm10 = vcmp.gt.f32.partialorder %v434_v54, 0.0  ;;  %v465_v1 = vmul.f32 0.1, %v433_v53 }
 0x13b   :  { %v523_v2 = vrot.slane %v3093_v62, 7  ;;  %v478_v4 = vsel %vm446_vm6, %v430_v50, %v462_v60  ;;  %v479_v6 = vsel %vm447_vm7, %v431_v51, %v463_v61  ;;  %v466_v7 = vmul.f32 0.1, %v434_v54 }
 0x13c   :  { %v480_v8 = vsel %vm448_vm8, %v432_v52, %v464_v63  ;;  %v510_v9 = vrot.slane %v478_v4, 7  ;;  %v511_v10 = vrot.slane %v479_v6, 7  ;;  %v559_v11 = vrot.slane %v478_v4, 1 }
 0x13d   :  { %v512_v12 = vrot.slane %v480_v8, 7  ;;  %v560_v13 = vrot.slane %v479_v6, 1  ;;  %v561_v14 = vrot.slane %v480_v8, 1  ;;  %v481_v17 = vsel %vm449_vm9, %v433_v53, %v465_v1 }
 0x13e   :  { %v543_v20 = vsel %vm542_vm3, %v478_v4, %v510_v9  ;;  %v544_v22 = vsel %vm542_vm3, %v479_v6, %v511_v10  ;;  %v592_v27 = vsel %vm591_vm4, %v559_v11, %v478_v4  ;;  %v482_v29 = vsel %vm450_vm10, %v434_v54, %v466_v7 }
 0x13f   :  { %v545_v30 = vsel %vm542_vm3, %v480_v8, %v512_v12  ;;  %v593_v31 = vsel %vm591_vm4, %v560_v13, %v479_v6  ;;  %v594_v34 = vsel %vm591_vm4, %v561_v14, %v480_v8  ;;  %v608_v36 = vmax.f32 %v543_v20, %v478_v4 }
 0x140   :  { %v609_v37 = vmax.f32 %v544_v22, %v479_v6  ;;  %v610_v38 = vmax.f32 %v545_v30, %v480_v8  ;;  %v513_v39 = vrot.slane %v481_v17, 7  ;;  %v514_v41 = vrot.slane %v482_v29, 7 }
 0x141   :  { %v624_v42 = vmax.f32 %v608_v36, %v592_v27  ;;  %v562_v44 = vrot.slane %v481_v17, 1  ;;  %v563_v45 = vrot.slane %v482_v29, 1  ;;  %vm451_vm11 = vcmp.gt.f32.partialorder %v435_v55, 0.0 }
 0x142   :  { %v625_v46 = vmax.f32 %v609_v37, %v593_v31  ;;  %v626_v47 = vmax.f32 %v610_v38, %v594_v34  ;;  %v546_v48 = vsel %vm542_vm3, %v481_v17, %v513_v39  ;;  %v547_v49 = vsel %vm542_vm3, %v482_v29, %v514_v41 }
 0x143   :  { %v595_v50 = vsel %vm591_vm4, %v562_v44, %v481_v17  ;;  %v596_v51 = vsel %vm591_vm4, %v563_v45, %v482_v29  ;;  %v611_v52 = vmax.f32 %v546_v48, %v481_v17  ;;  %v612_v53 = vmax.f32 %v547_v49, %v482_v29 }
 0x144   :  { %v3108_v54 = vmax.f32 %v624_v42, %v625_v46  ;;  %v641_v58 = vmax.f32 %v625_v46, %v626_v47  ;;  %vm452_vm12 = vcmp.gt.f32.partialorder %v3091_v56, 0.0  ;;  %v467_v60 = vmul.f32 0.1, %v435_v55 }
 0x145   :  { %v627_v61 = vmax.f32 %v611_v52, %v595_v50  ;;  %v628_v63 = vmax.f32 %v612_v53, %v596_v51  ;;  %v468_v1 = vmul.f32 0.1, %v3091_v56  ;;  %v393_v4 = vmul.f32 %v3055_v25, %v375_v16 }
 0x146   :  { %v3117_v6 = vmax.f32 %v3108_v54, %v626_v47  ;;  %v483_v7 = vsel %vm451_vm11, %v435_v55, %v467_v60  ;;  %v394_v8 = vmul.f32 %v3055_v25, %v376_v19  ;;  %v395_v9 = vmul.f32 %v3055_v25, %v377_v15 }
 0x147   :  { %v642_v10 = vmax.f32 %v626_v47, %v627_v61  ;;  %v3128_v11 = vmax.f32 %v641_v58, %v627_v61  ;;  %v484_v40 = vsel %vm452_vm12, %v3091_v56, %v468_v1  ;;  %v515_v16 = vrot.slane %v483_v7, 7 }
 0x148   :  { %v668_v12 = vpack.c.bf16 %v3117_v6, %v3108_v54  ;;  %v516_v55 = vrot.slane %v484_v40, 7  ;;  %v564_v13 = vrot.slane %v483_v7, 1  ;;  %v565_v14 = vrot.slane %v484_v40, 1 }
 0x149   :  { %v3133_v59 = vmax.f32 %v642_v10, %v628_v63  ;;  %v548_v19 = vsel %vm542_vm3, %v483_v7, %v515_v16  ;;  %v643_v17 = vmax.f32 %v627_v61, %v628_v63  ;;  %v415_v3 = vmul.f32 %v3060_v26, %v393_v4 }
 0x14a   :  { %2450 = vmatprep.mubr.msk.bf16.mxu1 %vm273_vm2, %v668_v12  ;;  %v549_v15 = vsel %vm542_vm3, %v484_v40, %v516_v55  ;;  %v597_v56 = vsel %vm591_vm4, %v564_v13, %v483_v7  ;;  %v598_v20 = vsel %vm591_vm4, %v565_v14, %v484_v40  ;;  %v613_v22 = vmax.f32 %v548_v19, %v483_v7 }
 0x14b   :  { %v669_v27 = vpack.c.bf16 %v3133_v59, %v3128_v11  ;;  %v614_v29 = vmax.f32 %v549_v15, %v484_v40  ;;  %v437_v30 = vadd.f32 %v3069_v32, %v415_v3  ;;  %v396_v31 = vmul.f32 %v3055_v25, %v378_v18 }
 0x14c   :  { %v629_v34 = vmax.f32 %v613_v22, %v597_v56  ;;  %v416_v36 = vmul.f32 %v3060_v26, %v394_v8  ;;  %v417_v37 = vmul.f32 %v3060_v26, %v395_v9  ;;  %v397_v38 = vmul.f32 %v3055_v25, %v379_v35 }
 0x14d   :  { %2451 = vmatmul.mubr.msk.bf16.vlgmr.msra.gmra.mrb[0].mxu1 %vm273_vm2, %v669_v27  ;;  %v630_v39 = vmax.f32 %v614_v29, %v598_v20  ;;  %vm453_vm13 = vcmp.gt.f32.partialorder %v437_v30, 0.0  ;;  %v469_v41 = vmul.f32 0.1, %v437_v30  ;;  %v418_v42 = vmul.f32 %v3060_v26, %v396_v31 }
 0x14e   :  { %v644_v57 = vmax.f32 %v628_v63, %v629_v34  ;;  %v3156_v44 = vmax.f32 %v643_v17, %v629_v34  ;;  %v438_v18 = vadd.f32 %v3069_v32, %v416_v36  ;;  %v439_v45 = vadd.f32 %v3069_v32, %v417_v37 }
 0x14f   :  { %v485_v46 = vsel %vm453_vm13, %v437_v30, %v469_v41  ;;  %v645_v47 = vmax.f32 %v629_v34, %v630_v39  ;;  %v440_v0 = vadd.f32 %v3069_v32, %v418_v42  ;;  %v398_v35 = vmul.f32 %v3055_v25, %v380_v43 }
 0x150   :  { %v3165_v48 = vmax.f32 %v644_v57, %v630_v39  ;;  %v517_v49 = vrot.slane %v485_v46, 7  ;;  %v566_v50 = vrot.slane %v485_v46, 1  ;;  %vm454_vm14 = vcmp.gt.f32.partialorder %v438_v18, 0.0 }
 0x151   :  { %vm455_vm15 = vcmp.gt.f32.partialorder %v439_v45, 0.0  ;;  %vm456_vm0 = vcmp.gt.f32.partialorder %v440_v0, 0.0  ;;  %v470_v51 = vmul.f32 0.1, %v438_v18  ;;  %v471_v52 = vmul.f32 0.1, %v439_v45 }
 0x152   :  { %v670_v53 = vpack.c.bf16 %v3165_v48, %v3156_v44  ;;  %v550_v58 = vsel %vm542_vm3, %v485_v46, %v517_v49  ;;  %v599_v60 = vsel %vm591_vm4, %v566_v50, %v485_v46  ;;  %v472_v61 = vmul.f32 0.1, %v440_v0 }
 0x153   :  { %v615_v23 = vmax.f32 %v550_v58, %v485_v46  ;;  %v486_v63 = vsel %vm454_vm14, %v438_v18, %v470_v51  ;;  %v487_v43 = vsel %vm455_vm15, %v439_v45, %v471_v52  ;;  %v419_v1 = vmul.f32 %v3060_v26, %v397_v38 }
 0x154   :  { %2454 = vmatprep.mubr.msk.bf16.mxu1 %vm273_vm2, %v670_v53  ;;  %v488_v4 = vsel %vm456_vm0, %v440_v0, %v472_v61  ;;  %v518_v7 = vrot.slane %v486_v63, 7  ;;  %v519_v8 = vrot.slane %v487_v43, 7  ;;  %v567_v9 = vrot.slane %v486_v63, 1 }
 0x155   :  { %v631_v10 = vmax.f32 %v615_v23, %v599_v60  ;;  %v520_v40 = vrot.slane %v488_v4, 7  ;;  %v568_v16 = vrot.slane %v487_v43, 1  ;;  %v569_v12 = vrot.slane %v488_v4, 1 }
 0x156   :  { %v551_v55 = vsel %vm542_vm3, %v486_v63, %v518_v7  ;;  %v552_v13 = vsel %vm542_vm3, %v487_v43, %v519_v8  ;;  %v600_v14 = vsel %vm591_vm4, %v567_v9, %v486_v63  ;;  %v420_v19 = vmul.f32 %v3060_v26, %v398_v35 }
 0x157   :  { %v646_v17 = vmax.f32 %v630_v39, %v631_v10  ;;  %v3177_v3 = vmax.f32 %v645_v47, %v631_v10  ;;  %v553_v15 = vsel %vm542_vm3, %v488_v4, %v520_v40  ;;  %v601_v56 = vsel %vm591_vm4, %v568_v16, %v487_v43 }
 0x158   :  { %v602_v20 = vsel %vm591_vm4, %v569_v12, %v488_v4  ;;  %v616_v22 = vmax.f32 %v551_v55, %v486_v63  ;;  %v617_v27 = vmax.f32 %v552_v13, %v487_v43  ;;  %v618_v29 = vmax.f32 %v553_v15, %v488_v4 }
 0x159   :  { %v3182_v30 = vmax.f32 %v646_v17, %v631_v10  ;;  %v441_v31 = vadd.f32 %v3069_v32, %v419_v1  ;;  %v442_v34 = vadd.f32 %v3069_v32, %v420_v19  ;;  %v400_v36 = vmul.f32 %v3055_v25, %v382_v33 }
 0x15a   :  { %v632_v37 = vmax.f32 %v616_v22, %v600_v14  ;;  %v633_v38 = vmax.f32 %v617_v27, %v601_v56  ;;  %v634_v39 = vmax.f32 %v618_v29, %v602_v20  ;;  %v556_v41 = vsel %vm542_vm3, %v3093_v62, %v523_v2 }
 0x15b   :  { %v671_v42 = vpack.c.bf16 %v3182_v30, %v3177_v3  ;;  %vm457_vm5 = vcmp.gt.f32.partialorder %v441_v31, 0.0  ;;  %vm458_vm6 = vcmp.gt.f32.partialorder %v442_v34, 0.0  ;;  %v473_v57 = vmul.f32 0.1, %v441_v31 }
 0x15c   :  { %v3196_v18 = vmax.f32 %v632_v37, %v633_v38  ;;  %v474_v45 = vmul.f32 0.1, %v442_v34  ;;  %v648_v21 = vmax.f32 %v633_v38, %v634_v39  ;;  %v422_v33 = vmul.f32 %v3060_v26, %v400_v36 }
 0x15d   :  { %2455 = vmatmul.mubr.msk.bf16.gmra.mrb[4].mxu1 %vm273_vm2, %v671_v42  ;;  %v489_v46 = vsel %vm457_vm5, %v441_v31, %v473_v57  ;;  %v572_v47 = vrot.slane %v3093_v62, 1  ;;  %v621_v0 = vmax.f32 %v556_v41, %v3093_v62  ;;  %v401_v2 = vmul.f32 %v3055_v25, %v383_v24 }
 0x15e   :  { %v3207_v35 = vmax.f32 %v3196_v18, %v634_v39  ;;  %v490_v49 = vsel %vm458_vm6, %v442_v34, %v474_v45  ;;  %v521_v50 = vrot.slane %v489_v46, 7  ;;  %v570_v51 = vrot.slane %v489_v46, 1 }
 0x15f   :  { %v522_v52 = vrot.slane %v490_v49, 7  ;;  %v571_v53 = vrot.slane %v490_v49, 1  ;;  %v444_v58 = vadd.f32 %v3069_v32, %v422_v33  ;;  %v605_v28 = vsel %vm591_vm4, %v572_v47, %v3093_v62 }
 0x160   :  { %v672_v60 = vpack.c.bf16 %v3207_v35, %v3196_v18  ;;  %v554_v61 = vsel %vm542_vm3, %v489_v46, %v521_v50  ;;  %v603_v24 = vsel %vm591_vm4, %v570_v51, %v489_v46  ;;  %v637_v43 = vmax.f32 %v621_v0, %v605_v28 }
 0x161   :  { %v555_v5 = vsel %vm542_vm3, %v490_v49, %v522_v52  ;;  %v619_v25 = vmax.f32 %v554_v61, %v489_v46  ;;  %vm460_vm7 = vcmp.gt.f32.partialorder %v444_v58, 0.0  ;;  %v476_v63 = vmul.f32 0.1, %v444_v58 }
 0x162   :  { %2458 = vmatprep.mubr.msk.bf16.mxu1 %vm273_vm2, %v672_v60  ;;  %v620_v23 = vmax.f32 %v555_v5, %v490_v49  ;;  %v423_v1 = vmul.f32 %v3060_v26, %v401_v2  ;;  %v604_v4 = vsel %vm591_vm4, %v571_v53, %v490_v49  ;;  %v2773_v33 = vmov 0.0  }
 0x163   :  { %v635_v7 = vmax.f32 %v619_v25, %v603_v24  ;;  %v492_v9 = vsel %vm460_vm7, %v444_v58, %v476_v63  ;;  %2466 = vmatprep.subr.bf16.mxu1 %v2773_v33  ;;  %2486 = vmatprep.subr.bf16.mxu0 %v2773_v33 }
 0x164   :  { %v636_v8 = vmax.f32 %v620_v23, %v604_v4  ;;  %v445_v62 = vadd.f32 %v3069_v32, %v423_v1  ;;  %v524_v16 = vrot.slane %v492_v9, 7  ;;  %v573_v12 = vrot.slane %v492_v9, 1 }
 0x165   :  { %v649_v10 = vmax.f32 %v634_v39, %v635_v7  ;;  %v3221_v40 = vmax.f32 %v648_v21, %v635_v7 }
 0x166   :  { %v650_v55 = vmax.f32 %v635_v7, %v636_v8  ;;  %v651_v13 = vmax.f32 %v636_v8, %v637_v43  ;;  %vm461_vm8 = vcmp.gt.f32.partialorder %v445_v62, 0.0  ;;  %v477_v14 = vmul.f32 0.1, %v445_v62 }
 0x167   :  { %v3223_v19 = vmax.f32 %v649_v10, %v636_v8  ;;  %v557_v26 = vsel %vm542_vm3, %v492_v9, %v524_v16  ;;  %v606_v20 = vsel %vm591_vm4, %v573_v12, %v492_v9 }
 0x168   :  { %v622_v17 = vmax.f32 %v557_v26, %v492_v9  ;;  %v3226_v15 = vmax.f32 %v650_v55, %v637_v43  ;;  %v493_v56 = vsel %vm461_vm8, %v445_v62, %v477_v14 }
 0x169   :  { %v673_v32 = vpack.c.bf16 %v3223_v19, %v3221_v40  ;;  %v525_v22 = vrot.slane %v493_v56, 7  ;;  %v574_v27 = vrot.slane %v493_v56, 1 }
 0x16a   :  { %v638_v29 = vmax.f32 %v622_v17, %v606_v20 }
 0x16b   :  { %2459 = vmatmul.mubr.msk.bf16.gmra.mrb[8].mxu1 %vm273_vm2, %v673_v32  ;;  %v558_v31 = vsel %vm542_vm3, %v493_v56, %v525_v22  ;;  %v607_v38 = vsel %vm591_vm4, %v574_v27, %v493_v56  ;;  %vm2774_vm3 = vmmov 0  }
 0x16c   :  { %v3233_v34 = vmax.f32 %v651_v13, %v638_v29  ;;  %v623_v36 = vmax.f32 %v558_v31, %v493_v56  ;;  %v652_v37 = vmax.f32 %v637_v43, %v638_v29  ;;  %2502 = vmatprep.mubr.msk.bf16.mxu0 %vm2774_vm3, %v2773_v33 }
 0x16e   :  { %v674_v39 = vpack.c.bf16 %v3233_v34, %v3226_v15  ;;  %v639_v41 = vmax.f32 %v623_v36, %v607_v38 }
 0x170   :  { %2462 = vmatprep.mubr.msk.bf16.mxu1 %vm273_vm2, %v674_v39  ;;  %v653_v42 = vmax.f32 %v638_v29, %v639_v41  ;;  %v3239_v57 = vmax.f32 %v652_v37, %v639_v41 }
 0x172   :  { %v3241_v45 = vmax.f32 %v653_v42, %v639_v41 }
 0x174   :  { %v675_v21 = vpack.c.bf16 %v3241_v45, %v3239_v57 }
 0x176   :  { %2463 = vmatmul.mubr.msk.bf16.gmra.mrb[12].mxu1 %vm273_vm2, %v675_v21 }
 0x177   :  { %2482 = vmatprep.mubr.msk.bf16.mxu1 %vm2774_vm3, %v2773_v33 }
 0x220   :  { %v3248_v46 = vpop.f32.mrb[0].mxu1 }
 0x221   :  { %v3250_v47 = vpop.f32.mrb[1].mxu1  ;;  %v846_v50 = vmul.f32 %v3248_v46, %v3248_v46  ;;  %v810_v60 = vsel %vm273_vm2, %v3248_v46, 0.0 }
 0x222   :  { %v844_v0 = vmul.f32 %v3250_v47, %v3250_v47  ;;  %v3254_v2 = vpop.f32.mrb[2].mxu1  ;;  %v807_v51 = vsel %vm273_vm2, %v3250_v47, 0.0 }
 0x223   :  { %v3256_v49 = vpop.f32.mrb[3].mxu1  ;;  %v847_v28 = vmul.f32 %v3254_v2, %v3254_v2  ;;  %v863_v23 = vsel %vm273_vm2, %v846_v50, 0.0  ;;  %v812_v63 = vsel %vm273_vm2, %v3254_v2, 0.0 }
 0x224   :  { %v808_v52 = vsel %vm273_vm2, %v3256_v49, 0.0  ;;  %v845_v53 = vmul.f32 %v3256_v49, %v3256_v49  ;;  %v860_v61 = vsel %vm273_vm2, %v844_v0, 0.0 }
 0x225   :  { %v809_v58 = vadd.f32 %v808_v52, %v807_v51  ;;  %v865_v4 = vsel %vm273_vm2, %v847_v28, 0.0 }
 0x226   :  { %v861_v5 = vsel %vm273_vm2, %v845_v53, 0.0 }
 0x227   :  { %v811_v24 = vadd.f32 %v810_v60, %v809_v58  ;;  %v862_v25 = vadd.f32 %v861_v5, %v860_v61 }
 0x229   :  { %v864_v43 = vadd.f32 %v863_v23, %v862_v25  ;;  %v813_v1 = vadd.f32 %v812_v63, %v811_v24  ;;  %v2775_v23 = vmov 0  }
 0x22a   :  { %2590 = vset.pattern.permute.xlu0 %v2775_v23  ;;  %2591 = vset.pattern.permute.xlu1 %v2775_v23 }
 0x22b   :  { %v866_v7 = vadd.f32 %v865_v4, %v864_v43 }
 0x230   :  { %v3276_v8 = vpop.f32.mrb[4].mxu1 }
 0x231   :  { %v3278_v9 = vpop.f32.mrb[5].mxu1  ;;  %v850_v13 = vmul.f32 %v3276_v8, %v3276_v8  ;;  %v818_v20 = vsel %vm273_vm2, %v3276_v8, 0.0 }
 0x232   :  { %v814_v62 = vsel %vm273_vm2, %v3278_v9, 0.0  ;;  %v848_v10 = vmul.f32 %v3278_v9, %v3278_v9  ;;  %v3284_v16 = vpop.f32.mrb[6].mxu1 }
 0x233   :  { %v815_v12 = vadd.f32 %v814_v62, %v813_v1  ;;  %v3286_v55 = vpop.f32.mrb[7].mxu1  ;;  %v851_v22 = vmul.f32 %v3284_v16, %v3284_v16  ;;  %v871_v36 = vsel %vm273_vm2, %v850_v13, 0.0  ;;  %v820_v37 = vsel %vm273_vm2, %v3284_v16, 0.0 }
 0x234   :  { %v867_v14 = vsel %vm273_vm2, %v848_v10, 0.0  ;;  %v816_v26 = vsel %vm273_vm2, %v3286_v55, 0.0  ;;  %v849_v17 = vmul.f32 %v3286_v55, %v3286_v55 }
 0x235   :  { %v868_v56 = vadd.f32 %v867_v14, %v866_v7  ;;  %v817_v32 = vadd.f32 %v816_v26, %v815_v12  ;;  %v873_v41 = vsel %vm273_vm2, %v851_v22, 0.0 }
 0x236   :  { %v869_v27 = vsel %vm273_vm2, %v849_v17, 0.0 }
 0x237   :  { %v819_v29 = vadd.f32 %v818_v20, %v817_v32  ;;  %v870_v31 = vadd.f32 %v869_v27, %v868_v56 }
 0x239   :  { %v872_v38 = vadd.f32 %v871_v36, %v870_v31  ;;  %v821_v39 = vadd.f32 %v820_v37, %v819_v29 }
 0x23b   :  { %v874_v42 = vadd.f32 %v873_v41, %v872_v38 }
 0x23e   :  { %v3308_v21 = vpop.f32.mrb[8].mxu1 }
 0x23f   :  { %v3310_v0 = vpop.f32.mrb[9].mxu1  ;;  %v854_v53 = vmul.f32 %v3308_v21, %v3308_v21  ;;  %v826_v63 = vsel %vm273_vm2, %v3308_v21, 0.0 }
 0x240   :  { %v822_v50 = vsel %vm273_vm2, %v3310_v0, 0.0  ;;  %v852_v51 = vmul.f32 %v3310_v0, %v3310_v0  ;;  %v3316_v52 = vpop.f32.mrb[10].mxu1 }
 0x241   :  { %v823_v58 = vadd.f32 %v822_v50, %v821_v39  ;;  %v3320_v60 = vpop.f32.mrb[11].mxu1  ;;  %v855_v43 = vmul.f32 %v3316_v52, %v3316_v52  ;;  %v879_v62 = vsel %vm273_vm2, %v854_v53, 0.0  ;;  %v828_v10 = vsel %vm273_vm2, %v3316_v52, 0.0 }
 0x242   :  { %v875_v61 = vsel %vm273_vm2, %v852_v51, 0.0  ;;  %v824_v28 = vsel %vm273_vm2, %v3320_v60, 0.0  ;;  %v853_v5 = vmul.f32 %v3320_v60, %v3320_v60 }
 0x243   :  { %v876_v24 = vadd.f32 %v875_v61, %v874_v42  ;;  %v825_v25 = vadd.f32 %v824_v28, %v823_v58  ;;  %v881_v14 = vsel %vm273_vm2, %v855_v43, 0.0 }
 0x244   :  { %v877_v1 = vsel %vm273_vm2, %v853_v5, 0.0 }
 0x245   :  { %v827_v4 = vadd.f32 %v826_v63, %v825_v25  ;;  %v878_v7 = vadd.f32 %v877_v1, %v876_v24 }
 0x247   :  { %v880_v12 = vadd.f32 %v879_v62, %v878_v7  ;;  %v829_v13 = vadd.f32 %v828_v10, %v827_v4 }
 0x249   :  { %v3338_v26 = vpop.f32.mrb[12].mxu1  ;;  %v882_v17 = vadd.f32 %v881_v14, %v880_v12 }
 0x24a   :  { %v3340_v56 = vpop.f32.mrb[13].mxu1  ;;  %v858_v31 = vmul.f32 %v3338_v26, %v3338_v26  ;;  %v834_v42 = vsel %vm273_vm2, %v3338_v26, 0.0 }
 0x24b   :  { %v830_v32 = vsel %vm273_vm2, %v3340_v56, 0.0  ;;  %v856_v20 = vmul.f32 %v3340_v56, %v3340_v56  ;;  %v3346_v22 = vpop.f32.mrb[14].mxu1 }
 0x24c   :  { %v831_v27 = vadd.f32 %v830_v32, %v829_v13  ;;  %v793_v29 = vpop.f32.mrb[15].mxu1  ;;  %v859_v50 = vmul.f32 %v3346_v22, %v3346_v22  ;;  %v887_v61 = vsel %vm273_vm2, %v858_v31, 0.0  ;;  %v836_v28 = vsel %vm273_vm2, %v3346_v22, 0.0 }
 0x24d   :  { %v883_v36 = vsel %vm273_vm2, %v856_v20, 0.0  ;;  %v832_v37 = vsel %vm273_vm2, %v793_v29, 0.0  ;;  %v857_v38 = vmul.f32 %v793_v29, %v793_v29 }
 0x24e   :  { %v884_v39 = vadd.f32 %v883_v36, %v882_v17  ;;  %v833_v41 = vadd.f32 %v832_v37, %v831_v27  ;;  %v889_v25 = vsel %vm273_vm2, %v859_v50, 0.0 }
 0x24f   :  { %v885_v51 = vsel %vm273_vm2, %v857_v38, 0.0 }
 0x250   :  { %v835_v53 = vadd.f32 %v834_v42, %v833_v41  ;;  %v886_v58 = vadd.f32 %v885_v51, %v884_v39 }
 0x252   :  { %v837_v5 = vadd.f32 %v836_v28, %v835_v53  ;;  %v888_v24 = vadd.f32 %v887_v61, %v886_v58  ;;  %v3401_v28 = vld [vmem:[%s3964_s6] ss:$0 sm:$0xff] }
 0x254   :  { %v838_v63 = vrot.slane %v837_v5, 4  ;;  %v890_v43 = vadd.f32 %v889_v25, %v888_v24 }
 0x256   :  { %v839_v1 = vadd.f32 %v838_v63, %v837_v5  ;;  %v891_v4 = vrot.slane %v890_v43, 4 }
 0x258   :  { %v840_v7 = vrot.slane %v839_v1, 2  ;;  %v892_v62 = vadd.f32 %v891_v4, %v890_v43  ;;  %v3410_v43 = vld [vmem:[%s3965_s7] ss:$0 sm:$0xff] }
 0x25a   :  { %v841_v10 = vadd.f32 %v840_v7, %v839_v1  ;;  %v893_v12 = vrot.slane %v892_v62, 2 }
 0x25c   :  { %v842_v13 = vrot.slane %v841_v10, 1  ;;  %v894_v14 = vadd.f32 %v893_v12, %v892_v62 }
 0x25e   :  { %v843_v17 = vadd.f32 %v842_v13, %v841_v10  ;;  %v895_v32 = vrot.slane %v894_v14, 1 }
 0x260   :  { %v896_v20 = vadd.f32 %v895_v32, %v894_v14  ;;  %v3361_v27 = vmul.f32 0.0078125, %v843_v17 }
 0x262   :  { %v898_v31 = vmul.f32 0.0078125, %v896_v20  ;;  %v899_v36 = vmul.f32 %v3361_v27, %v3361_v27  ;;  %v914_v37 = vsub.f32 %v793_v29, %v3361_v27  ;;  %v901_v38 = vsub.f32 %v3250_v47, %v3361_v27 }
 0x263   :  { %v902_v39 = vsub.f32 %v3256_v49, %v3361_v27  ;;  %v903_v41 = vsub.f32 %v3248_v46, %v3361_v27  ;;  %v904_v42 = vsub.f32 %v3254_v2, %v3361_v27  ;;  %v905_v50 = vsub.f32 %v3278_v9, %v3361_v27 }
 0x264   :  { %v900_v51 = vsub.f32 %v898_v31, %v899_v36  ;;  %v906_v53 = vsub.f32 %v3286_v55, %v3361_v27  ;;  %v907_v29 = vsub.f32 %v3276_v8, %v3361_v27  ;;  %v908_v47 = vsub.f32 %v3284_v16, %v3361_v27 }
 0x265   :  { %v909_v49 = vsub.f32 %v3310_v0, %v3361_v27  ;;  %v910_v46 = vsub.f32 %v3320_v60, %v3361_v27  ;;  %v911_v2 = vsub.f32 %v3308_v21, %v3361_v27  ;;  %v912_v9 = vsub.f32 %v3316_v52, %v3361_v27 }
 0x266   :  { %v917_v58 = vadd.f32 1e-05, %v900_v51  ;;  %v913_v55 = vsub.f32 %v3340_v56, %v3361_v27  ;;  %v915_v8 = vsub.f32 %v3338_v26, %v3361_v27  ;;  %v916_v16 = vsub.f32 %v3346_v22, %v3361_v27 }
 0x268   :  { %2621 = vrsqrt.f32 %v917_v58 }
 0x272   :  { %v3396_v61 = vpop.eup %2621 }
 0x273   :  { %v932_v5 = vmul.f32 %v3396_v61, %v914_v37  ;;  %v919_v24 = vmul.f32 %v3396_v61, %v901_v38  ;;  %v920_v25 = vmul.f32 %v3396_v61, %v902_v39  ;;  %v921_v63 = vmul.f32 %v3396_v61, %v903_v41 }
 0x274   :  { %v922_v1 = vmul.f32 %v3396_v61, %v904_v42  ;;  %v923_v4 = vmul.f32 %v3396_v61, %v905_v50  ;;  %v924_v7 = vmul.f32 %v3396_v61, %v906_v53  ;;  %v925_v62 = vmul.f32 %v3396_v61, %v907_v29 }
 0x275   :  { %v954_v10 = vmul.f32 %v3401_v28, %v932_v5  ;;  %v941_v12 = vmul.f32 %v3401_v28, %v919_v24  ;;  %v942_v13 = vmul.f32 %v3401_v28, %v920_v25  ;;  %v943_v14 = vmul.f32 %v3401_v28, %v921_v63 }
 0x276   :  { %v944_v17 = vmul.f32 %v3401_v28, %v922_v1  ;;  %v945_v32 = vmul.f32 %v3401_v28, %v923_v4  ;;  %v946_v20 = vmul.f32 %v3401_v28, %v924_v7  ;;  %v926_v31 = vmul.f32 %v3396_v61, %v908_v47 }
 0x277   :  { %v963_v36 = vadd.f32 %v3410_v43, %v941_v12  ;;  %v964_v37 = vadd.f32 %v3410_v43, %v942_v13  ;;  %v965_v38 = vadd.f32 %v3410_v43, %v943_v14  ;;  %v3431_v50 = vadd.f32 %v3410_v43, %v954_v10 }
 0x278   :  { %v966_v39 = vadd.f32 %v3410_v43, %v944_v17  ;;  %v967_v41 = vadd.f32 %v3410_v43, %v945_v32  ;;  %v968_v42 = vadd.f32 %v3410_v43, %v946_v20  ;;  %v947_v51 = vmul.f32 %v3401_v28, %v925_v62 }
 0x279   :  { %vm979_vm4 = vcmp.gt.f32.partialorder %v963_v36, 0.0  ;;  %vm980_vm9 = vcmp.gt.f32.partialorder %v964_v37, 0.0  ;;  %v995_v53 = vmul.f32 0.1, %v963_v36  ;;  %v996_v29 = vmul.f32 0.1, %v964_v37 }
 0x27a   :  { %vm981_vm10 = vcmp.gt.f32.partialorder %v965_v38, 0.0  ;;  %vm982_vm11 = vcmp.gt.f32.partialorder %v966_v39, 0.0  ;;  %v997_v47 = vmul.f32 0.1, %v965_v38  ;;  %v998_v58 = vmul.f32 0.1, %v966_v39 }
 0x27b   :  { %vm983_vm12 = vcmp.gt.f32.partialorder %v967_v41, 0.0  ;;  %vm984_vm13 = vcmp.gt.f32.partialorder %v968_v42, 0.0  ;;  %v1011_v5 = vsel %vm979_vm4, %v963_v36, %v995_v53  ;;  %v1012_v24 = vsel %vm980_vm9, %v964_v37, %v996_v29 }
 0x27c   :  { %v999_v25 = vmul.f32 0.1, %v967_v41  ;;  %v1000_v63 = vmul.f32 0.1, %v968_v42  ;;  %v1027_v1 = vadd.f32 %v1011_v5, %v3108_v54  ;;  %v1028_v4 = vadd.f32 %v1012_v24, %v3117_v6 }
 0x27d   :  { %v1013_v7 = vsel %vm981_vm10, %v965_v38, %v997_v47  ;;  %v1014_v10 = vsel %vm982_vm11, %v966_v39, %v998_v58  ;;  %v948_v36 = vmul.f32 %v3401_v28, %v926_v31  ;;  %v969_v6 = vadd.f32 %v3410_v43, %v947_v51 }
 0x27e   :  { %v1029_v62 = vadd.f32 %v1013_v7, %v3128_v11  ;;  %v1030_v12 = vadd.f32 %v1014_v10, %v3133_v59  ;;  %v1015_v13 = vsel %vm983_vm12, %v967_v41, %v999_v25  ;;  %v1016_v14 = vsel %vm984_vm13, %v968_v42, %v1000_v63 }
 0x27f   :  { %v1043_v17 = vpack.c.bf16 %v1028_v4, %v1027_v1  ;;  %v3439_v32 = vadd.f32 %v1015_v13, %v3156_v44  ;;  %v3442_v20 = vadd.f32 %v1016_v14, %v3165_v48  ;;  %v927_v11 = vmul.f32 %v3396_v61, %v909_v49 }
 0x280   :  { %v1044_v54 = vpack.c.bf16 %v1030_v12, %v1029_v62  ;;  %v928_v59 = vmul.f32 %v3396_v61, %v910_v46  ;;  %v970_v31 = vadd.f32 %v3410_v43, %v948_v36  ;;  %v929_v0 = vmul.f32 %v3396_v61, %v911_v2 }
 0x281   :  { %v3455_v44 = vsel %vm273_vm2, %v1043_v17, 0  ;;  %v1045_v48 = vpack.c.bf16 %v3442_v20, %v3439_v32  ;;  %vm992_vm14 = vcmp.gt.f32.partialorder %v3431_v50, 0.0  ;;  %vm985_vm15 = vcmp.gt.f32.partialorder %v969_v6, 0.0  ;;  %v1056_v17 = vld [vmem:[%s3966_s9] sm:$0xff] }
 0x282   :  { %2467 = vmatpush3.bf16.xpose.msra.mxu1 %v3455_v44  ;;  %2487 = vmatpush3.bf16.xpose.msra.mxu0 %v3455_v44  ;;  %v1001_v60 = vmul.f32 0.1, %v969_v6  ;;  %v949_v49 = vmul.f32 %v3401_v28, %v927_v11  ;;  %v1008_v46 = vmul.f32 0.1, %v3431_v50  ;;  %vm986_vm0 = vcmp.gt.f32.partialorder %v970_v31, 0.0 }
 0x283   :  { %2468 = vmatprep.subr.bf16.mxu1 %v2773_v33  ;;  %2488 = vmatprep.subr.bf16.mxu0 %v2773_v33  ;;  %v1002_v21 = vmul.f32 0.1, %v970_v31  ;;  %v950_v2 = vmul.f32 %v3401_v28, %v928_v59  ;;  %v930_v39 = vmul.f32 %v3396_v61, %v912_v9  ;;  %v951_v41 = vmul.f32 %v3401_v28, %v929_v0 }
 0x284   :  { %v1017_v37 = vsel %vm985_vm15, %v969_v6, %v1001_v60  ;;  %v971_v38 = vadd.f32 %v3410_v43, %v949_v49  ;;  %v931_v29 = vmul.f32 %v3396_v61, %v913_v55  ;;  %v3493_v24 = vsel %vm273_vm2, %v1044_v54, 0  ;;  %1060 = vperm.xlu0 %2590, %v1056_v17   ;;  %v1057_v60 = vld [vmem:[%s3966_s9 + $0x8] sm:$0x1] }
 0x285   :  { %v1018_v42 = vsel %vm986_vm0, %v970_v31, %v1002_v21  ;;  %v3479_v51 = vadd.f32 %v1017_v37, %v3177_v3  ;;  %v972_v53 = vadd.f32 %v3410_v43, %v950_v2  ;;  %v952_v9 = vmul.f32 %v3401_v28, %v930_v39 }
 0x286   :  { %v3487_v47 = vadd.f32 %v1018_v42, %v3182_v30  ;;  %vm987_vm5 = vcmp.gt.f32.partialorder %v971_v38, 0.0  ;;  %v1003_v52 = vmul.f32 0.1, %v971_v38  ;;  %v973_v5 = vadd.f32 %v3410_v43, %v951_v41 }
 0x287   :  { %vm988_vm6 = vcmp.gt.f32.partialorder %v972_v53, 0.0  ;;  %v1004_v58 = vmul.f32 0.1, %v972_v53  ;;  %v953_v3 = vmul.f32 %v3401_v28, %v931_v29  ;;  %v974_v30 = vadd.f32 %v3410_v43, %v952_v9  ;;  %v2608_v29 = vld [vmem:[%s3962_s10] sm:$0x1f]  }
 0x288   :  { %v1046_v56 = vpack.c.bf16 %v3487_v47, %v3479_v51  ;;  %v1019_v55 = vsel %vm987_vm5, %v971_v38, %v1003_v52  ;;  %vm989_vm7 = vcmp.gt.f32.partialorder %v973_v5, 0.0  ;;  %v1005_v1 = vmul.f32 0.1, %v973_v5  ;;  %v1051_v38 = vld [vmem:[%s3968_s1] sm:$0xff]  ;;  %v1052_v51 = vld [vmem:[%s3968_s1 + $0x8] sm:$0xff] }
 0x289   :  { %v1020_v25 = vsel %vm988_vm6, %v972_v53, %v1004_v58  ;;  %v3499_v63 = vadd.f32 %v1019_v55, %v3196_v18  ;;  %vm990_vm8 = vcmp.gt.f32.partialorder %v974_v30, 0.0  ;;  %v1006_v7 = vmul.f32 0.1, %v974_v30  ;;  %v2606_v53 = vld [vmem:[%s3961_s8] sm:$0x1f]  }
 0x28a   :  { %2469 = vmatpush3.bf16.xpose.msra.mxu1 %v3493_v24  ;;  %2489 = vmatpush3.bf16.xpose.msra.mxu0 %v3493_v24  ;;  %v1036_v4 = vadd.f32 %v1020_v25, %v3207_v35  ;;  %v1021_v10 = vsel %vm989_vm7, %v973_v5, %v1005_v1  ;;  %v975_v62 = vadd.f32 %v3410_v43, %v953_v3  ;;  %v3536_v22 = vsel %vm273_vm2, %v1045_v48, 0  ;;  %v1336_v48 = vld [vmem:[%s3967_s12] sm:$0xff]  ;;  %v2265_v3 = vld [vmem:[%s3966_s9 + $0x18] sm:$0x1]  ;;  %v2613_v55 = vld [vmem:[%s3961_s8 + $0x8] sm:$0x1f]  }
 0x28b   :  { %2470 = vmatprep.subr.bf16.mxu1 %v2773_v33  ;;  %2490 = vmatprep.subr.bf16.mxu0 %v2773_v33  ;;  %v1024_v18 = vsel %vm992_vm14, %v3431_v50, %v1008_v46  ;;  %v1022_v13 = vsel %vm990_vm8, %v974_v30, %v1006_v7  ;;  %v1037_v14 = vadd.f32 %v1021_v10, %v3221_v40  ;;  %v3558_v46 = vsel %vm273_vm2, %v1046_v56, 0  ;;  %v2611_v58 = vld [vmem:[%s3963_s11] sm:$0x1f]   ;;  %v2284_v56 = vld [vmem:[%s3967_s12 + $0x18] sm:$0x1] }
 0x28c   :  { %v1047_v12 = vpack.c.bf16 %v1036_v4, %v3499_v63  ;;  %v933_v35 = vmul.f32 %v3396_v61, %v915_v8  ;;  %v1038_v36 = vadd.f32 %v1022_v13, %v3223_v19  ;;  %vm991_vm4 = vcmp.gt.f32.partialorder %v975_v62, 0.0  ;;  %v2264_v8 = vld [vmem:[%s3966_s9 + $0x10] sm:$0xff]  ;;  %v2614_v30 = vld [vmem:[%s3963_s11 + $0x8] sm:$0x1f]  }
 0x28d   :  { %v1007_v54 = vmul.f32 0.1, %v975_v62  ;;  %v934_v50 = vmul.f32 %v3396_v61, %v916_v16  ;;  %v1040_v40 = vadd.f32 %v1024_v18, %v3233_v34  ;;  %1470 = vperm.xlu0 %2590, %v2264_v8   ;;  %v2306_v61 = vld [vmem:[%s3966_s9 + $0x20] sm:$0xff]  ;;  %v3594_v39 = vcombine.high %v1051_v38, %v1051_v38  ;;  %v2615_v25 = vld [vmem:[%s3962_s10 + $0x8] sm:$0x1f]  }
 0x28e   :  { %v955_v26 = vmul.f32 %v3401_v28, %v933_v35  ;;  %v1048_v6 = vpack.c.bf16 %v1038_v36, %v1037_v14  ;;  %1833 = vperm.xlu1 %2591, %v2306_v61   ;;  %v3571_v21 = vsel %vm273_vm2, %v1047_v12, 0  ;;  %v2237_v42 = vcombine.low %v1051_v38, %v1051_v38  ;;  %v2616_v63 = vld [vmem:[%s3961_s8 + $0x10] sm:$0x1f]  }
 0x28f   :  { %v1023_v11 = vsel %vm991_vm4, %v975_v62, %v1007_v54  ;;  %v956_v19 = vmul.f32 %v3401_v28, %v934_v50  ;;  %v3616_v52 = vcombine.high %v1052_v51, %v1052_v51  ;;  %v2239_v9 = vcombine.low %v1052_v51, %v1052_v51  ;;  %v2617_v1 = vld [vmem:[%s3963_s11 + $0x10] sm:$0x1f]  }
 0x290   :  { %v1039_v59 = vadd.f32 %v1023_v11, %v3226_v15  ;;  %v977_v31 = vadd.f32 %v3410_v43, %v955_v26  ;;  %v3578_v2 = vsel %vm273_vm2, %v1048_v6, 0  ;;  %v3614_v47 = vsel %vm170_vm1, %v2237_v42, 0  ;;  %v2618_v4 = vld [vmem:[%s3962_s10 + $0x10] sm:$0x1f]  }
 0x291   :  { %v978_v34 = vadd.f32 %v3410_v43, %v956_v19  ;;  %v2283_v43 = vld [vmem:[%s3967_s12 + $0x10] sm:$0xff]  ;;  %vm1234_vm11 = vcmask 64512   ;;  %v3632_v5 = vsel %vm170_vm1, %v2239_v9, 0 }
 0x292   :  { %2471 = vmatpush3.bf16.xpose.msra.mxu1 %v3536_v22  ;;  %2491 = vmatpush3.bf16.xpose.msra.mxu0 %v3536_v22  ;;  %v1049_v27 = vpack.c.bf16 %v1040_v40, %v1039_v59  ;;  %vm993_vm9 = vcmp.gt.f32.partialorder %v977_v31, 0.0  ;;  %v1009_v16 = vmul.f32 0.1, %v977_v31 }
 0x293   :  { %2472 = vmatprep.subr.bf16.mxu1 %v2773_v33  ;;  %2492 = vmatprep.subr.bf16.mxu0 %v2773_v33  ;;  %vm994_vm10 = vcmp.gt.f32.partialorder %v978_v34, 0.0  ;;  %v1010_v15 = vmul.f32 0.1, %v978_v34 }
 0x294   :  { %v1025_v28 = vsel %vm993_vm9, %v977_v31, %v1009_v16  ;;  %1707 = vperm.xlu0 %2590, %v2283_v43   ;;  %1342 = vperm.xlu1 %2591, %v1336_v48   ;;  %v3585_v37 = vsel %vm273_vm2, %v1049_v27, 0 }
 0x295   :  { %v1026_v32 = vsel %vm994_vm10, %v978_v34, %v1010_v15  ;;  %v1041_v20 = vadd.f32 %v1025_v28, %v3239_v57  ;;  %v2325_v57 = vld [vmem:[%s3967_s12 + $0x20] sm:$0xff] }
 0x296   :  { %v1042_v0 = vadd.f32 %v1026_v32, %v3241_v45  ;;  %v1337_v45 = vld [vmem:[%s3967_s12 + $0x8] sm:$0x1] }
 0x298   :  { %v1050_v49 = vpack.c.bf16 %v1042_v0, %v1041_v20  ;;  %1065 = vperm.xlu0 %2590, %v1057_v60   ;;  %2070 = vperm.xlu1 %2591, %v2325_v57  }
 0x29a   :  { %2473 = vmatpush3.bf16.xpose.msra.mxu1 %v3558_v46  ;;  %2493 = vmatpush3.bf16.xpose.msra.mxu0 %v3558_v46  ;;  %v3597_v41 = vsel %vm273_vm2, %v1050_v49, 0 }
 0x29b   :  { %2474 = vmatprep.subr.bf16.mxu1 %v2773_v33  ;;  %2494 = vmatprep.subr.bf16.mxu0 %v2773_v33 }
 0x29c   :  { %1347 = vperm.xlu1 %2591, %v1337_v45   ;;  %1475 = vperm.xlu0 %2590, %v2265_v3  }
 0x2a0   :  { %1712 = vperm.xlu1 %2591, %v2284_v56  }
 0x2a2   :  { %2475 = vmatpush3.bf16.xpose.msra.mxu1 %v3571_v21  ;;  %2495 = vmatpush3.bf16.xpose.msra.mxu0 %v3571_v21 }
 0x2a3   :  { %2476 = vmatprep.subr.bf16.mxu1 %v2773_v33  ;;  %2496 = vmatprep.subr.bf16.mxu0 %v2773_v33 }
 0x2aa   :  { %2477 = vmatpush3.bf16.xpose.msra.mxu1 %v3578_v2  ;;  %2497 = vmatpush3.bf16.xpose.msra.mxu0 %v3578_v2 }
 0x2ab   :  { %2478 = vmatprep.subr.bf16.mxu1 %v2773_v33  ;;  %2498 = vmatprep.subr.bf16.mxu0 %v2773_v33 }
 0x2b2   :  { %2479 = vmatpush3.bf16.xpose.msra.mxu1 %v3585_v37  ;;  %2499 = vmatpush3.bf16.xpose.msra.mxu0 %v3585_v37 }
 0x2b3   :  { %2480 = vmatprep.subr.bf16.mxu1 %v2773_v33  ;;  %2500 = vmatprep.subr.bf16.mxu0 %v2773_v33 }
 0x2ba   :  { %2481 = vmatpush3.bf16.xpose.msra.mxu1 %v3597_v41  ;;  %2501 = vmatpush3.bf16.xpose.msra.mxu0 %v3597_v41 }
 0x2bb   :  { %2241 = vmatprep.subr.msk.bf16.mxu1 %vm170_vm1, %v3594_v39  ;;  %2506 = vmatprep.subr.bf16.mxu0 %v2773_v33 }
 0x2c1   :  { %2483 = vmatmul.mubr.msk.bf16.vlgmr.msra.gmra.mrb[16].mxu1 %vm273_vm2, %v2606_v53  ;;  %2503 = vmatmul.mubr.msk.bf16.vlgmr.msra.gmra.mrb[16].mxu0 %vm273_vm2, %v2608_v29 }
 0x2c2   :  { %1251 = vmatpush1.bf16.msra.mxu1 %v3614_v47  ;;  %2507 = vmatpush3.bf16.xpose.msra.mxu0 %v3455_v44 }
 0x2c3   :  { %1282 = vmatprep.mubr.bf16.mxu1 %v2775_v23  ;;  %2243 = vmatprep.subr.msk.bf16.mxu1 %vm170_vm1, %v3616_v52 }
 0x2c4   :  { %2508 = vmatprep.subr.bf16.mxu0 %v2773_v33  ;;  %2522 = vmatprep.mubr.msk.bf16.mxu0 %vm2774_vm3, %v2773_v33 }
 0x2c9   :  { %2242 = vmatmul.mubr.msk.bf16.vlgmr.msra.gmra.mrb[20].mxu1 %vm1234_vm11, %v2611_v58 }
 0x2ca   :  { %1294 = vmatpush1.bf16.msra.mxu1 %v3632_v5  ;;  %2509 = vmatpush3.bf16.xpose.msra.mxu0 %v3493_v24 }
 0x2cb   :  { %1325 = vmatprep.mubr.bf16.mxu1 %v2775_v23  ;;  %2510 = vmatprep.subr.bf16.mxu0 %v2773_v33 }
 0x2cc   :  { %2526 = vmatprep.subr.bf16.mxu1 %v2773_v33 }
 0x2d1   :  { %2244 = vmatmul.mubr.msk.bf16.vlgmr.msra.gmra.mrb[24].mxu1 %vm1234_vm11, %v2611_v58 }
 0x2d2   :  { %2511 = vmatpush3.bf16.xpose.msra.mxu0 %v3536_v22  ;;  %2542 = vmatprep.mubr.msk.bf16.mxu1 %vm2774_vm3, %v2773_v33 }
 0x2d3   :  { %2527 = vmatpush3.bf16.xpose.msra.mxu1 %v3455_v44  ;;  %2512 = vmatprep.subr.bf16.mxu0 %v2773_v33 }
 0x2d4   :  { %2528 = vmatprep.subr.bf16.mxu1 %v2773_v33 }
 0x2da   :  { %2513 = vmatpush3.bf16.xpose.msra.mxu0 %v3558_v46 }
 0x2db   :  { %2529 = vmatpush3.bf16.xpose.msra.mxu1 %v3493_v24  ;;  %2514 = vmatprep.subr.bf16.mxu0 %v2773_v33 }
 0x2dc   :  { %2530 = vmatprep.subr.bf16.mxu1 %v2773_v33 }
 0x2e2   :  { %2515 = vmatpush3.bf16.xpose.msra.mxu0 %v3571_v21 }
 0x2e3   :  { %2531 = vmatpush3.bf16.xpose.msra.mxu1 %v3536_v22  ;;  %2516 = vmatprep.subr.bf16.mxu0 %v2773_v33 }
 0x2e4   :  { %2532 = vmatprep.subr.bf16.mxu1 %v2773_v33 }
 0x2ea   :  { %2517 = vmatpush3.bf16.xpose.msra.mxu0 %v3578_v2 }
 0x2eb   :  { %2533 = vmatpush3.bf16.xpose.msra.mxu1 %v3558_v46  ;;  %2518 = vmatprep.subr.bf16.mxu0 %v2773_v33 }
 0x2ec   :  { %2534 = vmatprep.subr.bf16.mxu1 %v2773_v33 }
 0x2f2   :  { %2519 = vmatpush3.bf16.xpose.msra.mxu0 %v3585_v37 }
 0x2f3   :  { %2535 = vmatpush3.bf16.xpose.msra.mxu1 %v3571_v21  ;;  %2520 = vmatprep.subr.bf16.mxu0 %v2773_v33 }
 0x2f4   :  { %2536 = vmatprep.subr.bf16.mxu1 %v2773_v33 }
 0x2fa   :  { %2521 = vmatpush3.bf16.xpose.msra.mxu0 %v3597_v41 }
 0x2fb   :  { %2537 = vmatpush3.bf16.xpose.msra.mxu1 %v3578_v2  ;;  %2279 = vmatprep.subr.msk.bf16.mxu0 %vm170_vm1, %v3594_v39 }
 0x2fc   :  { %2538 = vmatprep.subr.bf16.mxu1 %v2773_v33 }
 0x301   :  { %2523 = vmatmul.mubr.msk.bf16.vlgmr.msra.gmra.mrb[20].mxu0 %vm273_vm2, %v2613_v55 }
 0x302   :  { %1615 = vmatpush1.bf16.msra.mxu0 %v3614_v47  ;;  %1646 = vmatprep.mubr.bf16.mxu0 %v2775_v23 }
 0x303   :  { %2539 = vmatpush3.bf16.xpose.msra.mxu1 %v3585_v37  ;;  %2546 = vmatprep.subr.bf16.mxu0 %v2773_v33 }
 0x304   :  { %2540 = vmatprep.subr.bf16.mxu1 %v2773_v33 }
 0x309   :  { %2280 = vmatmul.mubr.msk.bf16.vlgmr.msra.gmra.mrb[24].mxu0 %vm1234_vm11, %v2614_v30 }
 0x30a   :  { %2562 = vmatprep.mubr.msk.bf16.mxu0 %vm2774_vm3, %v2773_v33 }
 0x30b   :  { %2541 = vmatpush3.bf16.xpose.msra.mxu1 %v3597_v41  ;;  %2547 = vmatpush3.bf16.xpose.msra.mxu0 %v3455_v44 }
 0x30c   :  { %2281 = vmatprep.subr.msk.bf16.mxu1 %vm170_vm1, %v3616_v52  ;;  %2548 = vmatprep.subr.bf16.mxu0 %v2773_v33 }
 0x30d   :  { %v3761_v10 = vpop.permute.xlu1 %1833 }
 0x312   :  { %2543 = vmatmul.mubr.msk.bf16.vlgmr.msra.gmra.mrb[28].mxu1 %vm273_vm2, %v2615_v25 }
 0x313   :  { %1658 = vmatpush1.bf16.msra.mxu1 %v3632_v5  ;;  %2549 = vmatpush3.bf16.xpose.msra.mxu0 %v3493_v24  ;;  %v1343_v18 = vpop.permute.xlu1 %1342 }
 0x314   :  { %1689 = vmatprep.mubr.bf16.mxu1 %v2775_v23  ;;  %2550 = vmatprep.subr.bf16.mxu0 %v2773_v33 }
 0x315   :  { %2566 = vmatprep.subr.bf16.mxu1 %v2773_v33 }
 0x317   :  { %v3765_v6 = vpop.permute.xlu1 %2070 }
 0x31a   :  { %2282 = vmatmul.mubr.msk.bf16.vlgmr.msra.gmra.mrb[32].mxu1 %vm1234_vm11, %v2614_v30 }
 0x31b   :  { %2551 = vmatpush3.bf16.xpose.msra.mxu0 %v3536_v22  ;;  %2582 = vmatprep.mubr.msk.bf16.mxu1 %vm2774_vm3, %v2773_v33  ;;  %v1348_v27 = vpop.permute.xlu1 %1347  ;;  %vm1161_vm3 = vcmask 1042432  }
 0x31c   :  { %2567 = vmatpush3.bf16.xpose.msra.mxu1 %v3455_v44  ;;  %2552 = vmatprep.subr.bf16.mxu0 %v2773_v33  ;;  %v2326_v44 = vld [vmem:[%s3967_s12 + $0x28] sm:$0x1] }
 0x31d   :  { %2568 = vmatprep.subr.bf16.mxu1 %v2773_v33  ;;  %2075 = vperm.xlu1 %2591, %v2326_v44  }
 0x323   :  { %2553 = vmatpush3.bf16.xpose.msra.mxu0 %v3558_v46 }
 0x324   :  { %2569 = vmatpush3.bf16.xpose.msra.mxu1 %v3493_v24  ;;  %2554 = vmatprep.subr.bf16.mxu0 %v2773_v33  ;;  %v2307_v24 = vld [vmem:[%s3966_s9 + $0x28] sm:$0x1] }
 0x325   :  { %2570 = vmatprep.subr.bf16.mxu1 %v2773_v33  ;;  %1838 = vperm.xlu0 %2590, %v2307_v24  }
 0x32b   :  { %2555 = vmatpush3.bf16.xpose.msra.mxu0 %v3571_v21 }
 0x32c   :  { %2571 = vmatpush3.bf16.xpose.msra.mxu1 %v3536_v22  ;;  %2556 = vmatprep.subr.bf16.mxu0 %v2773_v33 }
 0x32d   :  { %2572 = vmatprep.subr.bf16.mxu1 %v2773_v33 }
 0x333   :  { %2557 = vmatpush3.bf16.xpose.msra.mxu0 %v3578_v2 }
 0x334   :  { %2573 = vmatpush3.bf16.xpose.msra.mxu1 %v3558_v46  ;;  %2558 = vmatprep.subr.bf16.mxu0 %v2773_v33 }
 0x335   :  { %2574 = vmatprep.subr.bf16.mxu1 %v2773_v33 }
 0x33b   :  { %2559 = vmatpush3.bf16.xpose.msra.mxu0 %v3585_v37 }
 0x33c   :  { %2575 = vmatpush3.bf16.xpose.msra.mxu1 %v3571_v21  ;;  %2560 = vmatprep.subr.bf16.mxu0 %v2773_v33 }
 0x33d   :  { %2576 = vmatprep.subr.bf16.mxu1 %v2773_v33 }
 0x343   :  { %2561 = vmatpush3.bf16.xpose.msra.mxu0 %v3597_v41 }
 0x344   :  { %2577 = vmatpush3.bf16.xpose.msra.mxu1 %v3578_v2  ;;  %2321 = vmatprep.subr.msk.bf16.mxu0 %vm170_vm1, %v3594_v39 }
 0x345   :  { %2578 = vmatprep.subr.bf16.mxu1 %v2773_v33 }
 0x34a   :  { %2563 = vmatmul.mubr.msk.bf16.vlgmr.msra.gmra.mrb[28].mxu0 %vm273_vm2, %v2616_v63  ;;  %v3770_v63 = vld [vmem:[%s3969_s13] sm:$0x3] }
 0x34b   :  { %1978 = vmatpush1.bf16.msra.mxu0 %v3614_v47  ;;  %2009 = vmatprep.mubr.bf16.mxu0 %v2775_v23 }
 0x34c   :  { %2579 = vmatpush3.bf16.xpose.msra.mxu1 %v3585_v37 }
 0x34d   :  { %2580 = vmatprep.subr.bf16.mxu1 %v2773_v33  ;;  %v1061_v33 = vpop.permute.xlu0 %1060 }
 0x351   :  { %v3759_v7 = vpop.permute.xlu0 %1470 }
 0x352   :  { %2322 = vmatmul.mubr.msk.bf16.vlgmr.msra.gmra.mrb[32].mxu0 %vm1234_vm11, %v2617_v1 }
 0x354   :  { %2581 = vmatpush3.bf16.xpose.msra.mxu1 %v3597_v41 }
 0x355   :  { %2323 = vmatprep.subr.msk.bf16.mxu1 %vm170_vm1, %v3616_v52  ;;  %v3763_v62 = vpop.permute.xlu0 %1707 }
 0x359   :  { %v1066_v12 = vpop.permute.xlu0 %1065 }
 0x35b   :  { %2583 = vmatmul.mubr.msk.bf16.vlgmr.msra.gmra.mrb[36].mxu1 %vm273_vm2, %v2618_v4  ;;  %vm1159_vm2 = vcmask 1041408  }
 0x35c   :  { %2021 = vmatpush1.bf16.msra.mxu1 %v3632_v5  ;;  %2052 = vmatprep.mubr.bf16.mxu1 %v2775_v23 }
 0x363   :  { %2324 = vmatmul.mubr.msk.bf16.vlgmr.msra.gmra.mrb[40].mxu1 %vm1234_vm11, %v2617_v1 }
 0x394   :  { %v1134_v13 = vpop.f32.mrb[16].mxu1  ;;  %v1210_v14 = vpop.f32.mrb[16].mxu0 }
 0x395   :  { %v1135_v35 = vadd.f32 %v1134_v13, %v1061_v33  ;;  %v2484_v17 = vpop.f32.mrb[17].mxu1  ;;  %v2504_v36 = vpop.f32.mrb[17].mxu0 }
 0x396   :  { %v1137_v54 = vpop.f32.mrb[18].mxu1  ;;  %v1213_v50 = vpop.f32.mrb[18].mxu0 }
 0x397   :  { %v2232_v40 = vmul.f32 -1.442695, %v1135_v35  ;;  %v1138_v23 = vadd.f32 %v1137_v54, %v1066_v12  ;;  %v2485_v26 = vpop.f32.mrb[19].mxu1  ;;  %v2505_v8 = vpop.f32.mrb[19].mxu0  ;;  %v1149_v28 = vmul.f32 1.442695, %v1135_v35 }
 0x399   :  { %2623 = vpow2.f32 %v2232_v40  ;;  %v2233_v11 = vmul.f32 -1.442695, %v1138_v23 }
 0x39b   :  { %2625 = vpow2.f32 %v2233_v11 }
 0x39c   :  { %v1284_v19 = vpop.f32.mrb[20].mxu1 }
 0x39d   :  { %v1338_v59 = vadd.f32 %v1284_v19, %v1210_v14  ;;  %v1286_v31 = vpop.f32.mrb[21].mxu1 }
 0x39e   :  { %v1375_v22 = vadd.f32 %v1286_v31, %v1210_v14  ;;  %v1288_v34 = vpop.f32.mrb[22].mxu1 }
 0x39f   :  { %v1350_v16 = vadd.f32 %v1343_v18, %v1338_v59  ;;  %v1339_v15 = vadd.f32 %v1288_v34, %v1213_v50  ;;  %v1290_v61 = vpop.f32.mrb[23].mxu1 }
 0x3a0   :  { %v1377_v43 = vadd.f32 %v1375_v22, %v1343_v18  ;;  %v1376_v32 = vadd.f32 %v1290_v61, %v1213_v50 }
 0x3a1   :  { %v2245_v20 = vmul.f32 -1.442695, %v1350_v16  ;;  %v1351_v48 = vadd.f32 %v1348_v27, %v1339_v15  ;;  %v1360_v47 = vmul.f32 1.442695, %v1350_v16  ;;  %v1352_v16 = vld [vmem:[%s3971_s14] sm:$0x3] }
 0x3a2   :  { %v2248_v0 = vmul.f32 -1.442695, %v1377_v43  ;;  %v1378_v60 = vadd.f32 %v1376_v32, %v1348_v27  ;;  %v1388_v3 = vmul.f32 1.442695, %v1377_v43  ;;  %v2247_v43 = vld [vmem:[%s3971_s14 + $0x2] sm:$0x3] }
 0x3a3   :  { %v2624_v49 = vpop.eup %2623  ;;  %2627 = vpow2.f32 %v2245_v20  ;;  %v2246_v21 = vmul.f32 -1.442695, %v1351_v48 }
 0x3a4   :  { %v1144_v46 = vadd.f32 1.0, %v2624_v49  ;;  %2629 = vpow2.f32 %v1149_v28  ;;  %v1327_v57 = vpop.f32.mrb[24].mxu1  ;;  %v2249_v39 = vmul.f32 -1.442695, %v1378_v60 }
 0x3a5   :  { %v2626_v45 = vpop.eup %2625  ;;  %2631 = vpow2.f32 %v2248_v0  ;;  %v1404_v2 = vadd.f32 %v1327_v57, %v1210_v14  ;;  %v1329_v37 = vpop.f32.mrb[25].mxu1 }
 0x3a6   :  { %2633 = vrcp.f32 %v1144_v46  ;;  %v1156_v38 = vadd.f32 1.0, %v2626_v45  ;;  %v1433_v41 = vadd.f32 %v1329_v37, %v1210_v14  ;;  %v1331_v42 = vpop.f32.mrb[26].mxu1 }
 0x3a7   :  { %v1406_v51 = vadd.f32 %v1404_v2, %v1343_v18  ;;  %v1405_v53 = vadd.f32 %v1331_v42, %v1213_v50  ;;  %v1333_v29 = vpop.f32.mrb[27].mxu1 }
 0x3a8   :  { %2635 = vrcp.f32 %v1156_v38  ;;  %v1435_v52 = vadd.f32 %v1433_v41, %v1343_v18  ;;  %v1434_v9 = vadd.f32 %v1333_v29, %v1213_v50  ;;  %v2252_v29 = vld [vmem:[%s3971_s14 + $0x4] sm:$0x3] }
 0x3a9   :  { %2637 = vpow2.f32 %v2246_v21  ;;  %v2253_v58 = vmul.f32 -1.442695, %v1406_v51  ;;  %v1407_v5 = vadd.f32 %v1405_v53, %v1348_v27  ;;  %v1417_v12 = vmul.f32 1.442695, %v1406_v51 }
 0x3aa   :  { %2639 = vpow2.f32 %v2249_v39  ;;  %v2258_v56 = vmul.f32 -1.442695, %v1435_v52  ;;  %v1436_v55 = vadd.f32 %v1434_v9, %v1348_v27  ;;  %v1446_v14 = vmul.f32 1.442695, %v1435_v52 }
 0x3ab   :  { %2641 = vpow2.f32 %v2253_v58  ;;  %v2254_v30 = vmul.f32 -1.442695, %v1407_v5  ;;  %v2257_v58 = vld [vmem:[%s3971_s14 + $0x6] sm:$0x3] }
 0x3ac   :  { %2643 = vpow2.f32 %v1360_v47  ;;  %v2259_v44 = vmul.f32 -1.442695, %v1436_v55 }
 0x3ad   :  { %v2628_v25 = vpop.eup %2627  ;;  %2645 = vpow2.f32 %v2258_v56 }
 0x3ae   :  { %v2630_v24 = vpop.eup %2629  ;;  %v1356_v1 = vadd.f32 1.0, %v2628_v25  ;;  %2647 = vpow2.f32 %v1388_v3 }
 0x3af   :  { %v2632_v4 = vpop.eup %2631  ;;  %2649 = vpow2.f32 %v2254_v30  ;;  %v1151_v54 = vmul.f32 10.0, %v2630_v24  ;;  %v1152_v40 = vmul.f32 13.0, %v2630_v24 }
 0x3b0   :  { %v2634_v33 = vpop.eup %2633  ;;  %2651 = vrcp.f32 %v1356_v1  ;;  %v1384_v18 = vadd.f32 1.0, %v2632_v4 }
 0x3b1   :  { %v1147_v13 = vadd.f32 %v2634_v33, %v3770_v63  ;;  %2653 = vpow2.f32 %v2259_v44 }
 0x3b2   :  { %v2636_v35 = vpop.eup %2635  ;;  %2655 = vrcp.f32 %v1384_v18 }
 0x3b3   :  { %v2638_v17 = vpop.eup %2637  ;;  %v1148_v36 = vmul.f32 2.0, %v1147_v13  ;;  %1165 = vst [vmem:[%s3970_s15 + $0x8] sm:$0x1] %v2636_v35  ;;  %2657 = vpow2.f32 %v1417_v12 }
 0x3b4   :  { %v2640_v50 = vpop.eup %2639  ;;  %v1367_v23 = vadd.f32 1.0, %v2638_v17  ;;  %2659 = vpow2.f32 %v1446_v14  ;;  %v1476_v17 = vpop.permute.xlu0 %1475 }
 0x3b5   :  { %v2642_v26 = vpop.eup %2641  ;;  %v1160_v8 = vsel %vm1159_vm2, %v1148_v36, %v1151_v54  ;;  %v1395_v11 = vadd.f32 1.0, %v2640_v50 }
 0x3b6   :  { %v2644_v19 = vpop.eup %2643  ;;  %v1162_v59 = vsel %vm1161_vm3, %v1160_v8, %v1152_v40  ;;  %2661 = vrcp.f32 %v1367_v23  ;;  %v1413_v31 = vadd.f32 1.0, %v2642_v26 }
 0x3b7   :  { %v2646_v22 = vpop.eup %2645  ;;  %v1163_v34 = vsel %vm170_vm1, %v1162_v59, %v2634_v33  ;;  %2663 = vrcp.f32 %v1395_v11  ;;  %v1362_v0 = vmul.f32 10.0, %v2644_v19  ;;  %v1363_v49 = vmul.f32 13.0, %v2644_v19 }
 0x3b8   :  { %v2648_v27 = vpop.eup %2647  ;;  %1164 = vst [vmem:[%s3970_s15] sm:$0xff] %v1163_v34  ;;  %2665 = vrcp.f32 %v1413_v31  ;;  %v1442_v15 = vadd.f32 1.0, %v2646_v22 }
 0x3b9   :  { %v2650_v61 = vpop.eup %2649  ;;  %v1390_v21 = vmul.f32 10.0, %v2648_v27  ;;  %v1391_v38 = vmul.f32 13.0, %v2648_v27 }
 0x3ba   :  { %v2652_v28 = vpop.eup %2651  ;;  %2667 = vrcp.f32 %v1442_v15  ;;  %v1424_v32 = vadd.f32 1.0, %v2650_v61 }
 0x3bb   :  { %v2654_v20 = vpop.eup %2653  ;;  %v1359_v48 = vadd.f32 %v2652_v28, %v1352_v16 }
 0x3bc   :  { %v2656_v60 = vpop.eup %2655  ;;  %2669 = vrcp.f32 %v1424_v32  ;;  %v1453_v46 = vadd.f32 1.0, %v2654_v20  ;;  %v1713_v20 = vpop.permute.xlu1 %1712 }
 0x3bd   :  { %v1370_v57 = vsel %vm1159_vm2, %v1359_v48, %v1362_v0  ;;  %v1387_v45 = vadd.f32 %v2656_v60, %v2247_v43  ;;  %v2658_v2 = vpop.eup %2657 }
 0x3be   :  { %v1371_v37 = vsel %vm1161_vm3, %v1370_v57, %v1363_v49  ;;  %2671 = vrcp.f32 %v1453_v46  ;;  %v2660_v39 = vpop.eup %2659  ;;  %v1419_v3 = vmul.f32 10.0, %v2658_v2  ;;  %v1420_v55 = vmul.f32 13.0, %v2658_v2 }
 0x3bf   :  { %v1372_v41 = vsel %vm170_vm1, %v1371_v37, %v2652_v28  ;;  %v1398_v42 = vsel %vm1159_vm2, %v1387_v45, %v1390_v21  ;;  %v1448_v44 = vmul.f32 10.0, %v2660_v39  ;;  %v1449_v4 = vmul.f32 13.0, %v2660_v39 }
 0x3c0   :  { %v2662_v51 = vpop.eup %2661  ;;  %1373 = vst [vmem:[%s3972_s16] sm:$0xff] %v1372_v41  ;;  %v1399_v53 = vsel %vm1161_vm3, %v1398_v42, %v1391_v38 }
 0x3c1   :  { %v2664_v47 = vpop.eup %2663  ;;  %v1400_v52 = vsel %vm170_vm1, %v1399_v53, %v2656_v60  ;;  %1374 = vst [vmem:[%s3972_s16 + $0x8] sm:$0x1] %v2662_v51 }
 0x3c2   :  { %v2666_v9 = vpop.eup %2665  ;;  %2250 = vst [vmem:[%s3972_s16 + $0x10] sm:$0xff] %v1400_v52  ;;  %2251 = vst [vmem:[%s3972_s16 + $0x18] sm:$0x1] %v2664_v47 }
 0x3c3   :  { %v1416_v5 = vadd.f32 %v2666_v9, %v2252_v29 }
 0x3c4   :  { %v2668_v56 = vpop.eup %2667 }
 0x3c5   :  { %v1427_v30 = vsel %vm1159_vm2, %v1416_v5, %v1419_v3  ;;  %v1445_v25 = vadd.f32 %v2668_v56, %v2257_v58 }
 0x3c6   :  { %v2670_v24 = vpop.eup %2669  ;;  %v1428_v1 = vsel %vm1161_vm3, %v1427_v30, %v1420_v55 }
 0x3c7   :  { %v1429_v33 = vsel %vm170_vm1, %v1428_v1, %v2666_v9  ;;  %v1456_v18 = vsel %vm1159_vm2, %v1445_v25, %v1448_v44  ;;  %2256 = vst [vmem:[%s3972_s16 + $0x28] sm:$0x1] %v2670_v24 }
 0x3c8   :  { %v2672_v12 = vpop.eup %2671  ;;  %2255 = vst [vmem:[%s3972_s16 + $0x20] sm:$0xff] %v1429_v33  ;;  %v1457_v13 = vsel %vm1161_vm3, %v1456_v18, %v1449_v4 }
 0x3c9   :  { %v1458_v14 = vsel %vm170_vm1, %v1457_v13, %v2668_v56  ;;  %2261 = vst [vmem:[%s3972_s16 + $0x38] sm:$0x1] %v2672_v12 }
 0x3ca   :  { %2260 = vst [vmem:[%s3972_s16 + $0x30] sm:$0xff] %v1458_v14 }
 0x3d4   :  { %v1520_v35 = vpop.f32.mrb[20].mxu0 }
 0x3d5   :  { %v1521_v36 = vadd.f32 %v1520_v35, %v3759_v7  ;;  %v2524_v54 = vpop.f32.mrb[21].mxu0 }
 0x3d6   :  { %v1523_v50 = vpop.f32.mrb[22].mxu0 }
 0x3d7   :  { %v2268_v40 = vmul.f32 -1.442695, %v1521_v36  ;;  %v2525_v23 = vpop.f32.mrb[23].mxu0  ;;  %v1524_v26 = vadd.f32 %v1523_v50, %v1476_v17  ;;  %v1535_v59 = vmul.f32 1.442695, %v1521_v36 }
 0x3d9   :  { %2673 = vpow2.f32 %v2268_v40  ;;  %v2269_v8 = vmul.f32 -1.442695, %v1524_v26 }
 0x3db   :  { %2675 = vpow2.f32 %v2269_v8 }
 0x3dc   :  { %v1648_v11 = vpop.f32.mrb[24].mxu0  ;;  %2677 = vpow2.f32 %v1535_v59 }
 0x3dd   :  { %v1650_v19 = vpop.f32.mrb[25].mxu0 }
 0x3de   :  { %v1652_v31 = vpop.f32.mrb[26].mxu0 }
 0x3df   :  { %v1654_v22 = vpop.f32.mrb[27].mxu0 }
 0x3e3   :  { %v2674_v34 = vpop.eup %2673 }
 0x3e4   :  { %v1530_v27 = vadd.f32 1.0, %v2674_v34 }
 0x3e5   :  { %v2676_v16 = vpop.eup %2675  ;;  %v1596_v15 = vpop.f32.mrb[28].mxu1 }
 0x3e6   :  { %2679 = vrcp.f32 %v1530_v27  ;;  %v1703_v7 = vadd.f32 %v1648_v11, %v1596_v15  ;;  %v1741_v61 = vadd.f32 %v1650_v19, %v1596_v15  ;;  %v1542_v28 = vadd.f32 1.0, %v2676_v16  ;;  %v2544_v43 = vpop.f32.mrb[29].mxu1  ;;  %v2678_v37 = vpop.eup %2677 }
 0x3e7   :  { %v1599_v32 = vpop.f32.mrb[30].mxu1  ;;  %v1537_v53 = vmul.f32 16.0, %v2678_v37  ;;  %v1538_v44 = vmul.f32 30.0, %v2678_v37  ;;  %v2289_v43 = vld [vmem:[%s3971_s14 + $0x2] sm:$0x3] }
 0x3e8   :  { %v1715_v48 = vadd.f32 %v3763_v62, %v1703_v7  ;;  %v1743_v0 = vadd.f32 %v1741_v61, %v3763_v62  ;;  %2681 = vrcp.f32 %v1542_v28  ;;  %v1704_v60 = vadd.f32 %v1652_v31, %v1599_v32  ;;  %v2545_v49 = vpop.f32.mrb[31].mxu1 }
 0x3e9   :  { %v1742_v46 = vadd.f32 %v1654_v22, %v1599_v32 }
 0x3ea   :  { %v2285_v57 = vmul.f32 -1.442695, %v1715_v48  ;;  %v2290_v45 = vmul.f32 -1.442695, %v1743_v0  ;;  %v1716_v21 = vadd.f32 %v1713_v20, %v1704_v60  ;;  %v1725_v9 = vmul.f32 1.442695, %v1715_v48 }
 0x3eb   :  { %v1744_v2 = vadd.f32 %v1742_v46, %v1713_v20  ;;  %v1753_v33 = vmul.f32 1.442695, %v1743_v0 }
 0x3ec   :  { %2683 = vpow2.f32 %v2285_v57  ;;  %v2286_v38 = vmul.f32 -1.442695, %v1716_v21 }
 0x3ed   :  { %v2291_v39 = vmul.f32 -1.442695, %v1744_v2  ;;  %v1691_v41 = vpop.f32.mrb[32].mxu1  ;;  %2685 = vpow2.f32 %v2290_v45 }
 0x3ee   :  { %v1769_v42 = vadd.f32 %v1691_v41, %v1596_v15  ;;  %v1693_v51 = vpop.f32.mrb[33].mxu1  ;;  %2687 = vpow2.f32 %v2286_v38 }
 0x3ef   :  { %v1797_v29 = vadd.f32 %v1693_v51, %v1596_v15  ;;  %v1695_v47 = vpop.f32.mrb[34].mxu1  ;;  %2689 = vpow2.f32 %v2291_v39  ;;  %v1717_v15 = vld [vmem:[%s3971_s14] sm:$0x3] }
 0x3f0   :  { %v2680_v52 = vpop.eup %2679  ;;  %v1771_v58 = vadd.f32 %v1769_v42, %v3763_v62  ;;  %v1770_v5 = vadd.f32 %v1695_v47, %v1599_v32  ;;  %v1697_v3 = vpop.f32.mrb[35].mxu1 }
 0x3f1   :  { %v1533_v56 = vadd.f32 %v2680_v52, %v3770_v63  ;;  %v1799_v55 = vadd.f32 %v1797_v29, %v3763_v62  ;;  %v1798_v30 = vadd.f32 %v1697_v3, %v1599_v32  ;;  %v2294_v29 = vld [vmem:[%s3971_s14 + $0x4] sm:$0x3] }
 0x3f2   :  { %v2682_v25 = vpop.eup %2681  ;;  %v2295_v24 = vmul.f32 -1.442695, %v1771_v58  ;;  %v1772_v1 = vadd.f32 %v1770_v5, %v1713_v20  ;;  %v1781_v11 = vmul.f32 1.442695, %v1771_v58  ;;  %v2299_v58 = vld [vmem:[%s3971_s14 + $0x6] sm:$0x3] }
 0x3f3   :  { %v1534_v4 = vmul.f32 2.0, %v1533_v56  ;;  %2271 = vst [vmem:[%s3970_s15 + $0x18] sm:$0x1] %v2682_v25  ;;  %v2300_v18 = vmul.f32 -1.442695, %v1799_v55  ;;  %v1800_v12 = vadd.f32 %v1798_v30, %v1713_v20 }
 0x3f4   :  { %2691 = vpow2.f32 %v2295_v24  ;;  %v2296_v13 = vmul.f32 -1.442695, %v1772_v1  ;;  %v1809_v59 = vmul.f32 1.442695, %v1799_v55 }
 0x3f5   :  { %v1545_v14 = vsel %vm1159_vm2, %v1534_v4, %v1537_v53  ;;  %2693 = vpow2.f32 %v1725_v9  ;;  %v2301_v17 = vmul.f32 -1.442695, %v1800_v12 }
 0x3f6   :  { %v2684_v35 = vpop.eup %2683  ;;  %v1546_v62 = vsel %vm1161_vm3, %v1545_v14, %v1538_v44  ;;  %2695 = vpow2.f32 %v2300_v18 }
 0x3f7   :  { %v1547_v36 = vsel %vm170_vm1, %v1546_v62, %v2680_v52  ;;  %v1721_v54 = vadd.f32 1.0, %v2684_v35  ;;  %2697 = vpow2.f32 %v1753_v33  ;;  %v2686_v50 = vpop.eup %2685  ;;  %v1839_v62 = vpop.permute.xlu0 %1838 }
 0x3f8   :  { %2270 = vst [vmem:[%s3970_s15 + $0x10] sm:$0xff] %v1547_v36  ;;  %2699 = vpow2.f32 %v2296_v13  ;;  %v1749_v40 = vadd.f32 1.0, %v2686_v50  ;;  %v2688_v23 = vpop.eup %2687 }
 0x3f9   :  { %2701 = vrcp.f32 %v1721_v54  ;;  %v2690_v26 = vpop.eup %2689  ;;  %v1732_v8 = vadd.f32 1.0, %v2688_v23 }
 0x3fa   :  { %2703 = vpow2.f32 %v2301_v17  ;;  %v1760_v19 = vadd.f32 1.0, %v2690_v26 }
 0x3fb   :  { %2705 = vrcp.f32 %v1749_v40 }
 0x3fc   :  { %2707 = vrcp.f32 %v1732_v8 }
 0x3fd   :  { %2709 = vrcp.f32 %v1760_v19 }
 0x3fe   :  { %v2692_v31 = vpop.eup %2691  ;;  %2711 = vpow2.f32 %v1781_v11 }
 0x3ff   :  { %v2694_v22 = vpop.eup %2693  ;;  %v1777_v34 = vadd.f32 1.0, %v2692_v31  ;;  %2713 = vpow2.f32 %v1809_v59 }
 0x400   :  { %v2696_v27 = vpop.eup %2695  ;;  %v1727_v0 = vmul.f32 16.0, %v2694_v22  ;;  %v1728_v49 = vmul.f32 30.0, %v2694_v22 }
 0x401   :  { %v2698_v16 = vpop.eup %2697  ;;  %2715 = vrcp.f32 %v1777_v34  ;;  %v1805_v7 = vadd.f32 1.0, %v2696_v27 }
 0x402   :  { %v2700_v61 = vpop.eup %2699  ;;  %v1755_v21 = vmul.f32 16.0, %v2698_v16  ;;  %v1756_v38 = vmul.f32 30.0, %v2698_v16 }
 0x403   :  { %v2702_v28 = vpop.eup %2701  ;;  %2717 = vrcp.f32 %v1805_v7  ;;  %v1788_v32 = vadd.f32 1.0, %v2700_v61 }
 0x404   :  { %v2704_v20 = vpop.eup %2703  ;;  %v1724_v48 = vadd.f32 %v2702_v28, %v1717_v15 }
 0x405   :  { %v2706_v60 = vpop.eup %2705  ;;  %2719 = vrcp.f32 %v1788_v32  ;;  %v1816_v46 = vadd.f32 1.0, %v2704_v20 }
 0x406   :  { %v1735_v57 = vsel %vm1159_vm2, %v1724_v48, %v1727_v0  ;;  %v1752_v45 = vadd.f32 %v2706_v60, %v2289_v43  ;;  %v2708_v2 = vpop.eup %2707  ;;  %v2076_v0 = vpop.permute.xlu1 %2075 }
 0x407   :  { %v1736_v37 = vsel %vm1161_vm3, %v1735_v57, %v1728_v49  ;;  %2721 = vrcp.f32 %v1816_v46  ;;  %v2710_v39 = vpop.eup %2709  ;;  %2288 = vst [vmem:[%s3972_s16 + $0x48] sm:$0x1] %v2708_v2 }
 0x408   :  { %v1737_v41 = vsel %vm170_vm1, %v1736_v37, %v2702_v28  ;;  %v1763_v42 = vsel %vm1159_vm2, %v1752_v45, %v1755_v21  ;;  %v2712_v51 = vpop.eup %2711  ;;  %2293 = vst [vmem:[%s3972_s16 + $0x58] sm:$0x1] %v2710_v39 }
 0x409   :  { %2287 = vst [vmem:[%s3972_s16 + $0x40] sm:$0xff] %v1737_v41  ;;  %v1764_v53 = vsel %vm1161_vm3, %v1763_v42, %v1756_v38  ;;  %v2714_v47 = vpop.eup %2713  ;;  %v1783_v3 = vmul.f32 16.0, %v2712_v51  ;;  %v1784_v55 = vmul.f32 30.0, %v2712_v51 }
 0x40a   :  { %v1765_v52 = vsel %vm170_vm1, %v1764_v53, %v2706_v60  ;;  %v1811_v44 = vmul.f32 16.0, %v2714_v47  ;;  %v1812_v4 = vmul.f32 30.0, %v2714_v47 }
 0x40b   :  { %v2716_v9 = vpop.eup %2715  ;;  %2292 = vst [vmem:[%s3972_s16 + $0x50] sm:$0xff] %v1765_v52 }
 0x40c   :  { %v1780_v5 = vadd.f32 %v2716_v9, %v2294_v29 }
 0x40d   :  { %v2718_v56 = vpop.eup %2717 }
 0x40e   :  { %v1791_v30 = vsel %vm1159_vm2, %v1780_v5, %v1783_v3  ;;  %v1808_v25 = vadd.f32 %v2718_v56, %v2299_v58 }
 0x40f   :  { %v2720_v24 = vpop.eup %2719  ;;  %v1792_v1 = vsel %vm1161_vm3, %v1791_v30, %v1784_v55 }
 0x410   :  { %v1793_v33 = vsel %vm170_vm1, %v1792_v1, %v2716_v9  ;;  %v1819_v18 = vsel %vm1159_vm2, %v1808_v25, %v1811_v44  ;;  %2298 = vst [vmem:[%s3972_s16 + $0x68] sm:$0x1] %v2720_v24 }
 0x411   :  { %v2722_v12 = vpop.eup %2721  ;;  %2297 = vst [vmem:[%s3972_s16 + $0x60] sm:$0xff] %v1793_v33  ;;  %v1820_v13 = vsel %vm1161_vm3, %v1819_v18, %v1812_v4 }
 0x412   :  { %v1821_v14 = vsel %vm170_vm1, %v1820_v13, %v2718_v56  ;;  %2303 = vst [vmem:[%s3972_s16 + $0x78] sm:$0x1] %v2722_v12 }
 0x413   :  { %2302 = vst [vmem:[%s3972_s16 + $0x70] sm:$0xff] %v1821_v14 }
 0x41d   :  { %v1883_v35 = vpop.f32.mrb[28].mxu0 }
 0x41e   :  { %v1884_v17 = vadd.f32 %v1883_v35, %v3761_v10  ;;  %v2564_v36 = vpop.f32.mrb[29].mxu0 }
 0x41f   :  { %v1886_v54 = vpop.f32.mrb[30].mxu0 }
 0x420   :  { %v2310_v50 = vmul.f32 -1.442695, %v1884_v17  ;;  %v1887_v40 = vadd.f32 %v1886_v54, %v1839_v62  ;;  %v2565_v23 = vpop.f32.mrb[31].mxu0  ;;  %v1898_v31 = vmul.f32 1.442695, %v1884_v17 }
 0x422   :  { %2723 = vpow2.f32 %v2310_v50  ;;  %v2311_v26 = vmul.f32 -1.442695, %v1887_v40 }
 0x424   :  { %2725 = vpow2.f32 %v2311_v26 }
 0x425   :  { %v2011_v8 = vpop.f32.mrb[32].mxu0  ;;  %2727 = vpow2.f32 %v1898_v31 }
 0x426   :  { %v2013_v11 = vpop.f32.mrb[33].mxu0 }
 0x427   :  { %v2015_v19 = vpop.f32.mrb[34].mxu0 }
 0x428   :  { %v2017_v59 = vpop.f32.mrb[35].mxu0 }
 0x42c   :  { %v2724_v22 = vpop.eup %2723 }
 0x42d   :  { %v1893_v34 = vadd.f32 1.0, %v2724_v22  ;;  %v2080_v22 = vld [vmem:[%s3971_s14] sm:$0x3] }
 0x42e   :  { %v2726_v27 = vpop.eup %2725  ;;  %v1959_v16 = vpop.f32.mrb[36].mxu1 }
 0x42f   :  { %2729 = vrcp.f32 %v1893_v34  ;;  %v1905_v10 = vadd.f32 1.0, %v2726_v27  ;;  %v2066_v15 = vadd.f32 %v2011_v8, %v1959_v16  ;;  %v2104_v7 = vadd.f32 %v2013_v11, %v1959_v16  ;;  %v2584_v61 = vpop.f32.mrb[37].mxu1  ;;  %v2728_v41 = vpop.eup %2727 }
 0x430   :  { %v1962_v28 = vpop.f32.mrb[38].mxu1  ;;  %v1900_v55 = vmul.f32 33.0, %v2728_v41  ;;  %v1901_v33 = vmul.f32 23.0, %v2728_v41 }
 0x431   :  { %2731 = vrcp.f32 %v1905_v10  ;;  %v2078_v43 = vadd.f32 %v3765_v6, %v2066_v15  ;;  %v2106_v32 = vadd.f32 %v2104_v7, %v3765_v6  ;;  %v2067_v20 = vadd.f32 %v2015_v19, %v1962_v28  ;;  %v2585_v48 = vpop.f32.mrb[39].mxu1  ;;  %v2331_v10 = vld [vmem:[%s3971_s14 + $0x2] sm:$0x3] }
 0x432   :  { %v2105_v60 = vadd.f32 %v2017_v59, %v1962_v28 }
 0x433   :  { %v2327_v49 = vmul.f32 -1.442695, %v2078_v43  ;;  %v2332_v46 = vmul.f32 -1.442695, %v2106_v32  ;;  %v2079_v57 = vadd.f32 %v2076_v0, %v2067_v20  ;;  %v2088_v29 = vmul.f32 1.442695, %v2078_v43 }
 0x434   :  { %v2107_v45 = vadd.f32 %v2105_v60, %v2076_v0  ;;  %v2116_v24 = vmul.f32 1.442695, %v2106_v32 }
 0x435   :  { %2733 = vpow2.f32 %v2327_v49  ;;  %v2328_v21 = vmul.f32 -1.442695, %v2079_v57 }
 0x436   :  { %v2333_v2 = vmul.f32 -1.442695, %v2107_v45  ;;  %v2054_v37 = vpop.f32.mrb[40].mxu1  ;;  %2735 = vpow2.f32 %v2332_v46 }
 0x437   :  { %v2132_v38 = vadd.f32 %v2054_v37, %v1959_v16  ;;  %v2056_v39 = vpop.f32.mrb[41].mxu1  ;;  %2737 = vpow2.f32 %v2328_v21 }
 0x438   :  { %v2160_v42 = vadd.f32 %v2056_v39, %v1959_v16  ;;  %v2058_v51 = vpop.f32.mrb[42].mxu1  ;;  %2739 = vpow2.f32 %v2333_v2  ;;  %v2336_v39 = vld [vmem:[%s3971_s14 + $0x4] sm:$0x3] }
 0x439   :  { %v2730_v53 = vpop.eup %2729  ;;  %v2134_v47 = vadd.f32 %v2132_v38, %v3765_v6  ;;  %v2133_v52 = vadd.f32 %v2058_v51, %v1962_v28  ;;  %v2060_v9 = vpop.f32.mrb[43].mxu1 }
 0x43a   :  { %v1896_v58 = vadd.f32 %v2730_v53, %v3770_v63  ;;  %v2162_v5 = vadd.f32 %v2160_v42, %v3765_v6  ;;  %v2161_v3 = vadd.f32 %v2060_v9, %v1962_v28 }
 0x43b   :  { %v2732_v56 = vpop.eup %2731  ;;  %v2337_v30 = vmul.f32 -1.442695, %v2134_v47  ;;  %v2135_v25 = vadd.f32 %v2133_v52, %v2076_v0  ;;  %v2144_v40 = vmul.f32 1.442695, %v2134_v47 }
 0x43c   :  { %v1897_v44 = vmul.f32 2.0, %v1896_v58  ;;  %2313 = vst [vmem:[%s3970_s15 + $0x28] sm:$0x1] %v2732_v56  ;;  %v2342_v1 = vmul.f32 -1.442695, %v2162_v5  ;;  %v2163_v4 = vadd.f32 %v2161_v3, %v2076_v0 }
 0x43d   :  { %2741 = vpow2.f32 %v2337_v30  ;;  %v2338_v18 = vmul.f32 -1.442695, %v2135_v25  ;;  %v2172_v26 = vmul.f32 1.442695, %v2162_v5 }
 0x43e   :  { %v1908_v63 = vsel %vm1159_vm2, %v1897_v44, %v1900_v55  ;;  %2743 = vpow2.f32 %v2088_v29  ;;  %v2343_v13 = vmul.f32 -1.442695, %v2163_v4 }
 0x43f   :  { %v2734_v6 = vpop.eup %2733  ;;  %v1909_v12 = vsel %vm1161_vm3, %v1908_v63, %v1901_v33  ;;  %2745 = vpow2.f32 %v2342_v1 }
 0x440   :  { %v1910_v14 = vsel %vm170_vm1, %v1909_v12, %v2730_v53  ;;  %v2084_v35 = vadd.f32 1.0, %v2734_v6  ;;  %2747 = vpow2.f32 %v2116_v24  ;;  %v2736_v62 = vpop.eup %2735  ;;  %v2341_v53 = vld [vmem:[%s3971_s14 + $0x6] sm:$0x3] }
 0x441   :  { %2312 = vst [vmem:[%s3970_s15 + $0x20] sm:$0xff] %v1910_v14  ;;  %2749 = vpow2.f32 %v2338_v18  ;;  %v2112_v17 = vadd.f32 1.0, %v2736_v62  ;;  %v2738_v36 = vpop.eup %2737 }
 0x442   :  { %2751 = vrcp.f32 %v2084_v35  ;;  %v2740_v54 = vpop.eup %2739  ;;  %v2095_v50 = vadd.f32 1.0, %v2738_v36 }
 0x443   :  { %2753 = vpow2.f32 %v2343_v13  ;;  %v2123_v23 = vadd.f32 1.0, %v2740_v54 }
 0x444   :  { %2755 = vrcp.f32 %v2112_v17 }
 0x445   :  { %2757 = vrcp.f32 %v2095_v50 }
 0x446   :  { %2759 = vrcp.f32 %v2123_v23 }
 0x447   :  { %v2742_v8 = vpop.eup %2741  ;;  %2761 = vpow2.f32 %v2144_v40 }
 0x448   :  { %v2744_v11 = vpop.eup %2743  ;;  %v2140_v19 = vadd.f32 1.0, %v2742_v8  ;;  %2763 = vpow2.f32 %v2172_v26 }
 0x449   :  { %v2746_v59 = vpop.eup %2745  ;;  %v2090_v28 = vmul.f32 33.0, %v2744_v11  ;;  %v2091_v32 = vmul.f32 23.0, %v2744_v11 }
 0x44a   :  { %v2748_v31 = vpop.eup %2747  ;;  %2765 = vrcp.f32 %v2140_v19  ;;  %v2168_v34 = vadd.f32 1.0, %v2746_v59 }
 0x44b   :  { %v2750_v27 = vpop.eup %2749  ;;  %v2118_v60 = vmul.f32 33.0, %v2748_v31  ;;  %v2119_v57 = vmul.f32 23.0, %v2748_v31 }
 0x44c   :  { %v2752_v16 = vpop.eup %2751  ;;  %2767 = vrcp.f32 %v2168_v34  ;;  %v2151_v15 = vadd.f32 1.0, %v2750_v27 }
 0x44d   :  { %v2754_v7 = vpop.eup %2753  ;;  %v2087_v61 = vadd.f32 %v2752_v16, %v2080_v22 }
 0x44e   :  { %v2756_v43 = vpop.eup %2755  ;;  %2769 = vrcp.f32 %v2151_v15  ;;  %v2179_v20 = vadd.f32 1.0, %v2754_v7 }
 0x44f   :  { %v2098_v48 = vsel %vm1159_vm2, %v2087_v61, %v2090_v28  ;;  %v2115_v0 = vadd.f32 %v2756_v43, %v2331_v10  ;;  %v2758_v49 = vpop.eup %2757 }
 0x450   :  { %v2099_v46 = vsel %vm1161_vm3, %v2098_v48, %v2091_v32  ;;  %2771 = vrcp.f32 %v2179_v20  ;;  %v2760_v45 = vpop.eup %2759  ;;  %2330 = vst [vmem:[%s3972_s16 + $0x88] sm:$0x1] %v2758_v49 }
 0x451   :  { %v2100_v21 = vsel %vm170_vm1, %v2099_v46, %v2752_v16  ;;  %v2126_v2 = vsel %vm1159_vm2, %v2115_v0, %v2118_v60  ;;  %v2762_v37 = vpop.eup %2761  ;;  %2335 = vst [vmem:[%s3972_s16 + $0x98] sm:$0x1] %v2760_v45 }
 0x452   :  { %2329 = vst [vmem:[%s3972_s16 + $0x80] sm:$0xff] %v2100_v21  ;;  %v2127_v38 = vsel %vm1161_vm3, %v2126_v2, %v2119_v57  ;;  %v2764_v41 = vpop.eup %2763  ;;  %v2146_v47 = vmul.f32 33.0, %v2762_v37  ;;  %v2147_v9 = vmul.f32 23.0, %v2762_v37 }
 0x453   :  { %v2128_v42 = vsel %vm170_vm1, %v2127_v38, %v2756_v43  ;;  %v2174_v3 = vmul.f32 33.0, %v2764_v41  ;;  %v2175_v30 = vmul.f32 23.0, %v2764_v41 }
 0x454   :  { %v2766_v51 = vpop.eup %2765  ;;  %2334 = vst [vmem:[%s3972_s16 + $0x90] sm:$0xff] %v2128_v42 }
 0x455   :  { %v2143_v29 = vadd.f32 %v2766_v51, %v2336_v39 }
 0x456   :  { %v2768_v52 = vpop.eup %2767 }
 0x457   :  { %v2154_v58 = vsel %vm1159_vm2, %v2143_v29, %v2146_v47  ;;  %v2171_v5 = vadd.f32 %v2768_v52, %v2341_v53 }
 0x458   :  { %v2770_v56 = vpop.eup %2769  ;;  %v2155_v55 = vsel %vm1161_vm3, %v2154_v58, %v2147_v9 }
 0x459   :  { %v2156_v25 = vsel %vm170_vm1, %v2155_v55, %v2766_v51  ;;  %v2182_v44 = vsel %vm1159_vm2, %v2171_v5, %v2174_v3  ;;  %2340 = vst [vmem:[%s3972_s16 + $0xa8] sm:$0x1] %v2770_v56 }
 0x45a   :  { %v2772_v24 = vpop.eup %2771  ;;  %2339 = vst [vmem:[%s3972_s16 + $0xa0] sm:$0xff] %v2156_v25  ;;  %v2183_v1 = vsel %vm1161_vm3, %v2182_v44, %v2175_v30 }
 0x45b   :  { %v2184_v4 = vsel %vm170_vm1, %v2183_v1, %v2768_v52  ;;  %2345 = vst [vmem:[%s3972_s16 + $0xb8] sm:$0x1] %v2772_v24 }
 0x45c   :  { %2344 = vst [vmem:[%s3972_s16 + $0xb0] sm:$0xff] %v2184_v4 }

</bundles_post_ra>
